<compile_context>
chip_gen: v6e
topology: v6e:2x2x1
jax: 0.10.0
libtpu: 0.0.40
codegen_flags: <defaults>
</compile_context>

<pallas_src>
import functools

import jax
import jax.numpy as jnp
from jax import lax
from jax.experimental import pallas as pl
from jax.experimental.pallas import tpu as pltpu


_GELU_TANH_APPROX = True               # EUP tanh-GELU; False -> PyTorch-exact erf GELU.
_HEAVY_VMEM_BYTES = 48 * 1024 * 1024   # < v7x 64 MiB physical; > 32 MiB scoped default.

_CP_LIGHT = pltpu.CompilerParams(dimension_semantics=("parallel",))
_CP_HEAVY = pltpu.CompilerParams(dimension_semantics=("parallel",),
                                 vmem_limit_bytes=_HEAVY_VMEM_BYTES)
_CP_FLASH = pltpu.CompilerParams(dimension_semantics=("parallel", "parallel"),
                                 vmem_limit_bytes=_HEAVY_VMEM_BYTES)


def _pick_tile(L, candidates=(512, 256, 128, 64, 32, 16, 8)):
    for t in candidates:
        if L % t == 0:
            return t
    return L


def _group_mean_rstd(x, cg, gc, cnt, eps):
    """Per-channel GroupNorm mean / rsqrt(var+eps) for a (L, C) f32 tile.

    cg: (C, G) 0/1 channel->group map, gc: (G, C) group->channel map.  Exact f32.
    """
    s = jnp.sum(x, axis=0, keepdims=True)                         # (1, C)
    sq = jnp.sum(x * x, axis=0, keepdims=True)
    sg = jnp.dot(s, cg, preferred_element_type=jnp.float32)       # (1, G)
    sqg = jnp.dot(sq, cg, preferred_element_type=jnp.float32)
    mean_g = sg / cnt
    var_g = sqg / cnt - mean_g * mean_g
    rstd_g = lax.rsqrt(var_g + eps)
    mean = jnp.dot(mean_g, gc, preferred_element_type=jnp.float32)  # (1, C)
    rstd = jnp.dot(rstd_g, gc, preferred_element_type=jnp.float32)
    return mean, rstd


# ------------------------------------------------------------------ kernels --

def _embed_conv_kernel(x_ref, w_ref, b_ref, o_ref, xbuf_ref, *, K, L):
    # x_ref: (1, L, Cin) unpadded.  Zero-padded frame built in VMEM (no XLA pad).
    x = x_ref[0].astype(jnp.float32)                       # (L, Cin)
    Cin = x.shape[1]
    pad = (K - 1) // 2
    zhalo = jnp.zeros((pad, Cin), jnp.float32)
    xbuf_ref[0:pad, :] = zhalo
    xbuf_ref[L + pad:L + 2 * pad, :] = zhalo
    xbuf_ref[pad:pad + L, :] = x
    xp = xbuf_ref[...]                                     # (L + 2*pad, Cin)
    w = w_ref[...]                                         # (K, Cin, Cout) bf16
    # TODO(synk): stack the K shifted slices into one (L, K*Cin) operand for a
    # single MXU matmul (Cin is small, so each tap under-fills the MXU).
    acc = jnp.zeros((L, w.shape[2]), jnp.float32)
    for k in range(K):
        acc = acc + jnp.dot(xp[k:k + L, :].astype(jnp.bfloat16), w[k],
                            preferred_element_type=jnp.float32)
    o_ref[0] = (acc + b_ref[...]).astype(o_ref.dtype)


def _resnet_kernel(x_ref, cg_ref, gc_ref,
                   gn1w_ref, gn1b_ref, w1_ref, b1_ref,
                   gn2w_ref, gn2b_ref, w2_ref, b2_ref,
                   o_ref, hbuf_ref, h2buf_ref, *, groups, eps, L):
    # Fully fused ResnetBlock:
    #   GN1 + swish + conv1(k=3,pad=1) + GN2 + swish + conv2(k=3,pad=1) + residual.
    x = x_ref[0].astype(jnp.float32)                       # (L, C)
    C = x.shape[1]
    cg = cg_ref[...]
    gc = gc_ref[...]
    cnt = float((L * C) // groups)

    # ---- GroupNorm1 + swish (stats over the unpadded tile)
    mean1, rstd1 = _group_mean_rstd(x, cg, gc, cnt, eps)
    h = (x - mean1) * rstd1 * gn1w_ref[...] + gn1b_ref[...]
    h = h * jax.nn.sigmoid(h)

    # ---- zero-padded frame of h in VMEM: rows [2, L+2) <- h, halo rows <- 0
    zhalo = jnp.zeros((2, C), jnp.float32)
    hbuf_ref[0:2, :] = zhalo
    hbuf_ref[L + 2:L + 4, :] = zhalo
    hbuf_ref[2:L + 2, :] = h
    hp = hbuf_ref[...]                                     # (L+4, C)

    # ---- conv1 (k=3) on the extended frame -> (L+2, C); valid rows are [1, L+1)
    w1 = w1_ref[...]                                       # (3, C, C) bf16
    c1 = jnp.dot(hp[0:L + 2, :].astype(jnp.bfloat16), w1[0],
                 preferred_element_type=jnp.float32)
    c1 = c1 + jnp.dot(hp[1:L + 3, :].astype(jnp.bfloat16), w1[1],
                      preferred_element_type=jnp.float32)
    c1 = c1 + jnp.dot(hp[2:L + 4, :].astype(jnp.bfloat16), w1[2],
                      preferred_element_type=jnp.float32)
    c1 = c1 + b1_ref[...]
    c1v = c1[1:L + 1, :]                                   # conv1 output (L, C)

    # ---- GroupNorm2 + swish on the valid rows only
    mean2, rstd2 = _group_mean_rstd(c1v, cg, gc, cnt, eps)
    h2 = (c1v - mean2) * rstd2 * gn2w_ref[...] + gn2b_ref[...]
    h2 = h2 * jax.nn.sigmoid(h2)
    # dropout: eval mode -> identity

    # ---- zero-padded frame of h2: rows [1, L+1) <- h2, rows 0 / L+1 <- 0
    zrow = jnp.zeros((1, C), jnp.float32)
    h2buf_ref[0:1, :] = zrow
    h2buf_ref[L + 1:L + 2, :] = zrow
    h2buf_ref[1:L + 1, :] = h2
    h2p = h2buf_ref[...]                                   # (L+2, C)

    # ---- conv2 (k=3) -> (L, C), fused residual
    w2 = w2_ref[...]                                       # (3, C, C) bf16
    c2 = jnp.dot(h2p[0:L, :].astype(jnp.bfloat16), w2[0],
                 preferred_element_type=jnp.float32)
    c2 = c2 + jnp.dot(h2p[1:L + 1, :].astype(jnp.bfloat16), w2[1],
                      preferred_element_type=jnp.float32)
    c2 = c2 + jnp.dot(h2p[2:L + 2, :].astype(jnp.bfloat16), w2[2],
                      preferred_element_type=jnp.float32)
    c2 = c2 + b2_ref[...]

    o_ref[0] = (x + c2).astype(o_ref.dtype)


def _attn_qkv_kernel(x_ref, cg_ref, gc_ref, gnw_ref, gnb_ref,
                     wq_ref, bq_ref, wk_ref, bk_ref, wv_ref, bv_ref,
                     q_ref, k_ref, v_ref, *, groups, eps):
    # GroupNorm + 1x1-conv q/k/v projections (bf16 MXU, f32 accumulate).
    x = x_ref[0].astype(jnp.float32)                       # (L, C)
    L, C = x.shape
    cnt = float((L * C) // groups)
    mean, rstd = _group_mean_rstd(x, cg_ref[...], gc_ref[...], cnt, eps)
    h = ((x - mean) * rstd * gnw_ref[...] + gnb_ref[...]).astype(jnp.bfloat16)
    q = jnp.dot(h, wq_ref[...], preferred_element_type=jnp.float32) + bq_ref[...]
    k = jnp.dot(h, wk_ref[...], preferred_element_type=jnp.float32) + bk_ref[...]
    v = jnp.dot(h, wv_ref[...], preferred_element_type=jnp.float32) + bv_ref[...]
    q_ref[0] = q.astype(jnp.bfloat16)
    k_ref[0] = k.astype(jnp.bfloat16)
    v_ref[0] = v.astype(jnp.bfloat16)


def _attn_tiled_kernel(x_ref, q_ref, k_ref, v_ref, wp_ref, bp_ref, o_ref, *, scale):
    # One q-tile of softmax(q k^T / sqrt(C)) v, plus 1x1 proj_out and residual.
    # Live logits are (TQ, L) instead of (L, L).
    q = q_ref[0]                                           # (TQ, C) bf16
    k = k_ref[0]                                           # (L,  C) bf16
    v = v_ref[0]                                           # (L,  C) bf16
    logits = lax.dot_general(q, k, (((1,), (1,)), ((), ())),
                             preferred_element_type=jnp.float32) * scale
    logits = logits - jnp.max(logits, axis=-1, keepdims=True)
    p = jnp.exp(logits)
    attn = p * pl.reciprocal(jnp.sum(p, axis=-1, keepdims=True), approx=True)
    out = jnp.dot(attn.astype(jnp.bfloat16), v, preferred_element_type=jnp.float32)
    out = jnp.dot(out.astype(jnp.bfloat16), wp_ref[...],
                  preferred_element_type=jnp.float32) + bp_ref[...]
    o_ref[0] = (x_ref[0].astype(jnp.float32) + out).astype(o_ref.dtype)


def _gn_ln_kernel(x_ref, cg_ref, gc_ref, gw_ref, gb_ref, lw_ref, lb_ref, o_ref,
                  *, groups, eps):
    # pos_net final GroupNorm fused with the backbone LayerNorm (over channels).
    x = x_ref[0].astype(jnp.float32)                       # (L, C)
    L, C = x.shape
    cnt = float((L * C) // groups)
    mean, rstd = _group_mean_rstd(x, cg_ref[...], gc_ref[...], cnt, eps)
    h = (x - mean) * rstd * gw_ref[...] + gb_ref[...]
    m = jnp.mean(h, axis=-1, keepdims=True)
    hc = h - m
    v = jnp.mean(hc * hc, axis=-1, keepdims=True)
    y = hc * lax.rsqrt(v + eps) * lw_ref[...] + lb_ref[...]
    o_ref[0] = y.astype(o_ref.dtype)


def _convnext_kernel(x_ref, dww_ref, dwb_ref, lnw_ref, lnb_ref,
                     w1_ref, b1_ref, w2_ref, b2_ref, gamma_ref,
                     fw_ref, fb_ref, o_ref, xbuf_ref, *, K, L, eps, apply_final_ln):
    # Fused ConvNeXt block: depthwise conv(k=7) + LayerNorm + MLP(GELU) + gamma +
    # residual (+ optional trailing final LayerNorm fused into the last block).
    x = x_ref[0].astype(jnp.float32)                       # (L, C)
    C = x.shape[1]
    pad = (K - 1) // 2
    zhalo = jnp.zeros((pad, C), jnp.float32)
    xbuf_ref[0:pad, :] = zhalo
    xbuf_ref[L + pad:L + 2 * pad, :] = zhalo
    xbuf_ref[pad:pad + L, :] = x
    xp = xbuf_ref[...]                                     # (L + 2*pad, C)
    dww = dww_ref[...]                                     # (K, C) f32
    h = jnp.zeros((L, C), jnp.float32)
    for k in range(K):
        h = h + xp[k:k + L, :] * dww[k:k + 1, :]
    h = h + dwb_ref[...]
    # LayerNorm over channels
    mean = jnp.mean(h, axis=-1, keepdims=True)
    hc = h - mean
    var = jnp.mean(hc * hc, axis=-1, keepdims=True)
    h = hc * lax.rsqrt(var + eps) * lnw_ref[...] + lnb_ref[...]
    # pointwise MLP (bf16 MXU, f32 accumulate)
    g = jnp.dot(h.astype(jnp.bfloat16), w1_ref[...],
                preferred_element_type=jnp.float32) + b1_ref[...]
    if _GELU_TANH_APPROX:
        # tanh approximation -> EUP transcendental (keeps the VALU slot free)
        g = 0.5 * g * (1.0 + jnp.tanh(0.7978845608028654 * (g + 0.044715 * g * g * g)))
    else:
        g = 0.5 * g * (1.0 + lax.erf(g * 0.7071067811865476))
    y = jnp.dot(g.astype(jnp.bfloat16), w2_ref[...],
                preferred_element_type=jnp.float32) + b2_ref[...]
    y = x + y * gamma_ref[...]
    if apply_final_ln:
        m = jnp.mean(y, axis=-1, keepdims=True)
        yc = y - m
        vv = jnp.mean(yc * yc, axis=-1, keepdims=True)
        y = yc * lax.rsqrt(vv + eps) * fw_ref[...] + fb_ref[...]
    o_ref[0] = y.astype(o_ref.dtype)


# ----------------------------------------------------------------- wrappers --

def embed_conv(x, w, b):
    # x: (B, L, Cin)   w: (K, Cin, Cout) bf16   b: (Cout,) f32
    B, L, Cin = x.shape
    K, _, Cout = w.shape
    pad = (K - 1) // 2
    return pl.pallas_call(
        functools.partial(_embed_conv_kernel, K=K, L=L),
        out_shape=jax.ShapeDtypeStruct((B, L, Cout), x.dtype),
        grid=(B,),
        in_specs=[pl.BlockSpec((1, L, Cin), lambda i: (i, 0, 0)),
                  pl.BlockSpec((K, Cin, Cout), lambda i: (0, 0, 0)),
                  pl.BlockSpec((1, Cout), lambda i: (0, 0))],
        out_specs=pl.BlockSpec((1, L, Cout), lambda i: (i, 0, 0)),
        scratch_shapes=[pltpu.VMEM((L + 2 * pad, Cin), jnp.float32)],
        compiler_params=_CP_LIGHT,
    )(x, w, b.reshape(1, Cout))


def resnet_block(x, p, cg, gc, *, num_groups=32, eps=1e-6):
    B, L, C = x.shape
    G = num_groups
    v2 = lambda i: (0, 0)
    v3 = lambda i: (0, 0, 0)
    return pl.pallas_call(
        functools.partial(_resnet_kernel, groups=G, eps=eps, L=L),
        out_shape=jax.ShapeDtypeStruct((B, L, C), x.dtype),
        grid=(B,),
        in_specs=[pl.BlockSpec((1, L, C), lambda i: (i, 0, 0)),
                  pl.BlockSpec((C, G), v2), pl.BlockSpec((G, C), v2),      # group maps
                  pl.BlockSpec((1, C), v2), pl.BlockSpec((1, C), v2),      # gn1
                  pl.BlockSpec((3, C, C), v3), pl.BlockSpec((1, C), v2),   # conv1
                  pl.BlockSpec((1, C), v2), pl.BlockSpec((1, C), v2),      # gn2
                  pl.BlockSpec((3, C, C), v3), pl.BlockSpec((1, C), v2)],  # conv2
        out_specs=pl.BlockSpec((1, L, C), lambda i: (i, 0, 0)),
        scratch_shapes=[pltpu.VMEM((L + 4, C), jnp.float32),
                        pltpu.VMEM((L + 2, C), jnp.float32)],
        compiler_params=_CP_HEAVY,
    )(x, cg, gc,
      p['gn1_w'].reshape(1, C), p['gn1_b'].reshape(1, C),
      p['conv1_w'], p['conv1_b'].reshape(1, C),
      p['gn2_w'].reshape(1, C), p['gn2_b'].reshape(1, C),
      p['conv2_w'], p['conv2_b'].reshape(1, C))


def attn_block(x, p, cg, gc, *, num_groups=32, eps=1e-6):
    B, L, C = x.shape
    G = num_groups
    v2 = lambda i: (0, 0)
    # Stage 1: GroupNorm + q/k/v projections (bf16 intermediates in HBM).
    q, k, v = pl.pallas_call(
        functools.partial(_attn_qkv_kernel, groups=G, eps=eps),
        out_shape=tuple(jax.ShapeDtypeStruct((B, L, C), jnp.bfloat16) for _ in range(3)),
        grid=(B,),
        in_specs=[pl.BlockSpec((1, L, C), lambda i: (i, 0, 0)),
                  pl.BlockSpec((C, G), v2), pl.BlockSpec((G, C), v2),
                  pl.BlockSpec((1, C), v2), pl.BlockSpec((1, C), v2),
                  pl.BlockSpec((C, C), v2), pl.BlockSpec((1, C), v2),
                  pl.BlockSpec((C, C), v2), pl.BlockSpec((1, C), v2),
                  pl.BlockSpec((C, C), v2), pl.BlockSpec((1, C), v2)],
        out_specs=tuple(pl.BlockSpec((1, L, C), lambda i: (i, 0, 0)) for _ in range(3)),
        compiler_params=_CP_HEAVY,
    )(x, cg, gc, p['gn_w'].reshape(1, C), p['gn_b'].reshape(1, C),
      p['wq'], p['bq'].reshape(1, C), p['wk'], p['bk'].reshape(1, C),
      p['wv'], p['bv'].reshape(1, C))

    # Stage 2: q-tiled attention + proj_out + residual, grid (B, L/TQ) both parallel.
    TQ = _pick_tile(L)
    v2q = lambda b, qi: (0, 0)
    return pl.pallas_call(
        functools.partial(_attn_tiled_kernel, scale=float(C) ** -0.5),
        out_shape=jax.ShapeDtypeStruct((B, L, C), x.dtype),
        grid=(B, L // TQ),
        in_specs=[pl.BlockSpec((1, TQ, C), lambda b, qi: (b, qi, 0)),
                  pl.BlockSpec((1, TQ, C), lambda b, qi: (b, qi, 0)),
                  pl.BlockSpec((1, L, C), lambda b, qi: (b, 0, 0)),
                  pl.BlockSpec((1, L, C), lambda b, qi: (b, 0, 0)),
                  pl.BlockSpec((C, C), v2q),
                  pl.BlockSpec((1, C), v2q)],
        out_specs=pl.BlockSpec((1, TQ, C), lambda b, qi: (b, qi, 0)),
        compiler_params=_CP_FLASH,
    )(x, q, k, v, p['wp'], p['bp'].reshape(1, C))


def gn_ln(x, gw, gb, lw, lb, cg, gc, *, num_groups=32, eps=1e-6):
    B, L, C = x.shape
    G = num_groups
    v2 = lambda i: (0, 0)
    return pl.pallas_call(
        functools.partial(_gn_ln_kernel, groups=G, eps=eps),
        out_shape=jax.ShapeDtypeStruct((B, L, C), x.dtype),
        grid=(B,),
        in_specs=[pl.BlockSpec((1, L, C), lambda i: (i, 0, 0)),
                  pl.BlockSpec((C, G), v2), pl.BlockSpec((G, C), v2),
                  pl.BlockSpec((1, C), v2), pl.BlockSpec((1, C), v2),
                  pl.BlockSpec((1, C), v2), pl.BlockSpec((1, C), v2)],
        out_specs=pl.BlockSpec((1, L, C), lambda i: (i, 0, 0)),
        compiler_params=_CP_LIGHT,
    )(x, cg, gc, gw.reshape(1, C), gb.reshape(1, C), lw.reshape(1, C), lb.reshape(1, C))


def convnext_block(x, p, *, eps=1e-6, final_ln=None):
    B, L, C = x.shape
    K = p['dw_w'].shape[0]
    pad = (K - 1) // 2
    I = p['w1'].shape[1]
    apply_ln = final_ln is not None
    if apply_ln:
        fw, fb = final_ln[0].reshape(1, C), final_ln[1].reshape(1, C)
    else:
        fw = jnp.ones((1, C), jnp.float32)
        fb = jnp.zeros((1, C), jnp.float32)
    v2 = lambda i: (0, 0)
    return pl.pallas_call(
        functools.partial(_convnext_kernel, K=K, L=L, eps=eps, apply_final_ln=apply_ln),
        out_shape=jax.ShapeDtypeStruct((B, L, C), x.dtype),
        grid=(B,),
        in_specs=[pl.BlockSpec((1, L, C), lambda i: (i, 0, 0)),
                  pl.BlockSpec((K, C), v2), pl.BlockSpec((1, C), v2),   # dwconv
                  pl.BlockSpec((1, C), v2), pl.BlockSpec((1, C), v2),   # LN
                  pl.BlockSpec((C, I), v2), pl.BlockSpec((1, I), v2),   # pwconv1
                  pl.BlockSpec((I, C), v2), pl.BlockSpec((1, C), v2),   # pwconv2
                  pl.BlockSpec((1, C), v2),                             # gamma
                  pl.BlockSpec((1, C), v2), pl.BlockSpec((1, C), v2)],  # final LN
        out_specs=pl.BlockSpec((1, L, C), lambda i: (i, 0, 0)),
        scratch_shapes=[pltpu.VMEM((L + 2 * pad, C), jnp.float32)],
        compiler_params=_CP_HEAVY,
    )(x, p['dw_w'], p['dw_b'].reshape(1, C), p['ln_w'].reshape(1, C),
      p['ln_b'].reshape(1, C), p['w1'], p['b1'].reshape(1, I),
      p['w2'], p['b2'].reshape(1, C), p['gamma'].reshape(1, C), fw, fb)


# -------------------------------------------------------------- full module --

def make_group_maps(C, num_groups):
    gid = jnp.arange(C) // (C // num_groups)
    cg = (gid[:, None] == jnp.arange(num_groups)[None, :]).astype(jnp.float32)  # (C, G)
    return cg, jnp.transpose(cg)                                                 # (G, C)


def vocos_backbone_forward(x_bcl, params):
    """x_bcl: (B, input_channels, L) like the PyTorch module. Returns (B, L, dim)."""
    cg, gc = params['cg'], params['gc']
    x = jnp.transpose(x_bcl, (0, 2, 1))                      # -> (B, L, Cin)
    x = embed_conv(x, params['embed_w'], params['embed_b'])
    # pos_net: Res, Res, Attn, Res, Res, GroupNorm
    x = resnet_block(x, params['res'][0], cg, gc)
    x = resnet_block(x, params['res'][1], cg, gc)
    x = attn_block(x, params['attn'], cg, gc)
    x = resnet_block(x, params['res'][2], cg, gc)
    x = resnet_block(x, params['res'][3], cg, gc)
    # pos_net final GroupNorm fused with self.norm (LayerNorm over channels)
    x = gn_ln(x, params['posnorm_w'], params['posnorm_b'],
              params['norm_w'], params['norm_b'], cg, gc)
    # ConvNeXt stack; final LayerNorm fused into the last block
    n = len(params['convnext'])
    assert n >= 1
    for idx, blk in enumerate(params['convnext']):
        fin = (params['final_w'], params['final_b']) if idx == n - 1 else None
        x = convnext_block(x, blk, final_ln=fin)
    return x                                                 # (B, L, dim)


def init_params(key, *, input_channels, dim, intermediate_dim, num_layers):
    keys = iter(jax.random.split(key, 256))

    def nrm(shape, std=0.02, dtype=jnp.float32):
        return (std * jax.random.normal(next(keys), shape, jnp.float32)).astype(dtype)

    ones = lambda n: jnp.ones((n,), jnp.float32)
    zeros = lambda n: jnp.zeros((n,), jnp.float32)
    bf16 = jnp.bfloat16
    layer_scale = 1.0 / num_layers

    def resnet_params():
        return dict(gn1_w=ones(dim), gn1_b=zeros(dim),
                    conv1_w=nrm((3, dim, dim), dtype=bf16), conv1_b=nrm((dim,), 0.01),
                    gn2_w=ones(dim), gn2_b=zeros(dim),
                    conv2_w=nrm((3, dim, dim), dtype=bf16), conv2_b=nrm((dim,), 0.01))

    attn = dict(gn_w=ones(dim), gn_b=zeros(dim),
                wq=nrm((dim, dim), dtype=bf16), bq=nrm((dim,), 0.01),
                wk=nrm((dim, dim), dtype=bf16), bk=nrm((dim,), 0.01),
                wv=nrm((dim, dim), dtype=bf16), bv=nrm((dim,), 0.01),
                wp=nrm((dim, dim), dtype=bf16), bp=nrm((dim,), 0.01))

    convnext = [dict(dw_w=nrm((7, dim)), dw_b=zeros(dim),
                     ln_w=ones(dim), ln_b=zeros(dim),
                     w1=nrm((dim, intermediate_dim), dtype=bf16),
                     b1=zeros(intermediate_dim),
                     w2=nrm((intermediate_dim, dim), dtype=bf16), b2=zeros(dim),
                     gamma=layer_scale * ones(dim))
                for _ in range(num_layers)]

    cg, gc = make_group_maps(dim, 32)
    return dict(cg=cg, gc=gc,
                embed_w=nrm((7, input_channels, dim), dtype=bf16), embed_b=zeros(dim),
                res=[resnet_params() for _ in range(4)],
                attn=attn,
                posnorm_w=ones(dim), posnorm_b=zeros(dim),
                norm_w=ones(dim), norm_b=zeros(dim),
                convnext=convnext,
                final_w=ones(dim), final_b=zeros(dim))


if __name__ == "__main__":
    B, Cin, L = 2, 4, 16
    dim, intermediate_dim, num_layers = 32, 64, 2   # dim divisible by 32 (GroupNorm groups)

    key = jax.random.PRNGKey(0)
    k_x, k_p = jax.random.split(key)
    x = jax.random.normal(k_x, (B, Cin, L), dtype=jnp.float32)   # PyTorch-style (B, C, L)
    params = init_params(k_p, input_channels=Cin, dim=dim,
                         intermediate_dim=intermediate_dim, num_layers=num_layers)

    fwd = jax.jit(vocos_backbone_forward)
    out = fwd(x, params)
    out = jax.block_until_ready(out)
    assert out.shape == (B, L, dim), out.shape
    print("KERNEL_OK")
</pallas_src>

<mosaic_0001>
module attributes {stable_mosaic.version = 11 : i64} {
  func.func @_embed_conv_kernel(%arg0: i32, %arg1: memref<1x16x4xf32, #tpu.memory_space<vmem>>, %arg2: memref<7x4x32xbf16, #tpu.memory_space<vmem>>, %arg3: memref<1x32xf32, #tpu.memory_space<vmem>>, %arg4: memref<1x16x32xf32, #tpu.memory_space<vmem>>, %arg5: memref<22x4xf32, #tpu.memory_space<vmem>>) attributes {dimension_semantics = [#tpu.dimension_semantics<parallel>], iteration_bounds = array<i64: 2>, scalar_prefetch = 0 : i64, scratch_operands = 1 : i64, tpu.core_type = #tpu.core_type<tc>, window_params = [{transform_indices = @transform_0, window_bounds = array<i64: 1, 16, 4>}, {pipeline_mode = #tpu.pipeline_mode<synchronous>, transform_indices = @transform_1, window_bounds = array<i64: 7, 4, 32>}, {pipeline_mode = #tpu.pipeline_mode<synchronous>, transform_indices = @transform_2, window_bounds = array<i64: 1, 32>}, {transform_indices = @transform_3, window_bounds = array<i64: 1, 16, 32>}]} {
    %c0 = arith.constant 0 : index
    %c0_0 = arith.constant 0 : index
    %c0_1 = arith.constant 0 : index
    %0 = vector.load %arg1[%c0, %c0_0, %c0_1] : memref<1x16x4xf32, #tpu.memory_space<vmem>>, vector<1x16x4xf32>
    %1 = vector.shape_cast %0 : vector<1x16x4xf32> to vector<16x4xf32>
    %cst = arith.constant 0.000000e+00 : f32
    %2 = vector.broadcast %cst : f32 to vector<3x4xf32>
    %c0_2 = arith.constant 0 : index
    %c0_3 = arith.constant 0 : index
    %3 = vector.load %arg5[%c0_2, %c0_3] : memref<22x4xf32, #tpu.memory_space<vmem>>, vector<3x4xf32>
    tpu.vector_store %arg5[%c0_2, %c0_3], %2 {strides = array<i32>} : memref<22x4xf32, #tpu.memory_space<vmem>>, vector<3x4xf32>,
    %c19 = arith.constant 19 : index
    %c0_4 = arith.constant 0 : index
    %4 = vector.load %arg5[%c19, %c0_4] : memref<22x4xf32, #tpu.memory_space<vmem>>, vector<3x4xf32>
    tpu.vector_store %arg5[%c19, %c0_4], %2 {strides = array<i32>} : memref<22x4xf32, #tpu.memory_space<vmem>>, vector<3x4xf32>,
    %c3 = arith.constant 3 : index
    %c0_5 = arith.constant 0 : index
    %5 = vector.load %arg5[%c3, %c0_5] : memref<22x4xf32, #tpu.memory_space<vmem>>, vector<16x4xf32>
    tpu.vector_store %arg5[%c3, %c0_5], %1 {strides = array<i32>} : memref<22x4xf32, #tpu.memory_space<vmem>>, vector<16x4xf32>,
    %c0_6 = arith.constant 0 : index
    %c0_7 = arith.constant 0 : index
    %6 = vector.load %arg5[%c0_6, %c0_7] : memref<22x4xf32, #tpu.memory_space<vmem>>, vector<22x4xf32>
    %c0_8 = arith.constant 0 : index
    %c0_9 = arith.constant 0 : index
    %c0_10 = arith.constant 0 : index
    %7 = vector.load %arg2[%c0_8, %c0_9, %c0_10] : memref<7x4x32xbf16, #tpu.memory_space<vmem>>, vector<7x4x32xbf16>
    %cst_11 = arith.constant 0.000000e+00 : f32
    %8 = vector.broadcast %cst_11 : f32 to vector<16x32xf32>
    %9 = vector.extract_strided_slice %6 {offsets = [0, 0], sizes = [16, 4], strides = [1, 1]} : vector<22x4xf32> to vector<16x4xf32>
    %10 = arith.truncf %9 : vector<16x4xf32> to vector<16x4xbf16>
    %11 = vector.extract_strided_slice %7 {offsets = [0, 0, 0], sizes = [1, 4, 32], strides = [1, 1, 1]} : vector<7x4x32xbf16> to vector<1x4x32xbf16>
    %12 = vector.shape_cast %11 : vector<1x4x32xbf16> to vector<4x32xbf16>
    %cst_12 = arith.constant dense<0.000000e+00> : vector<16x32xf32>
    %13 = tpu.matmul %10, %12, %cst_12 {dimension_numbers = #tpu.dot_dimension_numbers<[1], [0], [0], [1], [0, 0, 1, 1], [], []>} : vector<16x4xbf16>, vector<4x32xbf16>, vector<16x32xf32> -> vector<16x32xf32>
    %14 = arith.addf %8, %13 : vector<16x32xf32>
    %15 = vector.extract_strided_slice %6 {offsets = [1, 0], sizes = [16, 4], strides = [1, 1]} : vector<22x4xf32> to vector<16x4xf32>
    %16 = arith.truncf %15 : vector<16x4xf32> to vector<16x4xbf16>
    %17 = vector.extract_strided_slice %7 {offsets = [1, 0, 0], sizes = [1, 4, 32], strides = [1, 1, 1]} : vector<7x4x32xbf16> to vector<1x4x32xbf16>
    %18 = vector.shape_cast %17 : vector<1x4x32xbf16> to vector<4x32xbf16>
    %cst_13 = arith.constant dense<0.000000e+00> : vector<16x32xf32>
    %19 = tpu.matmul %16, %18, %cst_13 {dimension_numbers = #tpu.dot_dimension_numbers<[1], [0], [0], [1], [0, 0, 1, 1], [], []>} : vector<16x4xbf16>, vector<4x32xbf16>, vector<16x32xf32> -> vector<16x32xf32>
    %20 = arith.addf %14, %19 : vector<16x32xf32>
    %21 = vector.extract_strided_slice %6 {offsets = [2, 0], sizes = [16, 4], strides = [1, 1]} : vector<22x4xf32> to vector<16x4xf32>
    %22 = arith.truncf %21 : vector<16x4xf32> to vector<16x4xbf16>
    %23 = vector.extract_strided_slice %7 {offsets = [2, 0, 0], sizes = [1, 4, 32], strides = [1, 1, 1]} : vector<7x4x32xbf16> to vector<1x4x32xbf16>
    %24 = vector.shape_cast %23 : vector<1x4x32xbf16> to vector<4x32xbf16>
    %cst_14 = arith.constant dense<0.000000e+00> : vector<16x32xf32>
    %25 = tpu.matmul %22, %24, %cst_14 {dimension_numbers = #tpu.dot_dimension_numbers<[1], [0], [0], [1], [0, 0, 1, 1], [], []>} : vector<16x4xbf16>, vector<4x32xbf16>, vector<16x32xf32> -> vector<16x32xf32>
    %26 = arith.addf %20, %25 : vector<16x32xf32>
    %27 = vector.extract_strided_slice %6 {offsets = [3, 0], sizes = [16, 4], strides = [1, 1]} : vector<22x4xf32> to vector<16x4xf32>
    %28 = arith.truncf %27 : vector<16x4xf32> to vector<16x4xbf16>
    %29 = vector.extract_strided_slice %7 {offsets = [3, 0, 0], sizes = [1, 4, 32], strides = [1, 1, 1]} : vector<7x4x32xbf16> to vector<1x4x32xbf16>
    %30 = vector.shape_cast %29 : vector<1x4x32xbf16> to vector<4x32xbf16>
    %cst_15 = arith.constant dense<0.000000e+00> : vector<16x32xf32>
    %31 = tpu.matmul %28, %30, %cst_15 {dimension_numbers = #tpu.dot_dimension_numbers<[1], [0], [0], [1], [0, 0, 1, 1], [], []>} : vector<16x4xbf16>, vector<4x32xbf16>, vector<16x32xf32> -> vector<16x32xf32>
    %32 = arith.addf %26, %31 : vector<16x32xf32>
    %33 = vector.extract_strided_slice %6 {offsets = [4, 0], sizes = [16, 4], strides = [1, 1]} : vector<22x4xf32> to vector<16x4xf32>
    %34 = arith.truncf %33 : vector<16x4xf32> to vector<16x4xbf16>
    %35 = vector.extract_strided_slice %7 {offsets = [4, 0, 0], sizes = [1, 4, 32], strides = [1, 1, 1]} : vector<7x4x32xbf16> to vector<1x4x32xbf16>
    %36 = vector.shape_cast %35 : vector<1x4x32xbf16> to vector<4x32xbf16>
    %cst_16 = arith.constant dense<0.000000e+00> : vector<16x32xf32>
    %37 = tpu.matmul %34, %36, %cst_16 {dimension_numbers = #tpu.dot_dimension_numbers<[1], [0], [0], [1], [0, 0, 1, 1], [], []>} : vector<16x4xbf16>, vector<4x32xbf16>, vector<16x32xf32> -> vector<16x32xf32>
    %38 = arith.addf %32, %37 : vector<16x32xf32>
    %39 = vector.extract_strided_slice %6 {offsets = [5, 0], sizes = [16, 4], strides = [1, 1]} : vector<22x4xf32> to vector<16x4xf32>
    %40 = arith.truncf %39 : vector<16x4xf32> to vector<16x4xbf16>
    %41 = vector.extract_strided_slice %7 {offsets = [5, 0, 0], sizes = [1, 4, 32], strides = [1, 1, 1]} : vector<7x4x32xbf16> to vector<1x4x32xbf16>
    %42 = vector.shape_cast %41 : vector<1x4x32xbf16> to vector<4x32xbf16>
    %cst_17 = arith.constant dense<0.000000e+00> : vector<16x32xf32>
    %43 = tpu.matmul %40, %42, %cst_17 {dimension_numbers = #tpu.dot_dimension_numbers<[1], [0], [0], [1], [0, 0, 1, 1], [], []>} : vector<16x4xbf16>, vector<4x32xbf16>, vector<16x32xf32> -> vector<16x32xf32>
    %44 = arith.addf %38, %43 : vector<16x32xf32>
    %45 = vector.extract_strided_slice %6 {offsets = [6, 0], sizes = [16, 4], strides = [1, 1]} : vector<22x4xf32> to vector<16x4xf32>
    %46 = arith.truncf %45 : vector<16x4xf32> to vector<16x4xbf16>
    %47 = vector.extract_strided_slice %7 {offsets = [6, 0, 0], sizes = [1, 4, 32], strides = [1, 1, 1]} : vector<7x4x32xbf16> to vector<1x4x32xbf16>
    %48 = vector.shape_cast %47 : vector<1x4x32xbf16> to vector<4x32xbf16>
    %cst_18 = arith.constant dense<0.000000e+00> : vector<16x32xf32>
    %49 = tpu.matmul %46, %48, %cst_18 {dimension_numbers = #tpu.dot_dimension_numbers<[1], [0], [0], [1], [0, 0, 1, 1], [], []>} : vector<16x4xbf16>, vector<4x32xbf16>, vector<16x32xf32> -> vector<16x32xf32>
    %50 = arith.addf %44, %49 : vector<16x32xf32>
    %c0_19 = arith.constant 0 : index
    %c0_20 = arith.constant 0 : index
    %51 = vector.load %arg3[%c0_19, %c0_20] : memref<1x32xf32, #tpu.memory_space<vmem>>, vector<1x32xf32>
    %52 = vector.broadcast %51 : vector<1x32xf32> to vector<16x32xf32>
    %53 = arith.addf %50, %52 : vector<16x32xf32>
    %c0_21 = arith.constant 0 : index
    %c0_22 = arith.constant 0 : index
    %c0_23 = arith.constant 0 : index
    %54 = vector.load %arg4[%c0_21, %c0_22, %c0_23] : memref<1x16x32xf32, #tpu.memory_space<vmem>>, vector<1x16x32xf32>
    %55 = vector.shape_cast %54 : vector<1x16x32xf32> to vector<16x32xf32>
    %56 = vector.shape_cast %53 : vector<16x32xf32> to vector<1x16x32xf32>
    tpu.vector_store %arg4[%c0_21, %c0_22, %c0_23], %56 {strides = array<i32>} : memref<1x16x32xf32, #tpu.memory_space<vmem>>, vector<1x16x32xf32>,
    return
  }
  func.func @transform_0(%arg0: i32) -> (i32, i32, i32) {
    %c0_i32 = arith.constant 0 : i32
    %c0_i32_0 = arith.constant 0 : i32
    %c0_i32_1 = arith.constant 0 : i32
    return %arg0, %c0_i32, %c0_i32_0 : i32, i32, i32
  }
  func.func @transform_1(%arg0: i32) -> (i32, i32, i32) {
    %c0_i32 = arith.constant 0 : i32
    %c0_i32_0 = arith.constant 0 : i32
    %c0_i32_1 = arith.constant 0 : i32
    %c0_i32_2 = arith.constant 0 : i32
    return %c0_i32, %c0_i32_0, %c0_i32_1 : i32, i32, i32
  }
  func.func @transform_2(%arg0: i32) -> (i32, i32) {
    %c0_i32 = arith.constant 0 : i32
    %c0_i32_0 = arith.constant 0 : i32
    %c0_i32_1 = arith.constant 0 : i32
    return %c0_i32, %c0_i32_0 : i32, i32
  }
  func.func @transform_3(%arg0: i32) -> (i32, i32, i32) {
    %c0_i32 = arith.constant 0 : i32
    %c0_i32_0 = arith.constant 0 : i32
    %c0_i32_1 = arith.constant 0 : i32
    return %arg0, %c0_i32, %c0_i32_0 : i32, i32, i32
  }
}

module attributes {stable_mosaic.version = 11 : i64} {
  func.func @_attn_qkv_kernel(%arg0: i32, %arg1: memref<1x16x32xf32, #tpu.memory_space<vmem>>, %arg2: memref<32x32xf32, #tpu.memory_space<vmem>>, %arg3: memref<32x32xf32, #tpu.memory_space<vmem>>, %arg4: memref<1x32xf32, #tpu.memory_space<vmem>>, %arg5: memref<1x32xf32, #tpu.memory_space<vmem>>, %arg6: memref<32x32xbf16, #tpu.memory_space<vmem>>, %arg7: memref<1x32xf32, #tpu.memory_space<vmem>>, %arg8: memref<32x32xbf16, #tpu.memory_space<vmem>>, %arg9: memref<1x32xf32, #tpu.memory_space<vmem>>, %arg10: memref<32x32xbf16, #tpu.memory_space<vmem>>, %arg11: memref<1x32xf32, #tpu.memory_space<vmem>>, %arg12: memref<1x16x32xbf16, #tpu.memory_space<vmem>>, %arg13: memref<1x16x32xbf16, #tpu.memory_space<vmem>>, %arg14: memref<1x16x32xbf16, #tpu.memory_space<vmem>>) attributes {dimension_semantics = [#tpu.dimension_semantics<parallel>], iteration_bounds = array<i64: 2>, scalar_prefetch = 0 : i64, scratch_operands = 0 : i64, tpu.core_type = #tpu.core_type<tc>, window_params = [{transform_indices = @transform_0, window_bounds = array<i64: 1, 16, 32>}, {pipeline_mode = #tpu.pipeline_mode<synchronous>, transform_indices = @transform_1, window_bounds = array<i64: 32, 32>}, {pipeline_mode = #tpu.pipeline_mode<synchronous>, transform_indices = @transform_2, window_bounds = array<i64: 32, 32>}, {pipeline_mode = #tpu.pipeline_mode<synchronous>, transform_indices = @transform_3, window_bounds = array<i64: 1, 32>}, {pipeline_mode = #tpu.pipeline_mode<synchronous>, transform_indices = @transform_4, window_bounds = array<i64: 1, 32>}, {pipeline_mode = #tpu.pipeline_mode<synchronous>, transform_indices = @transform_5, window_bounds = array<i64: 32, 32>}, {pipeline_mode = #tpu.pipeline_mode<synchronous>, transform_indices = @transform_6, window_bounds = array<i64: 1, 32>}, {pipeline_mode = #tpu.pipeline_mode<synchronous>, transform_indices = @transform_7, window_bounds = array<i64: 32, 32>}, {pipeline_mode = #tpu.pipeline_mode<synchronous>, transform_indices = @transform_8, window_bounds = array<i64: 1, 32>}, {pipeline_mode = #tpu.pipeline_mode<synchronous>, transform_indices = @transform_9, window_bounds = array<i64: 32, 32>}, {pipeline_mode = #tpu.pipeline_mode<synchronous>, transform_indices = @transform_10, window_bounds = array<i64: 1, 32>}, {transform_indices = @transform_11, window_bounds = array<i64: 1, 16, 32>}, {transform_indices = @transform_12, window_bounds = array<i64: 1, 16, 32>}, {transform_indices = @transform_13, window_bounds = array<i64: 1, 16, 32>}]} {
    %c0 = arith.constant 0 : index
    %c0_0 = arith.constant 0 : index
    %c0_1 = arith.constant 0 : index
    %0 = vector.load %arg1[%c0, %c0_0, %c0_1] : memref<1x16x32xf32, #tpu.memory_space<vmem>>, vector<1x16x32xf32>
    %1 = vector.shape_cast %0 : vector<1x16x32xf32> to vector<16x32xf32>
    %c0_2 = arith.constant 0 : index
    %c0_3 = arith.constant 0 : index
    %2 = vector.load %arg2[%c0_2, %c0_3] : memref<32x32xf32, #tpu.memory_space<vmem>>, vector<32x32xf32>
    %c0_4 = arith.constant 0 : index
    %c0_5 = arith.constant 0 : index
    %3 = vector.load %arg3[%c0_4, %c0_5] : memref<32x32xf32, #tpu.memory_space<vmem>>, vector<32x32xf32>
    %cst = arith.constant dense<0.000000e+00> : vector<32xf32>
    %4 = vector.multi_reduction <add>, %1, %cst [0] : vector<16x32xf32> to vector<32xf32>
    %5 = vector.shape_cast %4 : vector<32xf32> to vector<1x32xf32>
    %6 = arith.mulf %1, %1 : vector<16x32xf32>
    %cst_6 = arith.constant dense<0.000000e+00> : vector<32xf32>
    %7 = vector.multi_reduction <add>, %6, %cst_6 [0] : vector<16x32xf32> to vector<32xf32>
    %8 = vector.shape_cast %7 : vector<32xf32> to vector<1x32xf32>
    %cst_7 = arith.constant dense<0.000000e+00> : vector<1x32xf32>
    %9 = tpu.matmul %5, %2, %cst_7 {dimension_numbers = #tpu.dot_dimension_numbers<[1], [0], [0], [1], [0, 0, 1, 1], [], []>} : vector<1x32xf32>, vector<32x32xf32>, vector<1x32xf32> -> vector<1x32xf32>
    %cst_8 = arith.constant dense<0.000000e+00> : vector<1x32xf32>
    %10 = tpu.matmul %8, %2, %cst_8 {dimension_numbers = #tpu.dot_dimension_numbers<[1], [0], [0], [1], [0, 0, 1, 1], [], []>} : vector<1x32xf32>, vector<32x32xf32>, vector<1x32xf32> -> vector<1x32xf32>
    %cst_9 = arith.constant 1.600000e+01 : f32
    %11 = vector.broadcast %cst_9 : f32 to vector<1x32xf32>
    %12 = arith.divf %9, %11 : vector<1x32xf32>
    %cst_10 = arith.constant 1.600000e+01 : f32
    %13 = vector.broadcast %cst_10 : f32 to vector<1x32xf32>
    %14 = arith.divf %10, %13 : vector<1x32xf32>
    %15 = arith.mulf %12, %12 : vector<1x32xf32>
    %16 = arith.subf %14, %15 : vector<1x32xf32>
    %cst_11 = arith.constant 9.99999997E-7 : f32
    %17 = vector.broadcast %cst_11 : f32 to vector<1x32xf32>
    %18 = arith.addf %16, %17 : vector<1x32xf32>
    %19 = math.rsqrt %18 : vector<1x32xf32>
    %cst_12 = arith.constant dense<0.000000e+00> : vector<1x32xf32>
    %20 = tpu.matmul %12, %3, %cst_12 {dimension_numbers = #tpu.dot_dimension_numbers<[1], [0], [0], [1], [0, 0, 1, 1], [], []>} : vector<1x32xf32>, vector<32x32xf32>, vector<1x32xf32> -> vector<1x32xf32>
    %cst_13 = arith.constant dense<0.000000e+00> : vector<1x32xf32>
    %21 = tpu.matmul %19, %3, %cst_13 {dimension_numbers = #tpu.dot_dimension_numbers<[1], [0], [0], [1], [0, 0, 1, 1], [], []>} : vector<1x32xf32>, vector<32x32xf32>, vector<1x32xf32> -> vector<1x32xf32>
    %22 = vector.broadcast %20 : vector<1x32xf32> to vector<16x32xf32>
    %23 = arith.subf %1, %22 : vector<16x32xf32>
    %24 = vector.broadcast %21 : vector<1x32xf32> to vector<16x32xf32>
    %25 = arith.mulf %23, %24 : vector<16x32xf32>
    %c0_14 = arith.constant 0 : index
    %c0_15 = arith.constant 0 : index
    %26 = vector.load %arg4[%c0_14, %c0_15] : memref<1x32xf32, #tpu.memory_space<vmem>>, vector<1x32xf32>
    %27 = vector.broadcast %26 : vector<1x32xf32> to vector<16x32xf32>
    %28 = arith.mulf %25, %27 : vector<16x32xf32>
    %c0_16 = arith.constant 0 : index
    %c0_17 = arith.constant 0 : index
    %29 = vector.load %arg5[%c0_16, %c0_17] : memref<1x32xf32, #tpu.memory_space<vmem>>, vector<1x32xf32>
    %30 = vector.broadcast %29 : vector<1x32xf32> to vector<16x32xf32>
    %31 = arith.addf %28, %30 : vector<16x32xf32>
    %32 = arith.truncf %31 : vector<16x32xf32> to vector<16x32xbf16>
    %c0_18 = arith.constant 0 : index
    %c0_19 = arith.constant 0 : index
    %33 = vector.load %arg6[%c0_18, %c0_19] : memref<32x32xbf16, #tpu.memory_space<vmem>>, vector<32x32xbf16>
    %cst_20 = arith.constant dense<0.000000e+00> : vector<16x32xf32>
    %34 = tpu.matmul %32, %33, %cst_20 {dimension_numbers = #tpu.dot_dimension_numbers<[1], [0], [0], [1], [0, 0, 1, 1], [], []>} : vector<16x32xbf16>, vector<32x32xbf16>, vector<16x32xf32> -> vector<16x32xf32>
    %c0_21 = arith.constant 0 : index
    %c0_22 = arith.constant 0 : index
    %35 = vector.load %arg7[%c0_21, %c0_22] : memref<1x32xf32, #tpu.memory_space<vmem>>, vector<1x32xf32>
    %36 = vector.broadcast %35 : vector<1x32xf32> to vector<16x32xf32>
    %37 = arith.addf %34, %36 : vector<16x32xf32>
    %c0_23 = arith.constant 0 : index
    %c0_24 = arith.constant 0 : index
    %38 = vector.load %arg8[%c0_23, %c0_24] : memref<32x32xbf16, #tpu.memory_space<vmem>>, vector<32x32xbf16>
    %cst_25 = arith.constant dense<0.000000e+00> : vector<16x32xf32>
    %39 = tpu.matmul %32, %38, %cst_25 {dimension_numbers = #tpu.dot_dimension_numbers<[1], [0], [0], [1], [0, 0, 1, 1], [], []>} : vector<16x32xbf16>, vector<32x32xbf16>, vector<16x32xf32> -> vector<16x32xf32>
    %c0_26 = arith.constant 0 : index
    %c0_27 = arith.constant 0 : index
    %40 = vector.load %arg9[%c0_26, %c0_27] : memref<1x32xf32, #tpu.memory_space<vmem>>, vector<1x32xf32>
    %41 = vector.broadcast %40 : vector<1x32xf32> to vector<16x32xf32>
    %42 = arith.addf %39, %41 : vector<16x32xf32>
    %c0_28 = arith.constant 0 : index
    %c0_29 = arith.constant 0 : index
    %43 = vector.load %arg10[%c0_28, %c0_29] : memref<32x32xbf16, #tpu.memory_space<vmem>>, vector<32x32xbf16>
    %cst_30 = arith.constant dense<0.000000e+00> : vector<16x32xf32>
    %44 = tpu.matmul %32, %43, %cst_30 {dimension_numbers = #tpu.dot_dimension_numbers<[1], [0], [0], [1], [0, 0, 1, 1], [], []>} : vector<16x32xbf16>, vector<32x32xbf16>, vector<16x32xf32> -> vector<16x32xf32>
    %c0_31 = arith.constant 0 : index
    %c0_32 = arith.constant 0 : index
    %45 = vector.load %arg11[%c0_31, %c0_32] : memref<1x32xf32, #tpu.memory_space<vmem>>, vector<1x32xf32>
    %46 = vector.broadcast %45 : vector<1x32xf32> to vector<16x32xf32>
    %47 = arith.addf %44, %46 : vector<16x32xf32>
    %48 = arith.truncf %37 : vector<16x32xf32> to vector<16x32xbf16>
    %c0_33 = arith.constant 0 : index
    %c0_34 = arith.constant 0 : index
    %c0_35 = arith.constant 0 : index
    %49 = vector.load %arg12[%c0_33, %c0_34, %c0_35] : memref<1x16x32xbf16, #tpu.memory_space<vmem>>, vector<1x16x32xbf16>
    %50 = vector.shape_cast %49 : vector<1x16x32xbf16> to vector<16x32xbf16>
    %51 = vector.shape_cast %48 : vector<16x32xbf16> to vector<1x16x32xbf16>
    tpu.vector_store %arg12[%c0_33, %c0_34, %c0_35], %51 {strides = array<i32>} : memref<1x16x32xbf16, #tpu.memory_space<vmem>>, vector<1x16x32xbf16>,
    %52 = arith.truncf %42 : vector<16x32xf32> to vector<16x32xbf16>
    %c0_36 = arith.constant 0 : index
    %c0_37 = arith.constant 0 : index
    %c0_38 = arith.constant 0 : index
    %53 = vector.load %arg13[%c0_36, %c0_37, %c0_38] : memref<1x16x32xbf16, #tpu.memory_space<vmem>>, vector<1x16x32xbf16>
    %54 = vector.shape_cast %53 : vector<1x16x32xbf16> to vector<16x32xbf16>
    %55 = vector.shape_cast %52 : vector<16x32xbf16> to vector<1x16x32xbf16>
    tpu.vector_store %arg13[%c0_36, %c0_37, %c0_38], %55 {strides = array<i32>} : memref<1x16x32xbf16, #tpu.memory_space<vmem>>, vector<1x16x32xbf16>,
    %56 = arith.truncf %47 : vector<16x32xf32> to vector<16x32xbf16>
    %c0_39 = arith.constant 0 : index
    %c0_40 = arith.constant 0 : index
    %c0_41 = arith.constant 0 : index
    %57 = vector.load %arg14[%c0_39, %c0_40, %c0_41] : memref<1x16x32xbf16, #tpu.memory_space<vmem>>, vector<1x16x32xbf16>
    %58 = vector.shape_cast %57 : vector<1x16x32xbf16> to vector<16x32xbf16>
    %59 = vector.shape_cast %56 : vector<16x32xbf16> to vector<1x16x32xbf16>
    tpu.vector_store %arg14[%c0_39, %c0_40, %c0_41], %59 {strides = array<i32>} : memref<1x16x32xbf16, #tpu.memory_space<vmem>>, vector<1x16x32xbf16>,
    return
  }
  func.func @transform_0(%arg0: i32) -> (i32, i32, i32) {
    %c0_i32 = arith.constant 0 : i32
    %c0_i32_0 = arith.constant 0 : i32
    %c0_i32_1 = arith.constant 0 : i32
    return %arg0, %c0_i32, %c0_i32_0 : i32, i32, i32
  }
  func.func @transform_1(%arg0: i32) -> (i32, i32) {
    %c0_i32 = arith.constant 0 : i32
    %c0_i32_0 = arith.constant 0 : i32
    %c0_i32_1 = arith.constant 0 : i32
    return %c0_i32, %c0_i32_0 : i32, i32
  }
  func.func @transform_2(%arg0: i32) -> (i32, i32) {
    %c0_i32 = arith.constant 0 : i32
    %c0_i32_0 = arith.constant 0 : i32
    %c0_i32_1 = arith.constant 0 : i32
    return %c0_i32, %c0_i32_0 : i32, i32
  }
  func.func @transform_3(%arg0: i32) -> (i32, i32) {
    %c0_i32 = arith.constant 0 : i32
    %c0_i32_0 = arith.constant 0 : i32
    %c0_i32_1 = arith.constant 0 : i32
    return %c0_i32, %c0_i32_0 : i32, i32
  }
  func.func @transform_4(%arg0: i32) -> (i32, i32) {
    %c0_i32 = arith.constant 0 : i32
    %c0_i32_0 = arith.constant 0 : i32
    %c0_i32_1 = arith.constant 0 : i32
    return %c0_i32, %c0_i32_0 : i32, i32
  }
  func.func @transform_5(%arg0: i32) -> (i32, i32) {
    %c0_i32 = arith.constant 0 : i32
    %c0_i32_0 = arith.constant 0 : i32
    %c0_i32_1 = arith.constant 0 : i32
    return %c0_i32, %c0_i32_0 : i32, i32
  }
  func.func @transform_6(%arg0: i32) -> (i32, i32) {
    %c0_i32 = arith.constant 0 : i32
    %c0_i32_0 = arith.constant 0 : i32
    %c0_i32_1 = arith.constant 0 : i32
    return %c0_i32, %c0_i32_0 : i32, i32
  }
  func.func @transform_7(%arg0: i32) -> (i32, i32) {
    %c0_i32 = arith.constant 0 : i32
    %c0_i32_0 = arith.constant 0 : i32
    %c0_i32_1 = arith.constant 0 : i32
    return %c0_i32, %c0_i32_0 : i32, i32
  }
  func.func @transform_8(%arg0: i32) -> (i32, i32) {
    %c0_i32 = arith.constant 0 : i32
    %c0_i32_0 = arith.constant 0 : i32
    %c0_i32_1 = arith.constant 0 : i32
    return %c0_i32, %c0_i32_0 : i32, i32
  }
  func.func @transform_9(%arg0: i32) -> (i32, i32) {
    %c0_i32 = arith.constant 0 : i32
    %c0_i32_0 = arith.constant 0 : i32
    %c0_i32_1 = arith.constant 0 : i32
    return %c0_i32, %c0_i32_0 : i32, i32
  }
  func.func @transform_10(%arg0: i32) -> (i32, i32) {
    %c0_i32 = arith.constant 0 : i32
    %c0_i32_0 = arith.constant 0 : i32
    %c0_i32_1 = arith.constant 0 : i32
    return %c0_i32, %c0_i32_0 : i32, i32
  }
  func.func @transform_11(%arg0: i32) -> (i32, i32, i32) {
    %c0_i32 = arith.constant 0 : i32
    %c0_i32_0 = arith.constant 0 : i32
    %c0_i32_1 = arith.constant 0 : i32
    return %arg0, %c0_i32, %c0_i32_0 : i32, i32, i32
  }
  func.func @transform_12(%arg0: i32) -> (i32, i32, i32) {
    %c0_i32 = arith.constant 0 : i32
    %c0_i32_0 = arith.constant 0 : i32
    %c0_i32_1 = arith.constant 0 : i32
    return %arg0, %c0_i32, %c0_i32_0 : i32, i32, i32
  }
  func.func @transform_13(%arg0: i32) -> (i32, i32, i32) {
    %c0_i32 = arith.constant 0 : i32
    %c0_i32_0 = arith.constant 0 : i32
    %c0_i32_1 = arith.constant 0 : i32
    return %arg0, %c0_i32, %c0_i32_0 : i32, i32, i32
  }
}

module attributes {stable_mosaic.version = 11 : i64} {
  func.func @_resnet_kernel(%arg0: i32, %arg1: memref<1x16x32xf32, #tpu.memory_space<vmem>>, %arg2: memref<32x32xf32, #tpu.memory_space<vmem>>, %arg3: memref<32x32xf32, #tpu.memory_space<vmem>>, %arg4: memref<1x32xf32, #tpu.memory_space<vmem>>, %arg5: memref<1x32xf32, #tpu.memory_space<vmem>>, %arg6: memref<3x32x32xbf16, #tpu.memory_space<vmem>>, %arg7: memref<1x32xf32, #tpu.memory_space<vmem>>, %arg8: memref<1x32xf32, #tpu.memory_space<vmem>>, %arg9: memref<1x32xf32, #tpu.memory_space<vmem>>, %arg10: memref<3x32x32xbf16, #tpu.memory_space<vmem>>, %arg11: memref<1x32xf32, #tpu.memory_space<vmem>>, %arg12: memref<1x16x32xf32, #tpu.memory_space<vmem>>, %arg13: memref<20x32xf32, #tpu.memory_space<vmem>>, %arg14: memref<18x32xf32, #tpu.memory_space<vmem>>) attributes {dimension_semantics = [#tpu.dimension_semantics<parallel>], iteration_bounds = array<i64: 2>, scalar_prefetch = 0 : i64, scratch_operands = 2 : i64, tpu.core_type = #tpu.core_type<tc>, window_params = [{transform_indices = @transform_0, window_bounds = array<i64: 1, 16, 32>}, {pipeline_mode = #tpu.pipeline_mode<synchronous>, transform_indices = @transform_1, window_bounds = array<i64: 32, 32>}, {pipeline_mode = #tpu.pipeline_mode<synchronous>, transform_indices = @transform_2, window_bounds = array<i64: 32, 32>}, {pipeline_mode = #tpu.pipeline_mode<synchronous>, transform_indices = @transform_3, window_bounds = array<i64: 1, 32>}, {pipeline_mode = #tpu.pipeline_mode<synchronous>, transform_indices = @transform_4, window_bounds = array<i64: 1, 32>}, {pipeline_mode = #tpu.pipeline_mode<synchronous>, transform_indices = @transform_5, window_bounds = array<i64: 3, 32, 32>}, {pipeline_mode = #tpu.pipeline_mode<synchronous>, transform_indices = @transform_6, window_bounds = array<i64: 1, 32>}, {pipeline_mode = #tpu.pipeline_mode<synchronous>, transform_indices = @transform_7, window_bounds = array<i64: 1, 32>}, {pipeline_mode = #tpu.pipeline_mode<synchronous>, transform_indices = @transform_8, window_bounds = array<i64: 1, 32>}, {pipeline_mode = #tpu.pipeline_mode<synchronous>, transform_indices = @transform_9, window_bounds = array<i64: 3, 32, 32>}, {pipeline_mode = #tpu.pipeline_mode<synchronous>, transform_indices = @transform_10, window_bounds = array<i64: 1, 32>}, {transform_indices = @transform_11, window_bounds = array<i64: 1, 16, 32>}]} {
    %c0 = arith.constant 0 : index
    %c0_0 = arith.constant 0 : index
    %c0_1 = arith.constant 0 : index
    %0 = vector.load %arg1[%c0, %c0_0, %c0_1] : memref<1x16x32xf32, #tpu.memory_space<vmem>>, vector<1x16x32xf32>
    %1 = vector.shape_cast %0 : vector<1x16x32xf32> to vector<16x32xf32>
    %c0_2 = arith.constant 0 : index
    %c0_3 = arith.constant 0 : index
    %2 = vector.load %arg2[%c0_2, %c0_3] : memref<32x32xf32, #tpu.memory_space<vmem>>, vector<32x32xf32>
    %c0_4 = arith.constant 0 : index
    %c0_5 = arith.constant 0 : index
    %3 = vector.load %arg3[%c0_4, %c0_5] : memref<32x32xf32, #tpu.memory_space<vmem>>, vector<32x32xf32>
    %cst = arith.constant dense<0.000000e+00> : vector<32xf32>
    %4 = vector.multi_reduction <add>, %1, %cst [0] : vector<16x32xf32> to vector<32xf32>
    %5 = vector.shape_cast %4 : vector<32xf32> to vector<1x32xf32>
    %6 = arith.mulf %1, %1 : vector<16x32xf32>
    %cst_6 = arith.constant dense<0.000000e+00> : vector<32xf32>
    %7 = vector.multi_reduction <add>, %6, %cst_6 [0] : vector<16x32xf32> to vector<32xf32>
    %8 = vector.shape_cast %7 : vector<32xf32> to vector<1x32xf32>
    %cst_7 = arith.constant dense<0.000000e+00> : vector<1x32xf32>
    %9 = tpu.matmul %5, %2, %cst_7 {dimension_numbers = #tpu.dot_dimension_numbers<[1], [0], [0], [1], [0, 0, 1, 1], [], []>} : vector<1x32xf32>, vector<32x32xf32>, vector<1x32xf32> -> vector<1x32xf32>
    %cst_8 = arith.constant dense<0.000000e+00> : vector<1x32xf32>
    %10 = tpu.matmul %8, %2, %cst_8 {dimension_numbers = #tpu.dot_dimension_numbers<[1], [0], [0], [1], [0, 0, 1, 1], [], []>} : vector<1x32xf32>, vector<32x32xf32>, vector<1x32xf32> -> vector<1x32xf32>
    %cst_9 = arith.constant 1.600000e+01 : f32
    %11 = vector.broadcast %cst_9 : f32 to vector<1x32xf32>
    %12 = arith.divf %9, %11 : vector<1x32xf32>
    %cst_10 = arith.constant 1.600000e+01 : f32
    %13 = vector.broadcast %cst_10 : f32 to vector<1x32xf32>
    %14 = arith.divf %10, %13 : vector<1x32xf32>
    %15 = arith.mulf %12, %12 : vector<1x32xf32>
    %16 = arith.subf %14, %15 : vector<1x32xf32>
    %cst_11 = arith.constant 9.99999997E-7 : f32
    %17 = vector.broadcast %cst_11 : f32 to vector<1x32xf32>
    %18 = arith.addf %16, %17 : vector<1x32xf32>
    %19 = math.rsqrt %18 : vector<1x32xf32>
    %cst_12 = arith.constant dense<0.000000e+00> : vector<1x32xf32>
    %20 = tpu.matmul %12, %3, %cst_12 {dimension_numbers = #tpu.dot_dimension_numbers<[1], [0], [0], [1], [0, 0, 1, 1], [], []>} : vector<1x32xf32>, vector<32x32xf32>, vector<1x32xf32> -> vector<1x32xf32>
    %cst_13 = arith.constant dense<0.000000e+00> : vector<1x32xf32>
    %21 = tpu.matmul %19, %3, %cst_13 {dimension_numbers = #tpu.dot_dimension_numbers<[1], [0], [0], [1], [0, 0, 1, 1], [], []>} : vector<1x32xf32>, vector<32x32xf32>, vector<1x32xf32> -> vector<1x32xf32>
    %22 = vector.broadcast %20 : vector<1x32xf32> to vector<16x32xf32>
    %23 = arith.subf %1, %22 : vector<16x32xf32>
    %24 = vector.broadcast %21 : vector<1x32xf32> to vector<16x32xf32>
    %25 = arith.mulf %23, %24 : vector<16x32xf32>
    %c0_14 = arith.constant 0 : index
    %c0_15 = arith.constant 0 : index
    %26 = vector.load %arg4[%c0_14, %c0_15] : memref<1x32xf32, #tpu.memory_space<vmem>>, vector<1x32xf32>
    %27 = vector.broadcast %26 : vector<1x32xf32> to vector<16x32xf32>
    %28 = arith.mulf %25, %27 : vector<16x32xf32>
    %c0_16 = arith.constant 0 : index
    %c0_17 = arith.constant 0 : index
    %29 = vector.load %arg5[%c0_16, %c0_17] : memref<1x32xf32, #tpu.memory_space<vmem>>, vector<1x32xf32>
    %30 = vector.broadcast %29 : vector<1x32xf32> to vector<16x32xf32>
    %31 = arith.addf %28, %30 : vector<16x32xf32>
    %32 = arith.negf %31 : vector<16x32xf32>
    %33 = math.exp %32 : vector<16x32xf32>
    %cst_18 = arith.constant 1.000000e+00 : f32
    %34 = vector.broadcast %cst_18 : f32 to vector<16x32xf32>
    %35 = arith.addf %34, %33 : vector<16x32xf32>
    %36 = arith.divf %34, %35 : vector<16x32xf32>
    %37 = arith.mulf %31, %36 : vector<16x32xf32>
    %cst_19 = arith.constant 0.000000e+00 : f32
    %38 = vector.broadcast %cst_19 : f32 to vector<2x32xf32>
    %c0_20 = arith.constant 0 : index
    %c0_21 = arith.constant 0 : index
    %39 = vector.load %arg13[%c0_20, %c0_21] : memref<20x32xf32, #tpu.memory_space<vmem>>, vector<2x32xf32>
    tpu.vector_store %arg13[%c0_20, %c0_21], %38 {strides = array<i32>} : memref<20x32xf32, #tpu.memory_space<vmem>>, vector<2x32xf32>,
    %c18 = arith.constant 18 : index
    %c0_22 = arith.constant 0 : index
    %40 = vector.load %arg13[%c18, %c0_22] : memref<20x32xf32, #tpu.memory_space<vmem>>, vector<2x32xf32>
    tpu.vector_store %arg13[%c18, %c0_22], %38 {strides = array<i32>} : memref<20x32xf32, #tpu.memory_space<vmem>>, vector<2x32xf32>,
    %c2 = arith.constant 2 : index
    %c0_23 = arith.constant 0 : index
    %41 = vector.load %arg13[%c2, %c0_23] : memref<20x32xf32, #tpu.memory_space<vmem>>, vector<16x32xf32>
    tpu.vector_store %arg13[%c2, %c0_23], %37 {strides = array<i32>} : memref<20x32xf32, #tpu.memory_space<vmem>>, vector<16x32xf32>,
    %c0_24 = arith.constant 0 : index
    %c0_25 = arith.constant 0 : index
    %42 = vector.load %arg13[%c0_24, %c0_25] : memref<20x32xf32, #tpu.memory_space<vmem>>, vector<20x32xf32>
    %c0_26 = arith.constant 0 : index
    %c0_27 = arith.constant 0 : index
    %c0_28 = arith.constant 0 : index
    %43 = vector.load %arg6[%c0_26, %c0_27, %c0_28] : memref<3x32x32xbf16, #tpu.memory_space<vmem>>, vector<3x32x32xbf16>
    %44 = vector.extract_strided_slice %42 {offsets = [0, 0], sizes = [18, 32], strides = [1, 1]} : vector<20x32xf32> to vector<18x32xf32>
    %45 = arith.truncf %44 : vector<18x32xf32> to vector<18x32xbf16>
    %46 = vector.extract_strided_slice %43 {offsets = [0, 0, 0], sizes = [1, 32, 32], strides = [1, 1, 1]} : vector<3x32x32xbf16> to vector<1x32x32xbf16>
    %47 = vector.shape_cast %46 : vector<1x32x32xbf16> to vector<32x32xbf16>
    %cst_29 = arith.constant dense<0.000000e+00> : vector<18x32xf32>
    %48 = tpu.matmul %45, %47, %cst_29 {dimension_numbers = #tpu.dot_dimension_numbers<[1], [0], [0], [1], [0, 0, 1, 1], [], []>} : vector<18x32xbf16>, vector<32x32xbf16>, vector<18x32xf32> -> vector<18x32xf32>
    %49 = vector.extract_strided_slice %42 {offsets = [1, 0], sizes = [18, 32], strides = [1, 1]} : vector<20x32xf32> to vector<18x32xf32>
    %50 = arith.truncf %49 : vector<18x32xf32> to vector<18x32xbf16>
    %51 = vector.extract_strided_slice %43 {offsets = [1, 0, 0], sizes = [1, 32, 32], strides = [1, 1, 1]} : vector<3x32x32xbf16> to vector<1x32x32xbf16>
    %52 = vector.shape_cast %51 : vector<1x32x32xbf16> to vector<32x32xbf16>
    %cst_30 = arith.constant dense<0.000000e+00> : vector<18x32xf32>
    %53 = tpu.matmul %50, %52, %cst_30 {dimension_numbers = #tpu.dot_dimension_numbers<[1], [0], [0], [1], [0, 0, 1, 1], [], []>} : vector<18x32xbf16>, vector<32x32xbf16>, vector<18x32xf32> -> vector<18x32xf32>
    %54 = arith.addf %48, %53 : vector<18x32xf32>
    %55 = vector.extract_strided_slice %42 {offsets = [2, 0], sizes = [18, 32], strides = [1, 1]} : vector<20x32xf32> to vector<18x32xf32>
    %56 = arith.truncf %55 : vector<18x32xf32> to vector<18x32xbf16>
    %57 = vector.extract_strided_slice %43 {offsets = [2, 0, 0], sizes = [1, 32, 32], strides = [1, 1, 1]} : vector<3x32x32xbf16> to vector<1x32x32xbf16>
    %58 = vector.shape_cast %57 : vector<1x32x32xbf16> to vector<32x32xbf16>
    %cst_31 = arith.constant dense<0.000000e+00> : vector<18x32xf32>
    %59 = tpu.matmul %56, %58, %cst_31 {dimension_numbers = #tpu.dot_dimension_numbers<[1], [0], [0], [1], [0, 0, 1, 1], [], []>} : vector<18x32xbf16>, vector<32x32xbf16>, vector<18x32xf32> -> vector<18x32xf32>
    %60 = arith.addf %54, %59 : vector<18x32xf32>
    %c0_32 = arith.constant 0 : index
    %c0_33 = arith.constant 0 : index
    %61 = vector.load %arg7[%c0_32, %c0_33] : memref<1x32xf32, #tpu.memory_space<vmem>>, vector<1x32xf32>
    %62 = vector.broadcast %61 : vector<1x32xf32> to vector<18x32xf32>
    %63 = arith.addf %60, %62 : vector<18x32xf32>
    %64 = vector.extract_strided_slice %63 {offsets = [1, 0], sizes = [16, 32], strides = [1, 1]} : vector<18x32xf32> to vector<16x32xf32>
    %cst_34 = arith.constant dense<0.000000e+00> : vector<32xf32>
    %65 = vector.multi_reduction <add>, %64, %cst_34 [0] : vector<16x32xf32> to vector<32xf32>
    %66 = vector.shape_cast %65 : vector<32xf32> to vector<1x32xf32>
    %67 = arith.mulf %64, %64 : vector<16x32xf32>
    %cst_35 = arith.constant dense<0.000000e+00> : vector<32xf32>
    %68 = vector.multi_reduction <add>, %67, %cst_35 [0] : vector<16x32xf32> to vector<32xf32>
    %69 = vector.shape_cast %68 : vector<32xf32> to vector<1x32xf32>
    %cst_36 = arith.constant dense<0.000000e+00> : vector<1x32xf32>
    %70 = tpu.matmul %66, %2, %cst_36 {dimension_numbers = #tpu.dot_dimension_numbers<[1], [0], [0], [1], [0, 0, 1, 1], [], []>} : vector<1x32xf32>, vector<32x32xf32>, vector<1x32xf32> -> vector<1x32xf32>
    %cst_37 = arith.constant dense<0.000000e+00> : vector<1x32xf32>
    %71 = tpu.matmul %69, %2, %cst_37 {dimension_numbers = #tpu.dot_dimension_numbers<[1], [0], [0], [1], [0, 0, 1, 1], [], []>} : vector<1x32xf32>, vector<32x32xf32>, vector<1x32xf32> -> vector<1x32xf32>
    %cst_38 = arith.constant 1.600000e+01 : f32
    %72 = vector.broadcast %cst_38 : f32 to vector<1x32xf32>
    %73 = arith.divf %70, %72 : vector<1x32xf32>
    %cst_39 = arith.constant 1.600000e+01 : f32
    %74 = vector.broadcast %cst_39 : f32 to vector<1x32xf32>
    %75 = arith.divf %71, %74 : vector<1x32xf32>
    %76 = arith.mulf %73, %73 : vector<1x32xf32>
    %77 = arith.subf %75, %76 : vector<1x32xf32>
    %cst_40 = arith.constant 9.99999997E-7 : f32
    %78 = vector.broadcast %cst_40 : f32 to vector<1x32xf32>
    %79 = arith.addf %77, %78 : vector<1x32xf32>
    %80 = math.rsqrt %79 : vector<1x32xf32>
    %cst_41 = arith.constant dense<0.000000e+00> : vector<1x32xf32>
    %81 = tpu.matmul %73, %3, %cst_41 {dimension_numbers = #tpu.dot_dimension_numbers<[1], [0], [0], [1], [0, 0, 1, 1], [], []>} : vector<1x32xf32>, vector<32x32xf32>, vector<1x32xf32> -> vector<1x32xf32>
    %cst_42 = arith.constant dense<0.000000e+00> : vector<1x32xf32>
    %82 = tpu.matmul %80, %3, %cst_42 {dimension_numbers = #tpu.dot_dimension_numbers<[1], [0], [0], [1], [0, 0, 1, 1], [], []>} : vector<1x32xf32>, vector<32x32xf32>, vector<1x32xf32> -> vector<1x32xf32>
    %83 = vector.broadcast %81 : vector<1x32xf32> to vector<16x32xf32>
    %84 = arith.subf %64, %83 : vector<16x32xf32>
    %85 = vector.broadcast %82 : vector<1x32xf32> to vector<16x32xf32>
    %86 = arith.mulf %84, %85 : vector<16x32xf32>
    %c0_43 = arith.constant 0 : index
    %c0_44 = arith.constant 0 : index
    %87 = vector.load %arg8[%c0_43, %c0_44] : memref<1x32xf32, #tpu.memory_space<vmem>>, vector<1x32xf32>
    %88 = vector.broadcast %87 : vector<1x32xf32> to vector<16x32xf32>
    %89 = arith.mulf %86, %88 : vector<16x32xf32>
    %c0_45 = arith.constant 0 : index
    %c0_46 = arith.constant 0 : index
    %90 = vector.load %arg9[%c0_45, %c0_46] : memref<1x32xf32, #tpu.memory_space<vmem>>, vector<1x32xf32>
    %91 = vector.broadcast %90 : vector<1x32xf32> to vector<16x32xf32>
    %92 = arith.addf %89, %91 : vector<16x32xf32>
    %93 = arith.negf %92 : vector<16x32xf32>
    %94 = math.exp %93 : vector<16x32xf32>
    %cst_47 = arith.constant 1.000000e+00 : f32
    %95 = vector.broadcast %cst_47 : f32 to vector<16x32xf32>
    %96 = arith.addf %95, %94 : vector<16x32xf32>
    %97 = arith.divf %95, %96 : vector<16x32xf32>
    %98 = arith.mulf %92, %97 : vector<16x32xf32>
    %cst_48 = arith.constant 0.000000e+00 : f32
    %99 = vector.broadcast %cst_48 : f32 to vector<1x32xf32>
    %c0_49 = arith.constant 0 : index
    %c0_50 = arith.constant 0 : index
    %100 = vector.load %arg14[%c0_49, %c0_50] : memref<18x32xf32, #tpu.memory_space<vmem>>, vector<1x32xf32>
    tpu.vector_store %arg14[%c0_49, %c0_50], %99 {strides = array<i32>} : memref<18x32xf32, #tpu.memory_space<vmem>>, vector<1x32xf32>,
    %c17 = arith.constant 17 : index
    %c0_51 = arith.constant 0 : index
    %101 = vector.load %arg14[%c17, %c0_51] : memref<18x32xf32, #tpu.memory_space<vmem>>, vector<1x32xf32>
    tpu.vector_store %arg14[%c17, %c0_51], %99 {strides = array<i32>} : memref<18x32xf32, #tpu.memory_space<vmem>>, vector<1x32xf32>,
    %c1 = arith.constant 1 : index
    %c0_52 = arith.constant 0 : index
    %102 = vector.load %arg14[%c1, %c0_52] : memref<18x32xf32, #tpu.memory_space<vmem>>, vector<16x32xf32>
    tpu.vector_store %arg14[%c1, %c0_52], %98 {strides = array<i32>} : memref<18x32xf32, #tpu.memory_space<vmem>>, vector<16x32xf32>,
    %c0_53 = arith.constant 0 : index
    %c0_54 = arith.constant 0 : index
    %103 = vector.load %arg14[%c0_53, %c0_54] : memref<18x32xf32, #tpu.memory_space<vmem>>, vector<18x32xf32>
    %c0_55 = arith.constant 0 : index
    %c0_56 = arith.constant 0 : index
    %c0_57 = arith.constant 0 : index
    %104 = vector.load %arg10[%c0_55, %c0_56, %c0_57] : memref<3x32x32xbf16, #tpu.memory_space<vmem>>, vector<3x32x32xbf16>
    %105 = vector.extract_strided_slice %103 {offsets = [0, 0], sizes = [16, 32], strides = [1, 1]} : vector<18x32xf32> to vector<16x32xf32>
    %106 = arith.truncf %105 : vector<16x32xf32> to vector<16x32xbf16>
    %107 = vector.extract_strided_slice %104 {offsets = [0, 0, 0], sizes = [1, 32, 32], strides = [1, 1, 1]} : vector<3x32x32xbf16> to vector<1x32x32xbf16>
    %108 = vector.shape_cast %107 : vector<1x32x32xbf16> to vector<32x32xbf16>
    %cst_58 = arith.constant dense<0.000000e+00> : vector<16x32xf32>
    %109 = tpu.matmul %106, %108, %cst_58 {dimension_numbers = #tpu.dot_dimension_numbers<[1], [0], [0], [1], [0, 0, 1, 1], [], []>} : vector<16x32xbf16>, vector<32x32xbf16>, vector<16x32xf32> -> vector<16x32xf32>
    %110 = vector.extract_strided_slice %103 {offsets = [1, 0], sizes = [16, 32], strides = [1, 1]} : vector<18x32xf32> to vector<16x32xf32>
    %111 = arith.truncf %110 : vector<16x32xf32> to vector<16x32xbf16>
    %112 = vector.extract_strided_slice %104 {offsets = [1, 0, 0], sizes = [1, 32, 32], strides = [1, 1, 1]} : vector<3x32x32xbf16> to vector<1x32x32xbf16>
    %113 = vector.shape_cast %112 : vector<1x32x32xbf16> to vector<32x32xbf16>
    %cst_59 = arith.constant dense<0.000000e+00> : vector<16x32xf32>
    %114 = tpu.matmul %111, %113, %cst_59 {dimension_numbers = #tpu.dot_dimension_numbers<[1], [0], [0], [1], [0, 0, 1, 1], [], []>} : vector<16x32xbf16>, vector<32x32xbf16>, vector<16x32xf32> -> vector<16x32xf32>
    %115 = arith.addf %109, %114 : vector<16x32xf32>
    %116 = vector.extract_strided_slice %103 {offsets = [2, 0], sizes = [16, 32], strides = [1, 1]} : vector<18x32xf32> to vector<16x32xf32>
    %117 = arith.truncf %116 : vector<16x32xf32> to vector<16x32xbf16>
    %118 = vector.extract_strided_slice %104 {offsets = [2, 0, 0], sizes = [1, 32, 32], strides = [1, 1, 1]} : vector<3x32x32xbf16> to vector<1x32x32xbf16>
    %119 = vector.shape_cast %118 : vector<1x32x32xbf16> to vector<32x32xbf16>
    %cst_60 = arith.constant dense<0.000000e+00> : vector<16x32xf32>
    %120 = tpu.matmul %117, %119, %cst_60 {dimension_numbers = #tpu.dot_dimension_numbers<[1], [0], [0], [1], [0, 0, 1, 1], [], []>} : vector<16x32xbf16>, vector<32x32xbf16>, vector<16x32xf32> -> vector<16x32xf32>
    %121 = arith.addf %115, %120 : vector<16x32xf32>
    %c0_61 = arith.constant 0 : index
    %c0_62 = arith.constant 0 : index
    %122 = vector.load %arg11[%c0_61, %c0_62] : memref<1x32xf32, #tpu.memory_space<vmem>>, vector<1x32xf32>
    %123 = vector.broadcast %122 : vector<1x32xf32> to vector<16x32xf32>
    %124 = arith.addf %121, %123 : vector<16x32xf32>
    %125 = arith.addf %1, %124 : vector<16x32xf32>
    %c0_63 = arith.constant 0 : index
    %c0_64 = arith.constant 0 : index
    %c0_65 = arith.constant 0 : index
    %126 = vector.load %arg12[%c0_63, %c0_64, %c0_65] : memref<1x16x32xf32, #tpu.memory_space<vmem>>, vector<1x16x32xf32>
    %127 = vector.shape_cast %126 : vector<1x16x32xf32> to vector<16x32xf32>
    %128 = vector.shape_cast %125 : vector<16x32xf32> to vector<1x16x32xf32>
    tpu.vector_store %arg12[%c0_63, %c0_64, %c0_65], %128 {strides = array<i32>} : memref<1x16x32xf32, #tpu.memory_space<vmem>>, vector<1x16x32xf32>,
    return
  }
  func.func @transform_0(%arg0: i32) -> (i32, i32, i32) {
    %c0_i32 = arith.constant 0 : i32
    %c0_i32_0 = arith.constant 0 : i32
    %c0_i32_1 = arith.constant 0 : i32
    return %arg0, %c0_i32, %c0_i32_0 : i32, i32, i32
  }
  func.func @transform_1(%arg0: i32) -> (i32, i32) {
    %c0_i32 = arith.constant 0 : i32
    %c0_i32_0 = arith.constant 0 : i32
    %c0_i32_1 = arith.constant 0 : i32
    return %c0_i32, %c0_i32_0 : i32, i32
  }
  func.func @transform_2(%arg0: i32) -> (i32, i32) {
    %c0_i32 = arith.constant 0 : i32
    %c0_i32_0 = arith.constant 0 : i32
    %c0_i32_1 = arith.constant 0 : i32
    return %c0_i32, %c0_i32_0 : i32, i32
  }
  func.func @transform_3(%arg0: i32) -> (i32, i32) {
    %c0_i32 = arith.constant 0 : i32
    %c0_i32_0 = arith.constant 0 : i32
    %c0_i32_1 = arith.constant 0 : i32
    return %c0_i32, %c0_i32_0 : i32, i32
  }
  func.func @transform_4(%arg0: i32) -> (i32, i32) {
    %c0_i32 = arith.constant 0 : i32
    %c0_i32_0 = arith.constant 0 : i32
    %c0_i32_1 = arith.constant 0 : i32
    return %c0_i32, %c0_i32_0 : i32, i32
  }
  func.func @transform_5(%arg0: i32) -> (i32, i32, i32) {
    %c0_i32 = arith.constant 0 : i32
    %c0_i32_0 = arith.constant 0 : i32
    %c0_i32_1 = arith.constant 0 : i32
    %c0_i32_2 = arith.constant 0 : i32
    return %c0_i32, %c0_i32_0, %c0_i32_1 : i32, i32, i32
  }
  func.func @transform_6(%arg0: i32) -> (i32, i32) {
    %c0_i32 = arith.constant 0 : i32
    %c0_i32_0 = arith.constant 0 : i32
    %c0_i32_1 = arith.constant 0 : i32
    return %c0_i32, %c0_i32_0 : i32, i32
  }
  func.func @transform_7(%arg0: i32) -> (i32, i32) {
    %c0_i32 = arith.constant 0 : i32
    %c0_i32_0 = arith.constant 0 : i32
    %c0_i32_1 = arith.constant 0 : i32
    return %c0_i32, %c0_i32_0 : i32, i32
  }
  func.func @transform_8(%arg0: i32) -> (i32, i32) {
    %c0_i32 = arith.constant 0 : i32
    %c0_i32_0 = arith.constant 0 : i32
    %c0_i32_1 = arith.constant 0 : i32
    return %c0_i32, %c0_i32_0 : i32, i32
  }
  func.func @transform_9(%arg0: i32) -> (i32, i32, i32) {
    %c0_i32 = arith.constant 0 : i32
    %c0_i32_0 = arith.constant 0 : i32
    %c0_i32_1 = arith.constant 0 : i32
    %c0_i32_2 = arith.constant 0 : i32
    return %c0_i32, %c0_i32_0, %c0_i32_1 : i32, i32, i32
  }
  func.func @transform_10(%arg0: i32) -> (i32, i32) {
    %c0_i32 = arith.constant 0 : i32
    %c0_i32_0 = arith.constant 0 : i32
    %c0_i32_1 = arith.constant 0 : i32
    return %c0_i32, %c0_i32_0 : i32, i32
  }
  func.func @transform_11(%arg0: i32) -> (i32, i32, i32) {
    %c0_i32 = arith.constant 0 : i32
    %c0_i32_0 = arith.constant 0 : i32
    %c0_i32_1 = arith.constant 0 : i32
    return %arg0, %c0_i32, %c0_i32_0 : i32, i32, i32
  }
}

module attributes {stable_mosaic.version = 11 : i64} {
  func.func @_attn_tiled_kernel(%arg0: i32, %arg1: i32, %arg2: memref<1x16x32xf32, #tpu.memory_space<vmem>>, %arg3: memref<1x16x32xbf16, #tpu.memory_space<vmem>>, %arg4: memref<1x16x32xbf16, #tpu.memory_space<vmem>>, %arg5: memref<1x16x32xbf16, #tpu.memory_space<vmem>>, %arg6: memref<32x32xbf16, #tpu.memory_space<vmem>>, %arg7: memref<1x32xf32, #tpu.memory_space<vmem>>, %arg8: memref<1x16x32xf32, #tpu.memory_space<vmem>>) attributes {dimension_semantics = [#tpu.dimension_semantics<parallel>, #tpu.dimension_semantics<parallel>], iteration_bounds = array<i64: 2, 1>, scalar_prefetch = 0 : i64, scratch_operands = 0 : i64, tpu.core_type = #tpu.core_type<tc>, window_params = [{transform_indices = @transform_0, window_bounds = array<i64: 1, 16, 32>}, {transform_indices = @transform_1, window_bounds = array<i64: 1, 16, 32>}, {transform_indices = @transform_2, window_bounds = array<i64: 1, 16, 32>}, {transform_indices = @transform_3, window_bounds = array<i64: 1, 16, 32>}, {pipeline_mode = #tpu.pipeline_mode<synchronous>, transform_indices = @transform_4, window_bounds = array<i64: 32, 32>}, {pipeline_mode = #tpu.pipeline_mode<synchronous>, transform_indices = @transform_5, window_bounds = array<i64: 1, 32>}, {transform_indices = @transform_6, window_bounds = array<i64: 1, 16, 32>}]} {
    %c0 = arith.constant 0 : index
    %c0_0 = arith.constant 0 : index
    %c0_1 = arith.constant 0 : index
    %0 = vector.load %arg3[%c0, %c0_0, %c0_1] : memref<1x16x32xbf16, #tpu.memory_space<vmem>>, vector<1x16x32xbf16>
    %1 = vector.shape_cast %0 : vector<1x16x32xbf16> to vector<16x32xbf16>
    %c0_2 = arith.constant 0 : index
    %c0_3 = arith.constant 0 : index
    %c0_4 = arith.constant 0 : index
    %2 = vector.load %arg4[%c0_2, %c0_3, %c0_4] : memref<1x16x32xbf16, #tpu.memory_space<vmem>>, vector<1x16x32xbf16>
    %3 = vector.shape_cast %2 : vector<1x16x32xbf16> to vector<16x32xbf16>
    %c0_5 = arith.constant 0 : index
    %c0_6 = arith.constant 0 : index
    %c0_7 = arith.constant 0 : index
    %4 = vector.load %arg5[%c0_5, %c0_6, %c0_7] : memref<1x16x32xbf16, #tpu.memory_space<vmem>>, vector<1x16x32xbf16>
    %5 = vector.shape_cast %4 : vector<1x16x32xbf16> to vector<16x32xbf16>
    %cst = arith.constant dense<0.000000e+00> : vector<16x16xf32>
    %6 = tpu.matmul %1, %3, %cst {dimension_numbers = #tpu.dot_dimension_numbers<[1], [1], [0], [0], [0, 0, 1, 0], [], []>} : vector<16x32xbf16>, vector<16x32xbf16>, vector<16x16xf32> -> vector<16x16xf32>
    %cst_8 = arith.constant 0.176776692 : f32
    %7 = vector.broadcast %cst_8 : f32 to vector<16x16xf32>
    %8 = arith.mulf %6, %7 : vector<16x16xf32>
    %cst_9 = arith.constant dense<0xFF800000> : vector<16xf32>
    %9 = vector.multi_reduction <maximumf>, %8, %cst_9 [1] : vector<16x16xf32> to vector<16xf32>
    %10 = vector.shape_cast %9 : vector<16xf32> to vector<16x1xf32>
    %11 = vector.broadcast %10 : vector<16x1xf32> to vector<16x16xf32>
    %12 = arith.subf %8, %11 : vector<16x16xf32>
    %13 = math.exp %12 : vector<16x16xf32>
    %cst_10 = arith.constant dense<0.000000e+00> : vector<16xf32>
    %14 = vector.multi_reduction <add>, %13, %cst_10 [1] : vector<16x16xf32> to vector<16xf32>
    %15 = vector.shape_cast %14 : vector<16xf32> to vector<16x1xf32>
    %16 = tpu.reciprocal %15 {approx = true} : vector<16x1xf32> -> vector<16x1xf32>
    %17 = vector.broadcast %16 : vector<16x1xf32> to vector<16x16xf32>
    %18 = arith.mulf %13, %17 : vector<16x16xf32>
    %19 = arith.truncf %18 : vector<16x16xf32> to vector<16x16xbf16>
    %cst_11 = arith.constant dense<0.000000e+00> : vector<16x32xf32>
    %20 = tpu.matmul %19, %5, %cst_11 {dimension_numbers = #tpu.dot_dimension_numbers<[1], [0], [0], [1], [0, 0, 1, 1], [], []>} : vector<16x16xbf16>, vector<16x32xbf16>, vector<16x32xf32> -> vector<16x32xf32>
    %21 = arith.truncf %20 : vector<16x32xf32> to vector<16x32xbf16>
    %c0_12 = arith.constant 0 : index
    %c0_13 = arith.constant 0 : index
    %22 = vector.load %arg6[%c0_12, %c0_13] : memref<32x32xbf16, #tpu.memory_space<vmem>>, vector<32x32xbf16>
    %cst_14 = arith.constant dense<0.000000e+00> : vector<16x32xf32>
    %23 = tpu.matmul %21, %22, %cst_14 {dimension_numbers = #tpu.dot_dimension_numbers<[1], [0], [0], [1], [0, 0, 1, 1], [], []>} : vector<16x32xbf16>, vector<32x32xbf16>, vector<16x32xf32> -> vector<16x32xf32>
    %c0_15 = arith.constant 0 : index
    %c0_16 = arith.constant 0 : index
    %24 = vector.load %arg7[%c0_15, %c0_16] : memref<1x32xf32, #tpu.memory_space<vmem>>, vector<1x32xf32>
    %25 = vector.broadcast %24 : vector<1x32xf32> to vector<16x32xf32>
    %26 = arith.addf %23, %25 : vector<16x32xf32>
    %c0_17 = arith.constant 0 : index
    %c0_18 = arith.constant 0 : index
    %c0_19 = arith.constant 0 : index
    %27 = vector.load %arg2[%c0_17, %c0_18, %c0_19] : memref<1x16x32xf32, #tpu.memory_space<vmem>>, vector<1x16x32xf32>
    %28 = vector.shape_cast %27 : vector<1x16x32xf32> to vector<16x32xf32>
    %29 = arith.addf %28, %26 : vector<16x32xf32>
    %c0_20 = arith.constant 0 : index
    %c0_21 = arith.constant 0 : index
    %c0_22 = arith.constant 0 : index
    %30 = vector.load %arg8[%c0_20, %c0_21, %c0_22] : memref<1x16x32xf32, #tpu.memory_space<vmem>>, vector<1x16x32xf32>
    %31 = vector.shape_cast %30 : vector<1x16x32xf32> to vector<16x32xf32>
    %32 = vector.shape_cast %29 : vector<16x32xf32> to vector<1x16x32xf32>
    tpu.vector_store %arg8[%c0_20, %c0_21, %c0_22], %32 {strides = array<i32>} : memref<1x16x32xf32, #tpu.memory_space<vmem>>, vector<1x16x32xf32>,
    return
  }
  func.func @transform_0(%arg0: i32, %arg1: i32) -> (i32, i32, i32) {
    %c0_i32 = arith.constant 0 : i32
    %c0_i32_0 = arith.constant 0 : i32
    return %arg0, %arg1, %c0_i32 : i32, i32, i32
  }
  func.func @transform_1(%arg0: i32, %arg1: i32) -> (i32, i32, i32) {
    %c0_i32 = arith.constant 0 : i32
    %c0_i32_0 = arith.constant 0 : i32
    return %arg0, %arg1, %c0_i32 : i32, i32, i32
  }
  func.func @transform_2(%arg0: i32, %arg1: i32) -> (i32, i32, i32) {
    %c0_i32 = arith.constant 0 : i32
    %c0_i32_0 = arith.constant 0 : i32
    %c0_i32_1 = arith.constant 0 : i32
    return %arg0, %c0_i32, %c0_i32_0 : i32, i32, i32
  }
  func.func @transform_3(%arg0: i32, %arg1: i32) -> (i32, i32, i32) {
    %c0_i32 = arith.constant 0 : i32
    %c0_i32_0 = arith.constant 0 : i32
    %c0_i32_1 = arith.constant 0 : i32
    return %arg0, %c0_i32, %c0_i32_0 : i32, i32, i32
  }
  func.func @transform_4(%arg0: i32, %arg1: i32) -> (i32, i32) {
    %c0_i32 = arith.constant 0 : i32
    %c0_i32_0 = arith.constant 0 : i32
    %c0_i32_1 = arith.constant 0 : i32
    return %c0_i32, %c0_i32_0 : i32, i32
  }
  func.func @transform_5(%arg0: i32, %arg1: i32) -> (i32, i32) {
    %c0_i32 = arith.constant 0 : i32
    %c0_i32_0 = arith.constant 0 : i32
    %c0_i32_1 = arith.constant 0 : i32
    return %c0_i32, %c0_i32_0 : i32, i32
  }
  func.func @transform_6(%arg0: i32, %arg1: i32) -> (i32, i32, i32) {
    %c0_i32 = arith.constant 0 : i32
    %c0_i32_0 = arith.constant 0 : i32
    return %arg0, %arg1, %c0_i32 : i32, i32, i32
  }
}

module attributes {stable_mosaic.version = 11 : i64} {
  func.func @_gn_ln_kernel(%arg0: i32, %arg1: memref<1x16x32xf32, #tpu.memory_space<vmem>>, %arg2: memref<32x32xf32, #tpu.memory_space<vmem>>, %arg3: memref<32x32xf32, #tpu.memory_space<vmem>>, %arg4: memref<1x32xf32, #tpu.memory_space<vmem>>, %arg5: memref<1x32xf32, #tpu.memory_space<vmem>>, %arg6: memref<1x32xf32, #tpu.memory_space<vmem>>, %arg7: memref<1x32xf32, #tpu.memory_space<vmem>>, %arg8: memref<1x16x32xf32, #tpu.memory_space<vmem>>) attributes {dimension_semantics = [#tpu.dimension_semantics<parallel>], iteration_bounds = array<i64: 2>, scalar_prefetch = 0 : i64, scratch_operands = 0 : i64, tpu.core_type = #tpu.core_type<tc>, window_params = [{transform_indices = @transform_0, window_bounds = array<i64: 1, 16, 32>}, {pipeline_mode = #tpu.pipeline_mode<synchronous>, transform_indices = @transform_1, window_bounds = array<i64: 32, 32>}, {pipeline_mode = #tpu.pipeline_mode<synchronous>, transform_indices = @transform_2, window_bounds = array<i64: 32, 32>}, {pipeline_mode = #tpu.pipeline_mode<synchronous>, transform_indices = @transform_3, window_bounds = array<i64: 1, 32>}, {pipeline_mode = #tpu.pipeline_mode<synchronous>, transform_indices = @transform_4, window_bounds = array<i64: 1, 32>}, {pipeline_mode = #tpu.pipeline_mode<synchronous>, transform_indices = @transform_5, window_bounds = array<i64: 1, 32>}, {pipeline_mode = #tpu.pipeline_mode<synchronous>, transform_indices = @transform_6, window_bounds = array<i64: 1, 32>}, {transform_indices = @transform_7, window_bounds = array<i64: 1, 16, 32>}]} {
    %c0 = arith.constant 0 : index
    %c0_0 = arith.constant 0 : index
    %c0_1 = arith.constant 0 : index
    %0 = vector.load %arg1[%c0, %c0_0, %c0_1] : memref<1x16x32xf32, #tpu.memory_space<vmem>>, vector<1x16x32xf32>
    %1 = vector.shape_cast %0 : vector<1x16x32xf32> to vector<16x32xf32>
    %c0_2 = arith.constant 0 : index
    %c0_3 = arith.constant 0 : index
    %2 = vector.load %arg2[%c0_2, %c0_3] : memref<32x32xf32, #tpu.memory_space<vmem>>, vector<32x32xf32>
    %c0_4 = arith.constant 0 : index
    %c0_5 = arith.constant 0 : index
    %3 = vector.load %arg3[%c0_4, %c0_5] : memref<32x32xf32, #tpu.memory_space<vmem>>, vector<32x32xf32>
    %cst = arith.constant dense<0.000000e+00> : vector<32xf32>
    %4 = vector.multi_reduction <add>, %1, %cst [0] : vector<16x32xf32> to vector<32xf32>
    %5 = vector.shape_cast %4 : vector<32xf32> to vector<1x32xf32>
    %6 = arith.mulf %1, %1 : vector<16x32xf32>
    %cst_6 = arith.constant dense<0.000000e+00> : vector<32xf32>
    %7 = vector.multi_reduction <add>, %6, %cst_6 [0] : vector<16x32xf32> to vector<32xf32>
    %8 = vector.shape_cast %7 : vector<32xf32> to vector<1x32xf32>
    %cst_7 = arith.constant dense<0.000000e+00> : vector<1x32xf32>
    %9 = tpu.matmul %5, %2, %cst_7 {dimension_numbers = #tpu.dot_dimension_numbers<[1], [0], [0], [1], [0, 0, 1, 1], [], []>} : vector<1x32xf32>, vector<32x32xf32>, vector<1x32xf32> -> vector<1x32xf32>
    %cst_8 = arith.constant dense<0.000000e+00> : vector<1x32xf32>
    %10 = tpu.matmul %8, %2, %cst_8 {dimension_numbers = #tpu.dot_dimension_numbers<[1], [0], [0], [1], [0, 0, 1, 1], [], []>} : vector<1x32xf32>, vector<32x32xf32>, vector<1x32xf32> -> vector<1x32xf32>
    %cst_9 = arith.constant 1.600000e+01 : f32
    %11 = vector.broadcast %cst_9 : f32 to vector<1x32xf32>
    %12 = arith.divf %9, %11 : vector<1x32xf32>
    %cst_10 = arith.constant 1.600000e+01 : f32
    %13 = vector.broadcast %cst_10 : f32 to vector<1x32xf32>
    %14 = arith.divf %10, %13 : vector<1x32xf32>
    %15 = arith.mulf %12, %12 : vector<1x32xf32>
    %16 = arith.subf %14, %15 : vector<1x32xf32>
    %cst_11 = arith.constant 9.99999997E-7 : f32
    %17 = vector.broadcast %cst_11 : f32 to vector<1x32xf32>
    %18 = arith.addf %16, %17 : vector<1x32xf32>
    %19 = math.rsqrt %18 : vector<1x32xf32>
    %cst_12 = arith.constant dense<0.000000e+00> : vector<1x32xf32>
    %20 = tpu.matmul %12, %3, %cst_12 {dimension_numbers = #tpu.dot_dimension_numbers<[1], [0], [0], [1], [0, 0, 1, 1], [], []>} : vector<1x32xf32>, vector<32x32xf32>, vector<1x32xf32> -> vector<1x32xf32>
    %cst_13 = arith.constant dense<0.000000e+00> : vector<1x32xf32>
    %21 = tpu.matmul %19, %3, %cst_13 {dimension_numbers = #tpu.dot_dimension_numbers<[1], [0], [0], [1], [0, 0, 1, 1], [], []>} : vector<1x32xf32>, vector<32x32xf32>, vector<1x32xf32> -> vector<1x32xf32>
    %22 = vector.broadcast %20 : vector<1x32xf32> to vector<16x32xf32>
    %23 = arith.subf %1, %22 : vector<16x32xf32>
    %24 = vector.broadcast %21 : vector<1x32xf32> to vector<16x32xf32>
    %25 = arith.mulf %23, %24 : vector<16x32xf32>
    %c0_14 = arith.constant 0 : index
    %c0_15 = arith.constant 0 : index
    %26 = vector.load %arg4[%c0_14, %c0_15] : memref<1x32xf32, #tpu.memory_space<vmem>>, vector<1x32xf32>
    %27 = vector.broadcast %26 : vector<1x32xf32> to vector<16x32xf32>
    %28 = arith.mulf %25, %27 : vector<16x32xf32>
    %c0_16 = arith.constant 0 : index
    %c0_17 = arith.constant 0 : index
    %29 = vector.load %arg5[%c0_16, %c0_17] : memref<1x32xf32, #tpu.memory_space<vmem>>, vector<1x32xf32>
    %30 = vector.broadcast %29 : vector<1x32xf32> to vector<16x32xf32>
    %31 = arith.addf %28, %30 : vector<16x32xf32>
    %cst_18 = arith.constant dense<0.000000e+00> : vector<16xf32>
    %32 = vector.multi_reduction <add>, %31, %cst_18 [1] : vector<16x32xf32> to vector<16xf32>
    %33 = vector.shape_cast %32 : vector<16xf32> to vector<16x1xf32>
    %cst_19 = arith.constant 3.200000e+01 : f32
    %34 = vector.broadcast %cst_19 : f32 to vector<16x1xf32>
    %35 = arith.divf %33, %34 : vector<16x1xf32>
    %36 = vector.broadcast %35 : vector<16x1xf32> to vector<16x32xf32>
    %37 = arith.subf %31, %36 : vector<16x32xf32>
    %38 = arith.mulf %37, %37 : vector<16x32xf32>
    %cst_20 = arith.constant dense<0.000000e+00> : vector<16xf32>
    %39 = vector.multi_reduction <add>, %38, %cst_20 [1] : vector<16x32xf32> to vector<16xf32>
    %40 = vector.shape_cast %39 : vector<16xf32> to vector<16x1xf32>
    %cst_21 = arith.constant 3.200000e+01 : f32
    %41 = vector.broadcast %cst_21 : f32 to vector<16x1xf32>
    %42 = arith.divf %40, %41 : vector<16x1xf32>
    %cst_22 = arith.constant 9.99999997E-7 : f32
    %43 = vector.broadcast %cst_22 : f32 to vector<16x1xf32>
    %44 = arith.addf %42, %43 : vector<16x1xf32>
    %45 = math.rsqrt %44 : vector<16x1xf32>
    %46 = vector.broadcast %45 : vector<16x1xf32> to vector<16x32xf32>
    %47 = arith.mulf %37, %46 : vector<16x32xf32>
    %c0_23 = arith.constant 0 : index
    %c0_24 = arith.constant 0 : index
    %48 = vector.load %arg6[%c0_23, %c0_24] : memref<1x32xf32, #tpu.memory_space<vmem>>, vector<1x32xf32>
    %49 = vector.broadcast %48 : vector<1x32xf32> to vector<16x32xf32>
    %50 = arith.mulf %47, %49 : vector<16x32xf32>
    %c0_25 = arith.constant 0 : index
    %c0_26 = arith.constant 0 : index
    %51 = vector.load %arg7[%c0_25, %c0_26] : memref<1x32xf32, #tpu.memory_space<vmem>>, vector<1x32xf32>
    %52 = vector.broadcast %51 : vector<1x32xf32> to vector<16x32xf32>
    %53 = arith.addf %50, %52 : vector<16x32xf32>
    %c0_27 = arith.constant 0 : index
    %c0_28 = arith.constant 0 : index
    %c0_29 = arith.constant 0 : index
    %54 = vector.load %arg8[%c0_27, %c0_28, %c0_29] : memref<1x16x32xf32, #tpu.memory_space<vmem>>, vector<1x16x32xf32>
    %55 = vector.shape_cast %54 : vector<1x16x32xf32> to vector<16x32xf32>
    %56 = vector.shape_cast %53 : vector<16x32xf32> to vector<1x16x32xf32>
    tpu.vector_store %arg8[%c0_27, %c0_28, %c0_29], %56 {strides = array<i32>} : memref<1x16x32xf32, #tpu.memory_space<vmem>>, vector<1x16x32xf32>,
    return
  }
  func.func @transform_0(%arg0: i32) -> (i32, i32, i32) {
    %c0_i32 = arith.constant 0 : i32
    %c0_i32_0 = arith.constant 0 : i32
    %c0_i32_1 = arith.constant 0 : i32
    return %arg0, %c0_i32, %c0_i32_0 : i32, i32, i32
  }
  func.func @transform_1(%arg0: i32) -> (i32, i32) {
    %c0_i32 = arith.constant 0 : i32
    %c0_i32_0 = arith.constant 0 : i32
    %c0_i32_1 = arith.constant 0 : i32
    return %c0_i32, %c0_i32_0 : i32, i32
  }
  func.func @transform_2(%arg0: i32) -> (i32, i32) {
    %c0_i32 = arith.constant 0 : i32
    %c0_i32_0 = arith.constant 0 : i32
    %c0_i32_1 = arith.constant 0 : i32
    return %c0_i32, %c0_i32_0 : i32, i32
  }
  func.func @transform_3(%arg0: i32) -> (i32, i32) {
    %c0_i32 = arith.constant 0 : i32
    %c0_i32_0 = arith.constant 0 : i32
    %c0_i32_1 = arith.constant 0 : i32
    return %c0_i32, %c0_i32_0 : i32, i32
  }
  func.func @transform_4(%arg0: i32) -> (i32, i32) {
    %c0_i32 = arith.constant 0 : i32
    %c0_i32_0 = arith.constant 0 : i32
    %c0_i32_1 = arith.constant 0 : i32
    return %c0_i32, %c0_i32_0 : i32, i32
  }
  func.func @transform_5(%arg0: i32) -> (i32, i32) {
    %c0_i32 = arith.constant 0 : i32
    %c0_i32_0 = arith.constant 0 : i32
    %c0_i32_1 = arith.constant 0 : i32
    return %c0_i32, %c0_i32_0 : i32, i32
  }
  func.func @transform_6(%arg0: i32) -> (i32, i32) {
    %c0_i32 = arith.constant 0 : i32
    %c0_i32_0 = arith.constant 0 : i32
    %c0_i32_1 = arith.constant 0 : i32
    return %c0_i32, %c0_i32_0 : i32, i32
  }
  func.func @transform_7(%arg0: i32) -> (i32, i32, i32) {
    %c0_i32 = arith.constant 0 : i32
    %c0_i32_0 = arith.constant 0 : i32
    %c0_i32_1 = arith.constant 0 : i32
    return %arg0, %c0_i32, %c0_i32_0 : i32, i32, i32
  }
}

module attributes {stable_mosaic.version = 11 : i64} {
  func.func @_convnext_kernel(%arg0: i32, %arg1: memref<1x16x32xf32, #tpu.memory_space<vmem>>, %arg2: memref<7x32xf32, #tpu.memory_space<vmem>>, %arg3: memref<1x32xf32, #tpu.memory_space<vmem>>, %arg4: memref<1x32xf32, #tpu.memory_space<vmem>>, %arg5: memref<1x32xf32, #tpu.memory_space<vmem>>, %arg6: memref<32x64xbf16, #tpu.memory_space<vmem>>, %arg7: memref<1x64xf32, #tpu.memory_space<vmem>>, %arg8: memref<64x32xbf16, #tpu.memory_space<vmem>>, %arg9: memref<1x32xf32, #tpu.memory_space<vmem>>, %arg10: memref<1x32xf32, #tpu.memory_space<vmem>>, %arg11: memref<1x32xf32, #tpu.memory_space<vmem>>, %arg12: memref<1x32xf32, #tpu.memory_space<vmem>>, %arg13: memref<1x16x32xf32, #tpu.memory_space<vmem>>, %arg14: memref<22x32xf32, #tpu.memory_space<vmem>>) attributes {dimension_semantics = [#tpu.dimension_semantics<parallel>], iteration_bounds = array<i64: 2>, scalar_prefetch = 0 : i64, scratch_operands = 1 : i64, tpu.core_type = #tpu.core_type<tc>, window_params = [{transform_indices = @transform_0, window_bounds = array<i64: 1, 16, 32>}, {pipeline_mode = #tpu.pipeline_mode<synchronous>, transform_indices = @transform_1, window_bounds = array<i64: 7, 32>}, {pipeline_mode = #tpu.pipeline_mode<synchronous>, transform_indices = @transform_2, window_bounds = array<i64: 1, 32>}, {pipeline_mode = #tpu.pipeline_mode<synchronous>, transform_indices = @transform_3, window_bounds = array<i64: 1, 32>}, {pipeline_mode = #tpu.pipeline_mode<synchronous>, transform_indices = @transform_4, window_bounds = array<i64: 1, 32>}, {pipeline_mode = #tpu.pipeline_mode<synchronous>, transform_indices = @transform_5, window_bounds = array<i64: 32, 64>}, {pipeline_mode = #tpu.pipeline_mode<synchronous>, transform_indices = @transform_6, window_bounds = array<i64: 1, 64>}, {pipeline_mode = #tpu.pipeline_mode<synchronous>, transform_indices = @transform_7, window_bounds = array<i64: 64, 32>}, {pipeline_mode = #tpu.pipeline_mode<synchronous>, transform_indices = @transform_8, window_bounds = array<i64: 1, 32>}, {pipeline_mode = #tpu.pipeline_mode<synchronous>, transform_indices = @transform_9, window_bounds = array<i64: 1, 32>}, {pipeline_mode = #tpu.pipeline_mode<synchronous>, transform_indices = @transform_10, window_bounds = array<i64: 1, 32>}, {pipeline_mode = #tpu.pipeline_mode<synchronous>, transform_indices = @transform_11, window_bounds = array<i64: 1, 32>}, {transform_indices = @transform_12, window_bounds = array<i64: 1, 16, 32>}]} {
    %c0 = arith.constant 0 : index
    %c0_0 = arith.constant 0 : index
    %c0_1 = arith.constant 0 : index
    %0 = vector.load %arg1[%c0, %c0_0, %c0_1] : memref<1x16x32xf32, #tpu.memory_space<vmem>>, vector<1x16x32xf32>
    %1 = vector.shape_cast %0 : vector<1x16x32xf32> to vector<16x32xf32>
    %cst = arith.constant 0.000000e+00 : f32
    %2 = vector.broadcast %cst : f32 to vector<3x32xf32>
    %c0_2 = arith.constant 0 : index
    %c0_3 = arith.constant 0 : index
    %3 = vector.load %arg14[%c0_2, %c0_3] : memref<22x32xf32, #tpu.memory_space<vmem>>, vector<3x32xf32>
    tpu.vector_store %arg14[%c0_2, %c0_3], %2 {strides = array<i32>} : memref<22x32xf32, #tpu.memory_space<vmem>>, vector<3x32xf32>,
    %c19 = arith.constant 19 : index
    %c0_4 = arith.constant 0 : index
    %4 = vector.load %arg14[%c19, %c0_4] : memref<22x32xf32, #tpu.memory_space<vmem>>, vector<3x32xf32>
    tpu.vector_store %arg14[%c19, %c0_4], %2 {strides = array<i32>} : memref<22x32xf32, #tpu.memory_space<vmem>>, vector<3x32xf32>,
    %c3 = arith.constant 3 : index
    %c0_5 = arith.constant 0 : index
    %5 = vector.load %arg14[%c3, %c0_5] : memref<22x32xf32, #tpu.memory_space<vmem>>, vector<16x32xf32>
    tpu.vector_store %arg14[%c3, %c0_5], %1 {strides = array<i32>} : memref<22x32xf32, #tpu.memory_space<vmem>>, vector<16x32xf32>,
    %c0_6 = arith.constant 0 : index
    %c0_7 = arith.constant 0 : index
    %6 = vector.load %arg14[%c0_6, %c0_7] : memref<22x32xf32, #tpu.memory_space<vmem>>, vector<22x32xf32>
    %c0_8 = arith.constant 0 : index
    %c0_9 = arith.constant 0 : index
    %7 = vector.load %arg2[%c0_8, %c0_9] : memref<7x32xf32, #tpu.memory_space<vmem>>, vector<7x32xf32>
    %cst_10 = arith.constant 0.000000e+00 : f32
    %8 = vector.broadcast %cst_10 : f32 to vector<16x32xf32>
    %9 = vector.extract_strided_slice %6 {offsets = [0, 0], sizes = [16, 32], strides = [1, 1]} : vector<22x32xf32> to vector<16x32xf32>
    %10 = vector.extract_strided_slice %7 {offsets = [0, 0], sizes = [1, 32], strides = [1, 1]} : vector<7x32xf32> to vector<1x32xf32>
    %11 = vector.broadcast %10 : vector<1x32xf32> to vector<16x32xf32>
    %12 = arith.mulf %9, %11 : vector<16x32xf32>
    %13 = arith.addf %8, %12 : vector<16x32xf32>
    %14 = vector.extract_strided_slice %6 {offsets = [1, 0], sizes = [16, 32], strides = [1, 1]} : vector<22x32xf32> to vector<16x32xf32>
    %15 = vector.extract_strided_slice %7 {offsets = [1, 0], sizes = [1, 32], strides = [1, 1]} : vector<7x32xf32> to vector<1x32xf32>
    %16 = vector.broadcast %15 : vector<1x32xf32> to vector<16x32xf32>
    %17 = arith.mulf %14, %16 : vector<16x32xf32>
    %18 = arith.addf %13, %17 : vector<16x32xf32>
    %19 = vector.extract_strided_slice %6 {offsets = [2, 0], sizes = [16, 32], strides = [1, 1]} : vector<22x32xf32> to vector<16x32xf32>
    %20 = vector.extract_strided_slice %7 {offsets = [2, 0], sizes = [1, 32], strides = [1, 1]} : vector<7x32xf32> to vector<1x32xf32>
    %21 = vector.broadcast %20 : vector<1x32xf32> to vector<16x32xf32>
    %22 = arith.mulf %19, %21 : vector<16x32xf32>
    %23 = arith.addf %18, %22 : vector<16x32xf32>
    %24 = vector.extract_strided_slice %6 {offsets = [3, 0], sizes = [16, 32], strides = [1, 1]} : vector<22x32xf32> to vector<16x32xf32>
    %25 = vector.extract_strided_slice %7 {offsets = [3, 0], sizes = [1, 32], strides = [1, 1]} : vector<7x32xf32> to vector<1x32xf32>
    %26 = vector.broadcast %25 : vector<1x32xf32> to vector<16x32xf32>
    %27 = arith.mulf %24, %26 : vector<16x32xf32>
    %28 = arith.addf %23, %27 : vector<16x32xf32>
    %29 = vector.extract_strided_slice %6 {offsets = [4, 0], sizes = [16, 32], strides = [1, 1]} : vector<22x32xf32> to vector<16x32xf32>
    %30 = vector.extract_strided_slice %7 {offsets = [4, 0], sizes = [1, 32], strides = [1, 1]} : vector<7x32xf32> to vector<1x32xf32>
    %31 = vector.broadcast %30 : vector<1x32xf32> to vector<16x32xf32>
    %32 = arith.mulf %29, %31 : vector<16x32xf32>
    %33 = arith.addf %28, %32 : vector<16x32xf32>
    %34 = vector.extract_strided_slice %6 {offsets = [5, 0], sizes = [16, 32], strides = [1, 1]} : vector<22x32xf32> to vector<16x32xf32>
    %35 = vector.extract_strided_slice %7 {offsets = [5, 0], sizes = [1, 32], strides = [1, 1]} : vector<7x32xf32> to vector<1x32xf32>
    %36 = vector.broadcast %35 : vector<1x32xf32> to vector<16x32xf32>
    %37 = arith.mulf %34, %36 : vector<16x32xf32>
    %38 = arith.addf %33, %37 : vector<16x32xf32>
    %39 = vector.extract_strided_slice %6 {offsets = [6, 0], sizes = [16, 32], strides = [1, 1]} : vector<22x32xf32> to vector<16x32xf32>
    %40 = vector.extract_strided_slice %7 {offsets = [6, 0], sizes = [1, 32], strides = [1, 1]} : vector<7x32xf32> to vector<1x32xf32>
    %41 = vector.broadcast %40 : vector<1x32xf32> to vector<16x32xf32>
    %42 = arith.mulf %39, %41 : vector<16x32xf32>
    %43 = arith.addf %38, %42 : vector<16x32xf32>
    %c0_11 = arith.constant 0 : index
    %c0_12 = arith.constant 0 : index
    %44 = vector.load %arg3[%c0_11, %c0_12] : memref<1x32xf32, #tpu.memory_space<vmem>>, vector<1x32xf32>
    %45 = vector.broadcast %44 : vector<1x32xf32> to vector<16x32xf32>
    %46 = arith.addf %43, %45 : vector<16x32xf32>
    %cst_13 = arith.constant dense<0.000000e+00> : vector<16xf32>
    %47 = vector.multi_reduction <add>, %46, %cst_13 [1] : vector<16x32xf32> to vector<16xf32>
    %48 = vector.shape_cast %47 : vector<16xf32> to vector<16x1xf32>
    %cst_14 = arith.constant 3.200000e+01 : f32
    %49 = vector.broadcast %cst_14 : f32 to vector<16x1xf32>
    %50 = arith.divf %48, %49 : vector<16x1xf32>
    %51 = vector.broadcast %50 : vector<16x1xf32> to vector<16x32xf32>
    %52 = arith.subf %46, %51 : vector<16x32xf32>
    %53 = arith.mulf %52, %52 : vector<16x32xf32>
    %cst_15 = arith.constant dense<0.000000e+00> : vector<16xf32>
    %54 = vector.multi_reduction <add>, %53, %cst_15 [1] : vector<16x32xf32> to vector<16xf32>
    %55 = vector.shape_cast %54 : vector<16xf32> to vector<16x1xf32>
    %cst_16 = arith.constant 3.200000e+01 : f32
    %56 = vector.broadcast %cst_16 : f32 to vector<16x1xf32>
    %57 = arith.divf %55, %56 : vector<16x1xf32>
    %cst_17 = arith.constant 9.99999997E-7 : f32
    %58 = vector.broadcast %cst_17 : f32 to vector<16x1xf32>
    %59 = arith.addf %57, %58 : vector<16x1xf32>
    %60 = math.rsqrt %59 : vector<16x1xf32>
    %61 = vector.broadcast %60 : vector<16x1xf32> to vector<16x32xf32>
    %62 = arith.mulf %52, %61 : vector<16x32xf32>
    %c0_18 = arith.constant 0 : index
    %c0_19 = arith.constant 0 : index
    %63 = vector.load %arg4[%c0_18, %c0_19] : memref<1x32xf32, #tpu.memory_space<vmem>>, vector<1x32xf32>
    %64 = vector.broadcast %63 : vector<1x32xf32> to vector<16x32xf32>
    %65 = arith.mulf %62, %64 : vector<16x32xf32>
    %c0_20 = arith.constant 0 : index
    %c0_21 = arith.constant 0 : index
    %66 = vector.load %arg5[%c0_20, %c0_21] : memref<1x32xf32, #tpu.memory_space<vmem>>, vector<1x32xf32>
    %67 = vector.broadcast %66 : vector<1x32xf32> to vector<16x32xf32>
    %68 = arith.addf %65, %67 : vector<16x32xf32>
    %69 = arith.truncf %68 : vector<16x32xf32> to vector<16x32xbf16>
    %c0_22 = arith.constant 0 : index
    %c0_23 = arith.constant 0 : index
    %70 = vector.load %arg6[%c0_22, %c0_23] : memref<32x64xbf16, #tpu.memory_space<vmem>>, vector<32x64xbf16>
    %cst_24 = arith.constant dense<0.000000e+00> : vector<16x64xf32>
    %71 = tpu.matmul %69, %70, %cst_24 {dimension_numbers = #tpu.dot_dimension_numbers<[1], [0], [0], [1], [0, 0, 1, 1], [], []>} : vector<16x32xbf16>, vector<32x64xbf16>, vector<16x64xf32> -> vector<16x64xf32>
    %c0_25 = arith.constant 0 : index
    %c0_26 = arith.constant 0 : index
    %72 = vector.load %arg7[%c0_25, %c0_26] : memref<1x64xf32, #tpu.memory_space<vmem>>, vector<1x64xf32>
    %73 = vector.broadcast %72 : vector<1x64xf32> to vector<16x64xf32>
    %74 = arith.addf %71, %73 : vector<16x64xf32>
    %cst_27 = arith.constant 5.000000e-01 : f32
    %75 = vector.broadcast %cst_27 : f32 to vector<16x64xf32>
    %76 = arith.mulf %75, %74 : vector<16x64xf32>
    %cst_28 = arith.constant 4.471500e-02 : f32
    %77 = vector.broadcast %cst_28 : f32 to vector<16x64xf32>
    %78 = arith.mulf %77, %74 : vector<16x64xf32>
    %79 = arith.mulf %78, %74 : vector<16x64xf32>
    %80 = arith.mulf %79, %74 : vector<16x64xf32>
    %81 = arith.addf %74, %80 : vector<16x64xf32>
    %cst_29 = arith.constant 0.797884583 : f32
    %82 = vector.broadcast %cst_29 : f32 to vector<16x64xf32>
    %83 = arith.mulf %82, %81 : vector<16x64xf32>
    %84 = math.tanh %83 : vector<16x64xf32>
    %cst_30 = arith.constant 1.000000e+00 : f32
    %85 = vector.broadcast %cst_30 : f32 to vector<16x64xf32>
    %86 = arith.addf %85, %84 : vector<16x64xf32>
    %87 = arith.mulf %76, %86 : vector<16x64xf32>
    %88 = arith.truncf %87 : vector<16x64xf32> to vector<16x64xbf16>
    %c0_31 = arith.constant 0 : index
    %c0_32 = arith.constant 0 : index
    %89 = vector.load %arg8[%c0_31, %c0_32] : memref<64x32xbf16, #tpu.memory_space<vmem>>, vector<64x32xbf16>
    %cst_33 = arith.constant dense<0.000000e+00> : vector<16x32xf32>
    %90 = tpu.matmul %88, %89, %cst_33 {dimension_numbers = #tpu.dot_dimension_numbers<[1], [0], [0], [1], [0, 0, 1, 1], [], []>} : vector<16x64xbf16>, vector<64x32xbf16>, vector<16x32xf32> -> vector<16x32xf32>
    %c0_34 = arith.constant 0 : index
    %c0_35 = arith.constant 0 : index
    %91 = vector.load %arg9[%c0_34, %c0_35] : memref<1x32xf32, #tpu.memory_space<vmem>>, vector<1x32xf32>
    %92 = vector.broadcast %91 : vector<1x32xf32> to vector<16x32xf32>
    %93 = arith.addf %90, %92 : vector<16x32xf32>
    %c0_36 = arith.constant 0 : index
    %c0_37 = arith.constant 0 : index
    %94 = vector.load %arg10[%c0_36, %c0_37] : memref<1x32xf32, #tpu.memory_space<vmem>>, vector<1x32xf32>
    %95 = vector.broadcast %94 : vector<1x32xf32> to vector<16x32xf32>
    %96 = arith.mulf %93, %95 : vector<16x32xf32>
    %97 = arith.addf %1, %96 : vector<16x32xf32>
    %c0_38 = arith.constant 0 : index
    %c0_39 = arith.constant 0 : index
    %c0_40 = arith.constant 0 : index
    %98 = vector.load %arg13[%c0_38, %c0_39, %c0_40] : memref<1x16x32xf32, #tpu.memory_space<vmem>>, vector<1x16x32xf32>
    %99 = vector.shape_cast %98 : vector<1x16x32xf32> to vector<16x32xf32>
    %100 = vector.shape_cast %97 : vector<16x32xf32> to vector<1x16x32xf32>
    tpu.vector_store %arg13[%c0_38, %c0_39, %c0_40], %100 {strides = array<i32>} : memref<1x16x32xf32, #tpu.memory_space<vmem>>, vector<1x16x32xf32>,
    return
  }
  func.func @transform_0(%arg0: i32) -> (i32, i32, i32) {
    %c0_i32 = arith.constant 0 : i32
    %c0_i32_0 = arith.constant 0 : i32
    %c0_i32_1 = arith.constant 0 : i32
    return %arg0, %c0_i32, %c0_i32_0 : i32, i32, i32
  }
  func.func @transform_1(%arg0: i32) -> (i32, i32) {
    %c0_i32 = arith.constant 0 : i32
    %c0_i32_0 = arith.constant 0 : i32
    %c0_i32_1 = arith.constant 0 : i32
    return %c0_i32, %c0_i32_0 : i32, i32
  }
  func.func @transform_2(%arg0: i32) -> (i32, i32) {
    %c0_i32 = arith.constant 0 : i32
    %c0_i32_0 = arith.constant 0 : i32
    %c0_i32_1 = arith.constant 0 : i32
    return %c0_i32, %c0_i32_0 : i32, i32
  }
  func.func @transform_3(%arg0: i32) -> (i32, i32) {
    %c0_i32 = arith.constant 0 : i32
    %c0_i32_0 = arith.constant 0 : i32
    %c0_i32_1 = arith.constant 0 : i32
    return %c0_i32, %c0_i32_0 : i32, i32
  }
  func.func @transform_4(%arg0: i32) -> (i32, i32) {
    %c0_i32 = arith.constant 0 : i32
    %c0_i32_0 = arith.constant 0 : i32
    %c0_i32_1 = arith.constant 0 : i32
    return %c0_i32, %c0_i32_0 : i32, i32
  }
  func.func @transform_5(%arg0: i32) -> (i32, i32) {
    %c0_i32 = arith.constant 0 : i32
    %c0_i32_0 = arith.constant 0 : i32
    %c0_i32_1 = arith.constant 0 : i32
    return %c0_i32, %c0_i32_0 : i32, i32
  }
  func.func @transform_6(%arg0: i32) -> (i32, i32) {
    %c0_i32 = arith.constant 0 : i32
    %c0_i32_0 = arith.constant 0 : i32
    %c0_i32_1 = arith.constant 0 : i32
    return %c0_i32, %c0_i32_0 : i32, i32
  }
  func.func @transform_7(%arg0: i32) -> (i32, i32) {
    %c0_i32 = arith.constant 0 : i32
    %c0_i32_0 = arith.constant 0 : i32
    %c0_i32_1 = arith.constant 0 : i32
    return %c0_i32, %c0_i32_0 : i32, i32
  }
  func.func @transform_8(%arg0: i32) -> (i32, i32) {
    %c0_i32 = arith.constant 0 : i32
    %c0_i32_0 = arith.constant 0 : i32
    %c0_i32_1 = arith.constant 0 : i32
    return %c0_i32, %c0_i32_0 : i32, i32
  }
  func.func @transform_9(%arg0: i32) -> (i32, i32) {
    %c0_i32 = arith.constant 0 : i32
    %c0_i32_0 = arith.constant 0 : i32
    %c0_i32_1 = arith.constant 0 : i32
    return %c0_i32, %c0_i32_0 : i32, i32
  }
  func.func @transform_10(%arg0: i32) -> (i32, i32) {
    %c0_i32 = arith.constant 0 : i32
    %c0_i32_0 = arith.constant 0 : i32
    %c0_i32_1 = arith.constant 0 : i32
    return %c0_i32, %c0_i32_0 : i32, i32
  }
  func.func @transform_11(%arg0: i32) -> (i32, i32) {
    %c0_i32 = arith.constant 0 : i32
    %c0_i32_0 = arith.constant 0 : i32
    %c0_i32_1 = arith.constant 0 : i32
    return %c0_i32, %c0_i32_0 : i32, i32
  }
  func.func @transform_12(%arg0: i32) -> (i32, i32, i32) {
    %c0_i32 = arith.constant 0 : i32
    %c0_i32_0 = arith.constant 0 : i32
    %c0_i32_1 = arith.constant 0 : i32
    return %arg0, %c0_i32, %c0_i32_0 : i32, i32, i32
  }
}

module attributes {stable_mosaic.version = 11 : i64} {
  func.func @_convnext_kernel(%arg0: i32, %arg1: memref<1x16x32xf32, #tpu.memory_space<vmem>>, %arg2: memref<7x32xf32, #tpu.memory_space<vmem>>, %arg3: memref<1x32xf32, #tpu.memory_space<vmem>>, %arg4: memref<1x32xf32, #tpu.memory_space<vmem>>, %arg5: memref<1x32xf32, #tpu.memory_space<vmem>>, %arg6: memref<32x64xbf16, #tpu.memory_space<vmem>>, %arg7: memref<1x64xf32, #tpu.memory_space<vmem>>, %arg8: memref<64x32xbf16, #tpu.memory_space<vmem>>, %arg9: memref<1x32xf32, #tpu.memory_space<vmem>>, %arg10: memref<1x32xf32, #tpu.memory_space<vmem>>, %arg11: memref<1x32xf32, #tpu.memory_space<vmem>>, %arg12: memref<1x32xf32, #tpu.memory_space<vmem>>, %arg13: memref<1x16x32xf32, #tpu.memory_space<vmem>>, %arg14: memref<22x32xf32, #tpu.memory_space<vmem>>) attributes {dimension_semantics = [#tpu.dimension_semantics<parallel>], iteration_bounds = array<i64: 2>, scalar_prefetch = 0 : i64, scratch_operands = 1 : i64, tpu.core_type = #tpu.core_type<tc>, window_params = [{transform_indices = @transform_0, window_bounds = array<i64: 1, 16, 32>}, {pipeline_mode = #tpu.pipeline_mode<synchronous>, transform_indices = @transform_1, window_bounds = array<i64: 7, 32>}, {pipeline_mode = #tpu.pipeline_mode<synchronous>, transform_indices = @transform_2, window_bounds = array<i64: 1, 32>}, {pipeline_mode = #tpu.pipeline_mode<synchronous>, transform_indices = @transform_3, window_bounds = array<i64: 1, 32>}, {pipeline_mode = #tpu.pipeline_mode<synchronous>, transform_indices = @transform_4, window_bounds = array<i64: 1, 32>}, {pipeline_mode = #tpu.pipeline_mode<synchronous>, transform_indices = @transform_5, window_bounds = array<i64: 32, 64>}, {pipeline_mode = #tpu.pipeline_mode<synchronous>, transform_indices = @transform_6, window_bounds = array<i64: 1, 64>}, {pipeline_mode = #tpu.pipeline_mode<synchronous>, transform_indices = @transform_7, window_bounds = array<i64: 64, 32>}, {pipeline_mode = #tpu.pipeline_mode<synchronous>, transform_indices = @transform_8, window_bounds = array<i64: 1, 32>}, {pipeline_mode = #tpu.pipeline_mode<synchronous>, transform_indices = @transform_9, window_bounds = array<i64: 1, 32>}, {pipeline_mode = #tpu.pipeline_mode<synchronous>, transform_indices = @transform_10, window_bounds = array<i64: 1, 32>}, {pipeline_mode = #tpu.pipeline_mode<synchronous>, transform_indices = @transform_11, window_bounds = array<i64: 1, 32>}, {transform_indices = @transform_12, window_bounds = array<i64: 1, 16, 32>}]} {
    %c0 = arith.constant 0 : index
    %c0_0 = arith.constant 0 : index
    %c0_1 = arith.constant 0 : index
    %0 = vector.load %arg1[%c0, %c0_0, %c0_1] : memref<1x16x32xf32, #tpu.memory_space<vmem>>, vector<1x16x32xf32>
    %1 = vector.shape_cast %0 : vector<1x16x32xf32> to vector<16x32xf32>
    %cst = arith.constant 0.000000e+00 : f32
    %2 = vector.broadcast %cst : f32 to vector<3x32xf32>
    %c0_2 = arith.constant 0 : index
    %c0_3 = arith.constant 0 : index
    %3 = vector.load %arg14[%c0_2, %c0_3] : memref<22x32xf32, #tpu.memory_space<vmem>>, vector<3x32xf32>
    tpu.vector_store %arg14[%c0_2, %c0_3], %2 {strides = array<i32>} : memref<22x32xf32, #tpu.memory_space<vmem>>, vector<3x32xf32>,
    %c19 = arith.constant 19 : index
    %c0_4 = arith.constant 0 : index
    %4 = vector.load %arg14[%c19, %c0_4] : memref<22x32xf32, #tpu.memory_space<vmem>>, vector<3x32xf32>
    tpu.vector_store %arg14[%c19, %c0_4], %2 {strides = array<i32>} : memref<22x32xf32, #tpu.memory_space<vmem>>, vector<3x32xf32>,
    %c3 = arith.constant 3 : index
    %c0_5 = arith.constant 0 : index
    %5 = vector.load %arg14[%c3, %c0_5] : memref<22x32xf32, #tpu.memory_space<vmem>>, vector<16x32xf32>
    tpu.vector_store %arg14[%c3, %c0_5], %1 {strides = array<i32>} : memref<22x32xf32, #tpu.memory_space<vmem>>, vector<16x32xf32>,
    %c0_6 = arith.constant 0 : index
    %c0_7 = arith.constant 0 : index
    %6 = vector.load %arg14[%c0_6, %c0_7] : memref<22x32xf32, #tpu.memory_space<vmem>>, vector<22x32xf32>
    %c0_8 = arith.constant 0 : index
    %c0_9 = arith.constant 0 : index
    %7 = vector.load %arg2[%c0_8, %c0_9] : memref<7x32xf32, #tpu.memory_space<vmem>>, vector<7x32xf32>
    %cst_10 = arith.constant 0.000000e+00 : f32
    %8 = vector.broadcast %cst_10 : f32 to vector<16x32xf32>
    %9 = vector.extract_strided_slice %6 {offsets = [0, 0], sizes = [16, 32], strides = [1, 1]} : vector<22x32xf32> to vector<16x32xf32>
    %10 = vector.extract_strided_slice %7 {offsets = [0, 0], sizes = [1, 32], strides = [1, 1]} : vector<7x32xf32> to vector<1x32xf32>
    %11 = vector.broadcast %10 : vector<1x32xf32> to vector<16x32xf32>
    %12 = arith.mulf %9, %11 : vector<16x32xf32>
    %13 = arith.addf %8, %12 : vector<16x32xf32>
    %14 = vector.extract_strided_slice %6 {offsets = [1, 0], sizes = [16, 32], strides = [1, 1]} : vector<22x32xf32> to vector<16x32xf32>
    %15 = vector.extract_strided_slice %7 {offsets = [1, 0], sizes = [1, 32], strides = [1, 1]} : vector<7x32xf32> to vector<1x32xf32>
    %16 = vector.broadcast %15 : vector<1x32xf32> to vector<16x32xf32>
    %17 = arith.mulf %14, %16 : vector<16x32xf32>
    %18 = arith.addf %13, %17 : vector<16x32xf32>
    %19 = vector.extract_strided_slice %6 {offsets = [2, 0], sizes = [16, 32], strides = [1, 1]} : vector<22x32xf32> to vector<16x32xf32>
    %20 = vector.extract_strided_slice %7 {offsets = [2, 0], sizes = [1, 32], strides = [1, 1]} : vector<7x32xf32> to vector<1x32xf32>
    %21 = vector.broadcast %20 : vector<1x32xf32> to vector<16x32xf32>
    %22 = arith.mulf %19, %21 : vector<16x32xf32>
    %23 = arith.addf %18, %22 : vector<16x32xf32>
    %24 = vector.extract_strided_slice %6 {offsets = [3, 0], sizes = [16, 32], strides = [1, 1]} : vector<22x32xf32> to vector<16x32xf32>
    %25 = vector.extract_strided_slice %7 {offsets = [3, 0], sizes = [1, 32], strides = [1, 1]} : vector<7x32xf32> to vector<1x32xf32>
    %26 = vector.broadcast %25 : vector<1x32xf32> to vector<16x32xf32>
    %27 = arith.mulf %24, %26 : vector<16x32xf32>
    %28 = arith.addf %23, %27 : vector<16x32xf32>
    %29 = vector.extract_strided_slice %6 {offsets = [4, 0], sizes = [16, 32], strides = [1, 1]} : vector<22x32xf32> to vector<16x32xf32>
    %30 = vector.extract_strided_slice %7 {offsets = [4, 0], sizes = [1, 32], strides = [1, 1]} : vector<7x32xf32> to vector<1x32xf32>
    %31 = vector.broadcast %30 : vector<1x32xf32> to vector<16x32xf32>
    %32 = arith.mulf %29, %31 : vector<16x32xf32>
    %33 = arith.addf %28, %32 : vector<16x32xf32>
    %34 = vector.extract_strided_slice %6 {offsets = [5, 0], sizes = [16, 32], strides = [1, 1]} : vector<22x32xf32> to vector<16x32xf32>
    %35 = vector.extract_strided_slice %7 {offsets = [5, 0], sizes = [1, 32], strides = [1, 1]} : vector<7x32xf32> to vector<1x32xf32>
    %36 = vector.broadcast %35 : vector<1x32xf32> to vector<16x32xf32>
    %37 = arith.mulf %34, %36 : vector<16x32xf32>
    %38 = arith.addf %33, %37 : vector<16x32xf32>
    %39 = vector.extract_strided_slice %6 {offsets = [6, 0], sizes = [16, 32], strides = [1, 1]} : vector<22x32xf32> to vector<16x32xf32>
    %40 = vector.extract_strided_slice %7 {offsets = [6, 0], sizes = [1, 32], strides = [1, 1]} : vector<7x32xf32> to vector<1x32xf32>
    %41 = vector.broadcast %40 : vector<1x32xf32> to vector<16x32xf32>
    %42 = arith.mulf %39, %41 : vector<16x32xf32>
    %43 = arith.addf %38, %42 : vector<16x32xf32>
    %c0_11 = arith.constant 0 : index
    %c0_12 = arith.constant 0 : index
    %44 = vector.load %arg3[%c0_11, %c0_12] : memref<1x32xf32, #tpu.memory_space<vmem>>, vector<1x32xf32>
    %45 = vector.broadcast %44 : vector<1x32xf32> to vector<16x32xf32>
    %46 = arith.addf %43, %45 : vector<16x32xf32>
    %cst_13 = arith.constant dense<0.000000e+00> : vector<16xf32>
    %47 = vector.multi_reduction <add>, %46, %cst_13 [1] : vector<16x32xf32> to vector<16xf32>
    %48 = vector.shape_cast %47 : vector<16xf32> to vector<16x1xf32>
    %cst_14 = arith.constant 3.200000e+01 : f32
    %49 = vector.broadcast %cst_14 : f32 to vector<16x1xf32>
    %50 = arith.divf %48, %49 : vector<16x1xf32>
    %51 = vector.broadcast %50 : vector<16x1xf32> to vector<16x32xf32>
    %52 = arith.subf %46, %51 : vector<16x32xf32>
    %53 = arith.mulf %52, %52 : vector<16x32xf32>
    %cst_15 = arith.constant dense<0.000000e+00> : vector<16xf32>
    %54 = vector.multi_reduction <add>, %53, %cst_15 [1] : vector<16x32xf32> to vector<16xf32>
    %55 = vector.shape_cast %54 : vector<16xf32> to vector<16x1xf32>
    %cst_16 = arith.constant 3.200000e+01 : f32
    %56 = vector.broadcast %cst_16 : f32 to vector<16x1xf32>
    %57 = arith.divf %55, %56 : vector<16x1xf32>
    %cst_17 = arith.constant 9.99999997E-7 : f32
    %58 = vector.broadcast %cst_17 : f32 to vector<16x1xf32>
    %59 = arith.addf %57, %58 : vector<16x1xf32>
    %60 = math.rsqrt %59 : vector<16x1xf32>
    %61 = vector.broadcast %60 : vector<16x1xf32> to vector<16x32xf32>
    %62 = arith.mulf %52, %61 : vector<16x32xf32>
    %c0_18 = arith.constant 0 : index
    %c0_19 = arith.constant 0 : index
    %63 = vector.load %arg4[%c0_18, %c0_19] : memref<1x32xf32, #tpu.memory_space<vmem>>, vector<1x32xf32>
    %64 = vector.broadcast %63 : vector<1x32xf32> to vector<16x32xf32>
    %65 = arith.mulf %62, %64 : vector<16x32xf32>
    %c0_20 = arith.constant 0 : index
    %c0_21 = arith.constant 0 : index
    %66 = vector.load %arg5[%c0_20, %c0_21] : memref<1x32xf32, #tpu.memory_space<vmem>>, vector<1x32xf32>
    %67 = vector.broadcast %66 : vector<1x32xf32> to vector<16x32xf32>
    %68 = arith.addf %65, %67 : vector<16x32xf32>
    %69 = arith.truncf %68 : vector<16x32xf32> to vector<16x32xbf16>
    %c0_22 = arith.constant 0 : index
    %c0_23 = arith.constant 0 : index
    %70 = vector.load %arg6[%c0_22, %c0_23] : memref<32x64xbf16, #tpu.memory_space<vmem>>, vector<32x64xbf16>
    %cst_24 = arith.constant dense<0.000000e+00> : vector<16x64xf32>
    %71 = tpu.matmul %69, %70, %cst_24 {dimension_numbers = #tpu.dot_dimension_numbers<[1], [0], [0], [1], [0, 0, 1, 1], [], []>} : vector<16x32xbf16>, vector<32x64xbf16>, vector<16x64xf32> -> vector<16x64xf32>
    %c0_25 = arith.constant 0 : index
    %c0_26 = arith.constant 0 : index
    %72 = vector.load %arg7[%c0_25, %c0_26] : memref<1x64xf32, #tpu.memory_space<vmem>>, vector<1x64xf32>
    %73 = vector.broadcast %72 : vector<1x64xf32> to vector<16x64xf32>
    %74 = arith.addf %71, %73 : vector<16x64xf32>
    %cst_27 = arith.constant 5.000000e-01 : f32
    %75 = vector.broadcast %cst_27 : f32 to vector<16x64xf32>
    %76 = arith.mulf %75, %74 : vector<16x64xf32>
    %cst_28 = arith.constant 4.471500e-02 : f32
    %77 = vector.broadcast %cst_28 : f32 to vector<16x64xf32>
    %78 = arith.mulf %77, %74 : vector<16x64xf32>
    %79 = arith.mulf %78, %74 : vector<16x64xf32>
    %80 = arith.mulf %79, %74 : vector<16x64xf32>
    %81 = arith.addf %74, %80 : vector<16x64xf32>
    %cst_29 = arith.constant 0.797884583 : f32
    %82 = vector.broadcast %cst_29 : f32 to vector<16x64xf32>
    %83 = arith.mulf %82, %81 : vector<16x64xf32>
    %84 = math.tanh %83 : vector<16x64xf32>
    %cst_30 = arith.constant 1.000000e+00 : f32
    %85 = vector.broadcast %cst_30 : f32 to vector<16x64xf32>
    %86 = arith.addf %85, %84 : vector<16x64xf32>
    %87 = arith.mulf %76, %86 : vector<16x64xf32>
    %88 = arith.truncf %87 : vector<16x64xf32> to vector<16x64xbf16>
    %c0_31 = arith.constant 0 : index
    %c0_32 = arith.constant 0 : index
    %89 = vector.load %arg8[%c0_31, %c0_32] : memref<64x32xbf16, #tpu.memory_space<vmem>>, vector<64x32xbf16>
    %cst_33 = arith.constant dense<0.000000e+00> : vector<16x32xf32>
    %90 = tpu.matmul %88, %89, %cst_33 {dimension_numbers = #tpu.dot_dimension_numbers<[1], [0], [0], [1], [0, 0, 1, 1], [], []>} : vector<16x64xbf16>, vector<64x32xbf16>, vector<16x32xf32> -> vector<16x32xf32>
    %c0_34 = arith.constant 0 : index
    %c0_35 = arith.constant 0 : index
    %91 = vector.load %arg9[%c0_34, %c0_35] : memref<1x32xf32, #tpu.memory_space<vmem>>, vector<1x32xf32>
    %92 = vector.broadcast %91 : vector<1x32xf32> to vector<16x32xf32>
    %93 = arith.addf %90, %92 : vector<16x32xf32>
    %c0_36 = arith.constant 0 : index
    %c0_37 = arith.constant 0 : index
    %94 = vector.load %arg10[%c0_36, %c0_37] : memref<1x32xf32, #tpu.memory_space<vmem>>, vector<1x32xf32>
    %95 = vector.broadcast %94 : vector<1x32xf32> to vector<16x32xf32>
    %96 = arith.mulf %93, %95 : vector<16x32xf32>
    %97 = arith.addf %1, %96 : vector<16x32xf32>
    %cst_38 = arith.constant dense<0.000000e+00> : vector<16xf32>
    %98 = vector.multi_reduction <add>, %97, %cst_38 [1] : vector<16x32xf32> to vector<16xf32>
    %99 = vector.shape_cast %98 : vector<16xf32> to vector<16x1xf32>
    %cst_39 = arith.constant 3.200000e+01 : f32
    %100 = vector.broadcast %cst_39 : f32 to vector<16x1xf32>
    %101 = arith.divf %99, %100 : vector<16x1xf32>
    %102 = vector.broadcast %101 : vector<16x1xf32> to vector<16x32xf32>
    %103 = arith.subf %97, %102 : vector<16x32xf32>
    %104 = arith.mulf %103, %103 : vector<16x32xf32>
    %cst_40 = arith.constant dense<0.000000e+00> : vector<16xf32>
    %105 = vector.multi_reduction <add>, %104, %cst_40 [1] : vector<16x32xf32> to vector<16xf32>
    %106 = vector.shape_cast %105 : vector<16xf32> to vector<16x1xf32>
    %cst_41 = arith.constant 3.200000e+01 : f32
    %107 = vector.broadcast %cst_41 : f32 to vector<16x1xf32>
    %108 = arith.divf %106, %107 : vector<16x1xf32>
    %cst_42 = arith.constant 9.99999997E-7 : f32
    %109 = vector.broadcast %cst_42 : f32 to vector<16x1xf32>
    %110 = arith.addf %108, %109 : vector<16x1xf32>
    %111 = math.rsqrt %110 : vector<16x1xf32>
    %112 = vector.broadcast %111 : vector<16x1xf32> to vector<16x32xf32>
    %113 = arith.mulf %103, %112 : vector<16x32xf32>
    %c0_43 = arith.constant 0 : index
    %c0_44 = arith.constant 0 : index
    %114 = vector.load %arg11[%c0_43, %c0_44] : memref<1x32xf32, #tpu.memory_space<vmem>>, vector<1x32xf32>
    %115 = vector.broadcast %114 : vector<1x32xf32> to vector<16x32xf32>
    %116 = arith.mulf %113, %115 : vector<16x32xf32>
    %c0_45 = arith.constant 0 : index
    %c0_46 = arith.constant 0 : index
    %117 = vector.load %arg12[%c0_45, %c0_46] : memref<1x32xf32, #tpu.memory_space<vmem>>, vector<1x32xf32>
    %118 = vector.broadcast %117 : vector<1x32xf32> to vector<16x32xf32>
    %119 = arith.addf %116, %118 : vector<16x32xf32>
    %c0_47 = arith.constant 0 : index
    %c0_48 = arith.constant 0 : index
    %c0_49 = arith.constant 0 : index
    %120 = vector.load %arg13[%c0_47, %c0_48, %c0_49] : memref<1x16x32xf32, #tpu.memory_space<vmem>>, vector<1x16x32xf32>
    %121 = vector.shape_cast %120 : vector<1x16x32xf32> to vector<16x32xf32>
    %122 = vector.shape_cast %119 : vector<16x32xf32> to vector<1x16x32xf32>
    tpu.vector_store %arg13[%c0_47, %c0_48, %c0_49], %122 {strides = array<i32>} : memref<1x16x32xf32, #tpu.memory_space<vmem>>, vector<1x16x32xf32>,
    return
  }
  func.func @transform_0(%arg0: i32) -> (i32, i32, i32) {
    %c0_i32 = arith.constant 0 : i32
    %c0_i32_0 = arith.constant 0 : i32
    %c0_i32_1 = arith.constant 0 : i32
    return %arg0, %c0_i32, %c0_i32_0 : i32, i32, i32
  }
  func.func @transform_1(%arg0: i32) -> (i32, i32) {
    %c0_i32 = arith.constant 0 : i32
    %c0_i32_0 = arith.constant 0 : i32
    %c0_i32_1 = arith.constant 0 : i32
    return %c0_i32, %c0_i32_0 : i32, i32
  }
  func.func @transform_2(%arg0: i32) -> (i32, i32) {
    %c0_i32 = arith.constant 0 : i32
    %c0_i32_0 = arith.constant 0 : i32
    %c0_i32_1 = arith.constant 0 : i32
    return %c0_i32, %c0_i32_0 : i32, i32
  }
  func.func @transform_3(%arg0: i32) -> (i32, i32) {
    %c0_i32 = arith.constant 0 : i32
    %c0_i32_0 = arith.constant 0 : i32
    %c0_i32_1 = arith.constant 0 : i32
    return %c0_i32, %c0_i32_0 : i32, i32
  }
  func.func @transform_4(%arg0: i32) -> (i32, i32) {
    %c0_i32 = arith.constant 0 : i32
    %c0_i32_0 = arith.constant 0 : i32
    %c0_i32_1 = arith.constant 0 : i32
    return %c0_i32, %c0_i32_0 : i32, i32
  }
  func.func @transform_5(%arg0: i32) -> (i32, i32) {
    %c0_i32 = arith.constant 0 : i32
    %c0_i32_0 = arith.constant 0 : i32
    %c0_i32_1 = arith.constant 0 : i32
    return %c0_i32, %c0_i32_0 : i32, i32
  }
  func.func @transform_6(%arg0: i32) -> (i32, i32) {
    %c0_i32 = arith.constant 0 : i32
    %c0_i32_0 = arith.constant 0 : i32
    %c0_i32_1 = arith.constant 0 : i32
    return %c0_i32, %c0_i32_0 : i32, i32
  }
  func.func @transform_7(%arg0: i32) -> (i32, i32) {
    %c0_i32 = arith.constant 0 : i32
    %c0_i32_0 = arith.constant 0 : i32
    %c0_i32_1 = arith.constant 0 : i32
    return %c0_i32, %c0_i32_0 : i32, i32
  }
  func.func @transform_8(%arg0: i32) -> (i32, i32) {
    %c0_i32 = arith.constant 0 : i32
    %c0_i32_0 = arith.constant 0 : i32
    %c0_i32_1 = arith.constant 0 : i32
    return %c0_i32, %c0_i32_0 : i32, i32
  }
  func.func @transform_9(%arg0: i32) -> (i32, i32) {
    %c0_i32 = arith.constant 0 : i32
    %c0_i32_0 = arith.constant 0 : i32
    %c0_i32_1 = arith.constant 0 : i32
    return %c0_i32, %c0_i32_0 : i32, i32
  }
  func.func @transform_10(%arg0: i32) -> (i32, i32) {
    %c0_i32 = arith.constant 0 : i32
    %c0_i32_0 = arith.constant 0 : i32
    %c0_i32_1 = arith.constant 0 : i32
    return %c0_i32, %c0_i32_0 : i32, i32
  }
  func.func @transform_11(%arg0: i32) -> (i32, i32) {
    %c0_i32 = arith.constant 0 : i32
    %c0_i32_0 = arith.constant 0 : i32
    %c0_i32_1 = arith.constant 0 : i32
    return %c0_i32, %c0_i32_0 : i32, i32
  }
  func.func @transform_12(%arg0: i32) -> (i32, i32, i32) {
    %c0_i32 = arith.constant 0 : i32
    %c0_i32_0 = arith.constant 0 : i32
    %c0_i32_1 = arith.constant 0 : i32
    return %arg0, %c0_i32, %c0_i32_0 : i32, i32, i32
  }
}

</mosaic_0001>

<bundles_post_ra>
// kernel: vocos_backbone_forward.10
= control target key start
LH: loop header
LB: loop body
LE: loop exit
PB: predicated region body
PF: predicated region fallthrough
CT: control target
= control target key end

     0   :  { %s760_s12 = smov 0   ;;  %s862_s0 = inlined_call_operand.vmem [shape: f32[2,16,4], index: 0, kind: input, shape index: {}]   ;;  %s863_s1 = inlined_call_operand.vmem [shape: bf16[7,4,32], index: 1, kind: input, shape index: {}]   ;;  %s864_s2 = inlined_call_operand.vmem [shape: f32[1,32], index: 2, kind: input, shape index: {}]   ;;  %s865_s3 = inlined_call_operand.vmem [shape: f32[2,16,32], index: 3, kind: output, shape index: {}]  }
   0x1 LB: > { %s643_s13 = sadd.s32 4294967295, %s736_s12   ;;  %p647_p0 = scmp.ge.s32.totalorder %s736_s12, 1  ;;  %s736_s12 = sphi %s760_s12, %s13_s12  }
   0x2   : > { %p137_p1 = scmp.lt.s32.totalorder %s736_s12, 3 }
   0x4   : > { %p138_p2 = pnand %p647_p0, %p137_p1 }
   0x5   : > { %p161_p3 = scmp.lt.s32.totalorder (!%p138_p2), %s643_s13, 1 }
   0x6   : > { %141 = sbr.rel (%p138_p2) target bundleno = 259 (0x103), region = 32 }
   0xb   : > { %v184_v0 = vld [vmem:[%s863_s1 + $0x2] sm:$0x3]  ;;  %vm208_vm0 = vcmask 1041408   ;;  %v183_v1 = vld [vmem:[%s863_s1] sm:$0x3]  ;;  %v738_v2 = vmov 0.0  }
   0xc   : > { %678 = vmatprep.subr.bf16.mxu0 %v738_v2  ;;  %v210_v3 = vsel %vm208_vm0, %v184_v0, 0  ;;  %684 = vmatprep.subr.bf16.mxu1 %v738_v2  ;;  %v256_v4 = vsel %vm208_vm0, %v183_v1, 0  ;;  %vm174_vm1 = vcmask 26624   ;;  %vm739_vm2 = vmmov 0   ;;  %s867_s13 = smov (!%p161_p3, %s643_s13), 1 }
   0xd   : > { %679 = vmatpush3.bf16.msra.mxu0 %v210_v3  ;;  %685 = vmatpush3.bf16.msra.mxu1 %v256_v4  ;;  %175 = vst.msk [vmem:[#allocation2] sm:$0x7] %vm174_vm1, %v738_v2  ;;  %176 = vst.msk [vmem:[#allocation2 + $0x13] sm:$0x7] %vm174_vm1, %v738_v2  ;;  %s662_s18 = sshll.u32 %s867_s13, 4  ;;  %vm177_vm3 = vcmask 31744  }
   0xe   : > { %680 = vmatprep.mubr.msk.bf16.mxu0 %vm739_vm2, %v738_v2  ;;  %686 = vmatprep.mubr.msk.bf16.mxu1 %vm739_vm2, %v738_v2  ;;  %s165_s21 = scalar_lea.vmem %s862_s0, %s662_s18  ;;  %v186_v7 = vld [vmem:[%s863_s1 + $0x6] sm:$0x3]  ;;  %v185_v20 = vld [vmem:[%s863_s1 + $0x4] sm:$0x3]  ;;  %vm192_vm4 = vsmask.f32 7424  ;;  %s170_s9 = scalar_lea.vmem %s865_s3, %s662_s18 }
   0xf   : > { %690 = vmatprep.subr.bf16.mxu0 %v738_v2  ;;  %696 = vmatprep.subr.bf16.mxu1 %v738_v2  ;;  %v172_v5 = vld [vmem:[%s165_s21] sm:$0xff]  ;;  %v173_v6 = vld [vmem:[%s165_s21 + $0x8] sm:$0xff]  ;;  %v368_v13 = vsel %vm208_vm0, %v186_v7, 0  ;;  %vm354_vm5 = vsmask.f32 6400  ;;  %v309_v28 = vsel %vm208_vm0, %v185_v20, 0 }
  0x10   : > { %178 = vst.msk [vmem:[#allocation2 + $0x3] sm:$0xff] %vm177_vm3, %v172_v5  ;;  %179 = vst.msk [vmem:[#allocation2 + $0xb] sm:$0xff] %vm177_vm3, %v173_v6  ;;  %v188_v27 = vld [vmem:[%s863_s1 + $0xa] sm:$0x3]  ;;  %vm301_vm6 = vcmask 1046528   ;;  %vm413_vm8 = vcmask 1045504  }
  0x11   : > { %v478_v36 = vsel %vm208_vm0, %v188_v27, 0  ;;  %v187_v39 = vld [vmem:[%s863_s1 + $0x8] sm:$0x3]  ;;  %vm466_vm7 = vsmask.f32 5376  ;;  %vm523_vm9 = vcmask 1044480  }
  0x12   : > { %v421_v43 = vsel %vm208_vm0, %v187_v39, 0  ;;  %v189_v47 = vld [vmem:[%s863_s1 + $0xc] sm:$0x3]  ;;  %vm585_vm10 = vcmask 261120  }
  0x13   : > { %v531_v49 = vsel %vm208_vm0, %v189_v47, 0 }
  0x17   : > { %v180_v8 = vld [vmem:[#allocation2] sm:$0xff]  ;;  %v181_v9 = vld [vmem:[#allocation2 + $0x8] sm:$0xff]  ;;  %v182_v10 = vld [vmem:[#allocation2 + $0x10] sm:$0x3f] }
  0x18   : > { %v799_v11 = vpack.c.bf16 %v181_v9, %v180_v8  ;;  %v801_v12 = vpack.c.bf16 %v182_v10, %v182_v10 }
  0x1a   : > { %v194_v14 = vshrl.u32 %v799_v11, 16  ;;  %v196_v15 = vshll.u32 %v799_v11, 16  ;;  %v201_v16 = vshll.u32 %v801_v12, 16  ;;  %687 = vmatmul.mubr.msk.bf16.vlgmr.msra.gmra.mxu1 %vm177_vm3, %v799_v11  ;;  %v358_v17 = vshrl.u32 %v801_v12, 16 }
  0x1b   : > { %697 = vmatpush3.bf16.msra.mxu1 %v368_v13  ;;  %698 = vmatprep.mubr.msk.bf16.mxu1 %vm739_vm2, %v738_v2  ;;  %v302_v37 = vrot.slane %v799_v11, 1  ;;  %v303_v38 = vrot.slane %v801_v12, 1  ;;  %v414_v45 = vrot.slane %v799_v11, 2  ;;  %v415_v46 = vrot.slane %v801_v12, 2 }
  0x1c   : > { %v198_v18 = vrot.slane %v196_v15, 1  ;;  %v203_v19 = vrot.slane %v201_v16, 1  ;;  %v355_v21 = vrot.slane %v194_v14, 1  ;;  %v356_v22 = vrot.slane %v196_v15, 2  ;;  %708 = vmatprep.subr.bf16.mxu1 %v738_v2 }
  0x1d   : > { %v360_v23 = vrot.slane %v358_v17, 1  ;;  %v361_v24 = vrot.slane %v201_v16, 2  ;;  %v467_v30 = vrot.slane %v194_v14, 2  ;;  %v468_v32 = vrot.slane %v196_v15, 3 }
  0x1e   : > { %v199_v25 = vor.u32 %v198_v18, %v194_v14  ;;  %v357_v26 = vor.u32 %v356_v22, %v355_v21  ;;  %v470_v33 = vrot.slane %v358_v17, 2  ;;  %v471_v34 = vrot.slane %v201_v16, 3 }
  0x1f   : > { %v362_v29 = vor.u32 %v361_v24, %v360_v23  ;;  %v469_v40 = vor.u32 %v468_v32, %v467_v30  ;;  %v304_v42 = vsel %vm301_vm6, %v302_v37, %v303_v38  ;;  %v416_v48 = vsel %vm413_vm8, %v414_v45, %v415_v46  ;;  %v659_v23 = vld [vmem:[%s864_s2] ss:$0 sm:$0xff] }
  0x20   : > { %v204_v31 = vsel %vm192_vm4, %v199_v25, %v203_v19  ;;  %v472_v41 = vor.u32 %v471_v34, %v470_v33  ;;  %v524_v50 = vrot.slane %v799_v11, 3  ;;  %v525_v51 = vrot.slane %v801_v12, 3 }
  0x21   : > { %681 = vmatmul.mubr.msk.bf16.vlgmr.msra.gmra.mxu0 %vm177_vm3, %v204_v31  ;;  %v363_v35 = vsel %vm354_vm5, %v357_v26, %v362_v29 }
  0x22   : > { %691 = vmatpush3.bf16.msra.mxu0 %v309_v28  ;;  %692 = vmatprep.mubr.msk.bf16.mxu0 %vm739_vm2, %v738_v2  ;;  %v473_v44 = vsel %vm466_vm7, %v469_v40, %v472_v41  ;;  %v526_v52 = vsel %vm523_vm9, %v524_v50, %v525_v51 }
  0x23   : > { %702 = vmatprep.subr.bf16.mxu0 %v738_v2  ;;  %699 = vmatmul.mubr.msk.bf16.vlgmr.msra.gmra.mxu1 %vm177_vm3, %v363_v35 }
  0x24   : > { %709 = vmatpush3.bf16.msra.mxu1 %v478_v36  ;;  %710 = vmatprep.mubr.msk.bf16.mxu1 %vm739_vm2, %v738_v2 }
  0x29   : > { %693 = vmatmul.mubr.msk.bf16.vlgmr.msra.gmra.mxu0 %vm177_vm3, %v304_v42 }
  0x2a   : > { %703 = vmatpush3.bf16.msra.mxu0 %v421_v43  ;;  %704 = vmatprep.mubr.msk.bf16.mxu0 %vm739_vm2, %v738_v2 }
  0x2b   : > { %714 = vmatprep.subr.bf16.mxu0 %v738_v2  ;;  %711 = vmatmul.mubr.msk.bf16.vlgmr.msra.gmra.mxu1 %vm177_vm3, %v473_v44 }
  0x31   : > { %705 = vmatmul.mubr.msk.bf16.vlgmr.msra.gmra.mxu0 %vm177_vm3, %v416_v48 }
  0x32   : > { %715 = vmatpush3.bf16.msra.mxu0 %v531_v49  ;;  %716 = vmatprep.mubr.msk.bf16.mxu0 %vm739_vm2, %v738_v2 }
  0x39   : > { %717 = vmatmul.mubr.msk.bf16.vlgmr.msra.gmra.mxu0 %vm177_vm3, %v526_v52 }
  0xda   : > { %v292_v53 = vpop.f32.mrf.mxu1 }
  0xdc   : > { %v688_v54 = vpop.f32.mrf.mxu1 }
  0xde   : > { %v295_v55 = vpop.f32.mrf.mxu1 }
  0xe0   : > { %v689_v56 = vpop.f32.mrf.mxu1 }
  0xe1   : > { %v246_v57 = vpop.f32.mrf.mxu0 }
  0xe2   : > { %v293_v4 = vadd.f32 %v292_v53, %v246_v57 }
  0xe3   : > { %v682_v58 = vpop.f32.mrf.mxu0  ;;  %v404_v59 = vpop.f32.mrf.mxu1 }
  0xe5   : > { %v249_v60 = vpop.f32.mrf.mxu0  ;;  %v700_v61 = vpop.f32.mrf.mxu1 }
  0xe6   : > { %v296_v10 = vadd.f32 %v295_v55, %v249_v60 }
  0xe7   : > { %v683_v62 = vpop.f32.mrf.mxu0  ;;  %v407_v63 = vpop.f32.mrf.mxu1 }
  0xe9   : > { %v345_v0 = vpop.f32.mrf.mxu0  ;;  %v701_v1 = vpop.f32.mrf.mxu1 }
  0xea   : > { %v352_v7 = vadd.f32 %v345_v0, %v293_v4 }
  0xeb   : > { %v694_v2 = vpop.f32.mrf.mxu0  ;;  %v514_v3 = vpop.f32.mrf.mxu1 }
  0xec   : > { %v411_v13 = vadd.f32 %v404_v59, %v352_v7 }
  0xed   : > { %v348_v5 = vpop.f32.mrf.mxu0  ;;  %v712_v6 = vpop.f32.mrf.mxu1 }
  0xee   : > { %v353_v14 = vadd.f32 %v348_v5, %v296_v10 }
  0xef   : > { %v695_v8 = vpop.f32.mrf.mxu0  ;;  %v517_v9 = vpop.f32.mrf.mxu1 }
  0xf0   : > { %v412_v18 = vadd.f32 %v407_v63, %v353_v14 }
  0xf1   : > { %v457_v11 = vpop.f32.mrf.mxu0  ;;  %v713_v12 = vpop.f32.mrf.mxu1 }
  0xf2   : > { %v464_v16 = vadd.f32 %v457_v11, %v411_v13 }
  0xf3   : > { %v706_v15 = vpop.f32.mrf.mxu0 }
  0xf4   : > { %v521_v20 = vadd.f32 %v514_v3, %v464_v16 }
  0xf5   : > { %v460_v17 = vpop.f32.mrf.mxu0 }
  0xf6   : > { %v465_v21 = vadd.f32 %v460_v17, %v412_v18 }
  0xf7   : > { %v707_v19 = vpop.f32.mrf.mxu0 }
  0xf8   : > { %v522_v26 = vadd.f32 %v517_v9, %v465_v21 }
  0xf9   : > { %v567_v22 = vpop.f32.mrf.mxu0 }
  0xfa   : > { %v574_v24 = vadd.f32 %v567_v22, %v521_v20 }
  0xfb   : > { %v718_v25 = vpop.f32.mrf.mxu0 }
  0xfc   : > { %v583_v27 = vadd.f32 %v659_v23, %v574_v24 }
  0xfd   : > { %v570_v28 = vpop.f32.mrf.mxu0 }
  0xfe   : > { %586 = vst.msk [vmem:[%s170_s9] sm:$0xff] %vm585_vm10, %v583_v27  ;;  %v575_v29 = vadd.f32 %v570_v28, %v522_v26 }
  0xff   : > { %v719_v30 = vpop.f32.mrf.mxu0 }
 0x100   : > { %v584_v31 = vadd.f32 %v659_v23, %v575_v29 }
 0x102   : > { %587 = vst.msk [vmem:[%s170_s9 + $0x8] sm:$0xff] %vm585_vm10, %v584_v31 }
 0x103 PF: > { %s13_s12 = sadd.s32 1, %s736_s12  }
 0x104   : > { %p10_p4 = scmp.ge.s32.totalorder %s13_s12, 4  }
 0x106   :  { %12 = sbr.rel (!%p10_p4) target bundleno = 1 (0x1), region = 62 }

// kernel: vocos_backbone_forward.13
= control target key start
LH: loop header
LB: loop body
LE: loop exit
PB: predicated region body
PF: predicated region fallthrough
CT: control target
= control target key end

     0   :  { %s1419_s25 = smov 0   ;;  %s1568_s0 = inlined_call_operand.vmem [shape: f32[2,16,32], index: 0, kind: input, shape index: {}]   ;;  %s1569_s1 = inlined_call_operand.vmem [shape: f32[32,32], index: 1, kind: input, shape index: {}]   ;;  %s1570_s2 = inlined_call_operand.vmem [shape: f32[32,32], index: 2, kind: input, shape index: {}]   ;;  %s1571_s3 = inlined_call_operand.vmem [shape: f32[1,32], index: 3, kind: input, shape index: {}]   ;;  %s1572_s4 = inlined_call_operand.vmem [shape: f32[1,32], index: 4, kind: input, shape index: {}]   ;;  %s1573_s5 = inlined_call_operand.vmem [shape: bf16[32,32], index: 5, kind: input, shape index: {}]   ;;  %s1574_s6 = inlined_call_operand.vmem [shape: f32[1,32], index: 6, kind: input, shape index: {}]   ;;  %s1575_s7 = inlined_call_operand.vmem [shape: bf16[32,32], index: 7, kind: input, shape index: {}]   ;;  %s1576_s8 = inlined_call_operand.vmem [shape: f32[1,32], index: 8, kind: input, shape index: {}]   ;;  %s1577_s9 = inlined_call_operand.vmem [shape: bf16[32,32], index: 9, kind: input, shape index: {}]   ;;  %s1578_s10 = inlined_call_operand.vmem [shape: f32[1,32], index: 10, kind: input, shape index: {}]   ;;  %s1579_s11 = inlined_call_operand.vmem [shape: bf16[2,16,32], index: 11, kind: output, shape index: {0}]   ;;  %s1580_s12 = inlined_call_operand.vmem [shape: bf16[2,16,32], index: 12, kind: output, shape index: {1}]   ;;  %s1581_s13 = inlined_call_operand.vmem [shape: bf16[2,16,32], index: 13, kind: output, shape index: {2}]  }
   0x1 LB: > { %s1175_s26 = sadd.s32 4294967295, %s1345_s25   ;;  %p1179_p0 = scmp.ge.s32.totalorder %s1345_s25, 1  ;;  %s1345_s25 = sphi %s1419_s25, %s24_s25  }
   0x2   : > { %p392_p1 = scmp.lt.s32.totalorder %s1345_s25, 3 }
   0x4   : > { %p393_p2 = pnand %p1179_p0, %p392_p1 }
   0x5   : > { %p446_p3 = scmp.lt.s32.totalorder (!%p393_p2), %s1175_s26, 1 }
   0x6   : > { %396 = sbr.rel (%p393_p2) target bundleno = 658 (0x292), region = 64 }
   0xb   : > { %v472_v0 = vld [vmem:[%s1569_s1 + $0x18] sm:$0xff]  ;;  %v1347_v1 = vmov 0.0   ;;  %v471_v2 = vld [vmem:[%s1569_s1 + $0x10] sm:$0xff]  ;;  %v470_v3 = vld [vmem:[%s1569_s1 + $0x8] sm:$0xff]  ;;  %s1583_s26 = smov (!%p446_p3, %s1175_s26), 1  ;;  %vm477_vm0 = vcmask 261120   ;;  %v797_v47 = vlaneseq }
   0xc   : > { %1253 = vmatprep.subr.mxu0 %v1347_v1  ;;  %1264 = vmatprep.subr.mxu1 %v1347_v1  ;;  %v469_v4 = vld [vmem:[%s1569_s1] sm:$0xff]  ;;  %s1214_s18 = sshll.u32 %s1583_s26, 4  ;;  %vm1348_vm1 = vmmov 0   ;;  %v476_v26 = vld [vmem:[%s1570_s2 + $0x18] sm:$0xff]  ;;  %v475_v28 = vld [vmem:[%s1570_s2 + $0x10] sm:$0xff]  ;;  %s1215_s20 = sshll.u32 %s1583_s26, 3 }
   0xd   : > { %1254 = vmatpush3.msra.mxu0 %v472_v0  ;;  %1265 = vmatpush3.msra.mxu1 %v472_v0  ;;  %s450_s21 = scalar_lea.vmem %s1568_s0, %s1214_s18  ;;  %v474_v29 = vld [vmem:[%s1570_s2 + $0x8] sm:$0xff]  ;;  %v473_v30 = vld [vmem:[%s1570_s2] sm:$0xff]  ;;  %v798_v48 = vshrl.u32 %v797_v47, 7  ;;  %s455_s23 = scalar_lea.vmem %s1579_s11, %s1215_s20  ;;  %vm1031_vm2 = vcmask 257024  }
   0xe   : > { %1255 = vmatprep.subr.mxu0 %v1347_v1  ;;  %1266 = vmatprep.subr.mxu1 %v1347_v1  ;;  %v1453_v5 = vld [vmem:[%s450_s21] sm:$0xff]  ;;  %v1455_v6 = vld [vmem:[%s450_s21 + $0x8] sm:$0xff]  ;;  %s460_s28 = scalar_lea.vmem %s1580_s12, %s1215_s20  ;;  %s465_s15 = scalar_lea.vmem %s1581_s13, %s1215_s20 }
   0xf   : > { %1256 = vmatpush3.msra.mxu0 %v471_v2  ;;  %1267 = vmatpush3.msra.mxu1 %v471_v2  ;;  %v478_v7 = vsel %vm477_vm0, %v1453_v5, 0.0  ;;  %v479_v8 = vsel %vm477_vm0, %v1455_v6, 0.0  ;;  %v487_v9 = vmul.f32 %v1453_v5, %v1453_v5  ;;  %v488_v10 = vmul.f32 %v1455_v6, %v1455_v6  ;;  %v1331_v41 = vld [vmem:[%s1573_s5 + $0x8] sm:$0xff]   ;;  %v1333_v43 = vld [vmem:[%s1573_s5] sm:$0xff]  }
  0x10   : > { %1257 = vmatprep.subr.mxu0 %v1347_v1  ;;  %1268 = vmatprep.subr.mxu1 %v1347_v1  ;;  %v480_v11 = vadd.f32 %v479_v8, %v478_v7  ;;  %v1332_v42 = vld [vmem:[%s1575_s7 + $0x8] sm:$0xff]   ;;  %v1334_v44 = vld [vmem:[%s1575_s7] sm:$0xff]   ;;  %v799_v49 = vsub.s32 0, %v798_v48 }
  0x11   : > { %1258 = vmatpush3.msra.mxu0 %v470_v3  ;;  %1261 = vmatprep.mubr.msk.f32.mxu0 %vm1348_vm1, %v1347_v1  ;;  %v489_v12 = vsel %vm477_vm0, %v487_v9, 0.0  ;;  %v490_v13 = vsel %vm477_vm0, %v488_v10, 0.0  ;;  %v1192_v55 = vld [vmem:[%s1571_s3] ss:$0 sm:$0xff]  ;;  %v1335_v0 = vld [vmem:[%s1577_s9 + $0x8] sm:$0xff]  }
  0x12   : > { %1259 = vmatprep.subr.mxu0 %v1347_v1  ;;  %1269 = vmatpush3.msra.mxu1 %v470_v3  ;;  %v481_v14 = vrot.slane %v480_v11, 4  ;;  %v491_v15 = vadd.f32 %v490_v13, %v489_v12  ;;  %v1193_v59 = vld [vmem:[%s1572_s4] ss:$0 sm:$0xff] }
  0x13   : > { %1260 = vmatpush3.msra.mxu0 %v469_v4  ;;  %1270 = vmatprep.subr.mxu1 %v1347_v1  ;;  %v1336_v3 = vld [vmem:[%s1577_s9] sm:$0xff]  }
  0x14   : > { %1271 = vmatpush3.msra.mxu1 %v469_v4  ;;  %1272 = vmatprep.mubr.msk.f32.mxu1 %vm1348_vm1, %v1347_v1  ;;  %v482_v16 = vadd.f32 %v481_v14, %v480_v11  ;;  %v492_v17 = vrot.slane %v491_v15, 4  ;;  %v1194_v4 = vld [vmem:[%s1574_s6] ss:$0 sm:$0xff] }
  0x15   : > { %1275 = vmatprep.subr.mxu0 %v1347_v1  ;;  %1286 = vmatprep.subr.mxu1 %v1347_v1 }
  0x16   : > { %v483_v18 = vrot.slane %v482_v16, 2  ;;  %v493_v19 = vadd.f32 %v492_v17, %v491_v15 }
  0x18   : > { %v484_v20 = vadd.f32 %v483_v18, %v482_v16  ;;  %v494_v21 = vrot.slane %v493_v19, 2 }
  0x1a   : > { %v485_v22 = vrot.slane %v484_v20, 1  ;;  %v495_v23 = vadd.f32 %v494_v21, %v493_v19  ;;  %v1202_v19 = vld [vmem:[%s1578_s10] ss:$0 sm:$0xff] }
  0x1c   : > { %v486_v24 = vadd.f32 %v485_v22, %v484_v20  ;;  %v496_v25 = vrot.slane %v495_v23, 1 }
  0x1e   : > { %1262 = vmatmul.mubr.msk.f32.vlgmr.msra.gmra.mxu0 %vm477_vm0, %v486_v24  ;;  %v497_v27 = vadd.f32 %v496_v25, %v495_v23 }
  0x1f   : > { %1276 = vmatpush3.msra.mxu0 %v476_v26  ;;  %1283 = vmatprep.mubr.msk.f32.mxu0 %vm1348_vm1, %v1347_v1 }
  0x20   : > { %1273 = vmatmul.mubr.msk.f32.vlgmr.msra.gmra.mxu1 %vm477_vm0, %v497_v27  ;;  %1277 = vmatprep.subr.mxu0 %v1347_v1 }
  0x21   : > { %1278 = vmatpush3.msra.mxu0 %v475_v28  ;;  %1287 = vmatpush3.msra.mxu1 %v476_v26 }
  0x22   : > { %1279 = vmatprep.subr.mxu0 %v1347_v1  ;;  %1288 = vmatprep.subr.mxu1 %v1347_v1 }
  0x23   : > { %1289 = vmatpush3.msra.mxu1 %v475_v28  ;;  %1294 = vmatprep.mubr.msk.f32.mxu1 %vm1348_vm1, %v1347_v1 }
  0x24   : > { %1290 = vmatprep.subr.mxu1 %v1347_v1  ;;  %1280 = vmatpush3.msra.mxu0 %v474_v29 }
  0x25   : > { %1291 = vmatpush3.msra.mxu1 %v474_v29  ;;  %1281 = vmatprep.subr.mxu0 %v1347_v1 }
  0x26   : > { %1292 = vmatprep.subr.mxu1 %v1347_v1  ;;  %1282 = vmatpush3.msra.mxu0 %v473_v30 }
  0x27   : > { %1293 = vmatpush3.msra.mxu1 %v473_v30  ;;  %1297 = vmatprep.subr.bf16.mxu0 %v1347_v1 }
  0x28   : > { %1305 = vmatprep.subr.bf16.mxu1 %v1347_v1 }
  0xde   : > { %v567_v31 = vpop.f32.mrf.mxu0 }
  0xdf   : > { %v645_v32 = vmul.f32 0.0625, %v567_v31 }
  0xe0   : > { %v1263_v33 = vpop.f32.mrf.mxu0  ;;  %v640_v34 = vpop.f32.mrf.mxu1 }
  0xe1   : > { %v647_v35 = vmul.f32 %v645_v32, %v645_v32  ;;  %v646_v36 = vmul.f32 0.0625, %v640_v34  ;;  %1284 = vmatmul.mubr.msk.f32.vlgmr.msra.gmra.mxu0 %vm477_vm0, %v645_v32 }
  0xe2   : > { %v1274_v37 = vpop.f32.mrf.mxu1  ;;  %1301 = vmatprep.mubr.msk.bf16.mxu0 %vm1348_vm1, %v1347_v1  ;;  %1298 = vmatpush3.bf16.msra.mxu0 %v1331_v41 }
  0xe3   : > { %v648_v38 = vsub.f32 %v646_v36, %v647_v35  ;;  %1299 = vmatprep.subr.bf16.mxu0 %v1347_v1 }
  0xe5   : > { %v649_v39 = vadd.f32 1e-06, %v648_v38 }
  0xe6   : > { %1300 = vmatpush3.bf16.msra.mxu0 %v1333_v43 }
  0xe7   : > { %1337 = vrsqrt.f32 %v649_v39  ;;  %1313 = vmatprep.subr.bf16.mxu0 %v1347_v1 }
  0xf4   : > { %v1338_v40 = vpop.eup %1337 }
  0xf5   : > { %1295 = vmatmul.mubr.msk.f32.vlgmr.msra.gmra.mxu1 %vm477_vm0, %v1338_v40 }
  0xf6   : > { %1309 = vmatprep.mubr.msk.bf16.mxu1 %vm1348_vm1, %v1347_v1  ;;  %1306 = vmatpush3.bf16.msra.mxu1 %v1332_v42 }
  0xf7   : > { %1307 = vmatprep.subr.bf16.mxu1 %v1347_v1 }
  0xfa   : > { %1308 = vmatpush3.bf16.msra.mxu1 %v1334_v44 }
 0x1a1   : > { %v720_v45 = vpop.f32.mrf.mxu0 }
 0x1a2   : > { %v800_v50 = vrot.slane %v720_v45, %v799_v49 }
 0x1a3   : > { %v1285_v46 = vpop.f32.mrf.mxu0 }
 0x1a4   : > { %v801_v52 = vsub.f32 %v1453_v5, %v800_v50  ;;  %v802_v53 = vsub.f32 %v1455_v6, %v800_v50  ;;  %v1198_v5 = vld [vmem:[%s1576_s8] ss:$0 sm:$0xff] }
 0x1b5   : > { %v793_v51 = vpop.f32.mrf.mxu1 }
 0x1b6   : > { %v806_v54 = vrot.slane %v793_v51, %v799_v49 }
 0x1b7   : > { %v1296_v56 = vpop.f32.mrf.mxu1 }
 0x1b8   : > { %v807_v57 = vmul.f32 %v806_v54, %v801_v52  ;;  %v808_v58 = vmul.f32 %v806_v54, %v802_v53 }
 0x1ba   : > { %v816_v60 = vmul.f32 %v1192_v55, %v807_v57  ;;  %v817_v61 = vmul.f32 %v1192_v55, %v808_v58 }
 0x1bc   : > { %v825_v62 = vadd.f32 %v1193_v59, %v816_v60  ;;  %v826_v63 = vadd.f32 %v1193_v59, %v817_v61 }
 0x1be   : > { %v827_v2 = vpack.c.bf16 %v826_v63, %v825_v62 }
 0x1c0   : > { %1302 = vmatmul.mubr.msk.bf16.vlgmr.msra.gmra.mxu0 %vm477_vm0, %v827_v2  ;;  %1310 = vmatmul.mubr.msk.bf16.vlgmr.msra.gmra.mxu1 %vm477_vm0, %v827_v2 }
 0x1c1   : > { %1314 = vmatpush3.bf16.msra.mxu0 %v1335_v0  ;;  %1317 = vmatprep.mubr.msk.bf16.mxu0 %vm1348_vm1, %v1347_v1 }
 0x1c2   : > { %1315 = vmatprep.subr.bf16.mxu0 %v1347_v1 }
 0x1c5   : > { %1316 = vmatpush3.bf16.msra.mxu0 %v1336_v3 }
 0x1c8   : > { %1318 = vmatmul.mubr.msk.bf16.vlgmr.msra.gmra.mxu0 %vm477_vm0, %v827_v2 }
 0x280   : > { %v888_v6 = vpop.f32.mrf.mxu0  ;;  %v952_v7 = vpop.f32.mrf.mxu1 }
 0x281   : > { %v889_v8 = vadd.f32 %v1194_v4, %v888_v6  ;;  %v953_v9 = vadd.f32 %v1198_v5, %v952_v7 }
 0x282   : > { %v1303_v1 = vpop.f32.mrf.mxu0  ;;  %v1311_v10 = vpop.f32.mrf.mxu1 }
 0x283   : > { %v1218_v11 = vpack.c.bf16 %v889_v8, %v889_v8  ;;  %v1220_v12 = vpack.c.bf16 %v953_v9, %v953_v9 }
 0x284   : > { %v891_v13 = vpop.f32.mrf.mxu0  ;;  %v955_v14 = vpop.f32.mrf.mxu1 }
 0x285   : > { %1032 = vst.msk [vmem:[%s455_s23] sm:$0xf] %vm1031_vm2, %v1218_v11  ;;  %1042 = vst.msk [vmem:[%s460_s28] sm:$0xf] %vm1031_vm2, %v1220_v12  ;;  %v892_v15 = vadd.f32 %v1194_v4, %v891_v13  ;;  %v956_v16 = vadd.f32 %v1198_v5, %v955_v14 }
 0x286   : > { %v1304_v17 = vpop.f32.mrf.mxu0  ;;  %v1312_v18 = vpop.f32.mrf.mxu1 }
 0x287   : > { %v1219_v20 = vpack.c.bf16 %v892_v15, %v892_v15  ;;  %v1221_v21 = vpack.c.bf16 %v956_v16, %v956_v16 }
 0x288   : > { %v1016_v22 = vpop.f32.mrf.mxu0 }
 0x289   : > { %1033 = vst.msk [vmem:[%s455_s23 + $0x4] sm:$0xf] %vm1031_vm2, %v1219_v20  ;;  %1043 = vst.msk [vmem:[%s460_s28 + $0x4] sm:$0xf] %vm1031_vm2, %v1221_v21  ;;  %v1017_v23 = vadd.f32 %v1202_v19, %v1016_v22 }
 0x28a   : > { %v1319_v24 = vpop.f32.mrf.mxu0 }
 0x28b   : > { %v1222_v25 = vpack.c.bf16 %v1017_v23, %v1017_v23 }
 0x28c   : > { %v1019_v26 = vpop.f32.mrf.mxu0 }
 0x28d   : > { %1052 = vst.msk [vmem:[%s465_s15] sm:$0xf] %vm1031_vm2, %v1222_v25  ;;  %v1020_v27 = vadd.f32 %v1202_v19, %v1019_v26 }
 0x28e   : > { %v1320_v28 = vpop.f32.mrf.mxu0 }
 0x28f   : > { %v1223_v29 = vpack.c.bf16 %v1020_v27, %v1020_v27 }
 0x291   : > { %1053 = vst.msk [vmem:[%s465_s15 + $0x4] sm:$0xf] %vm1031_vm2, %v1223_v29 }
 0x292 PF: > { %s24_s25 = sadd.s32 1, %s1345_s25  }
 0x293   : > { %p21_p4 = scmp.ge.s32.totalorder %s24_s25, 4  }
 0x295   :  { %23 = sbr.rel (!%p21_p4) target bundleno = 1 (0x1), region = 118 }

// kernel: vocos_backbone_forward.14
= control target key start
LH: loop header
LB: loop body
LE: loop exit
PB: predicated region body
PF: predicated region fallthrough
CT: control target
= control target key end

     0   :  { %s869_s21 = smov 0   ;;  %s871_s22 = smov 0   ;;  %s942_s0 = inlined_call_operand.vmem [shape: f32[2,16,32], index: 0, kind: input, shape index: {}]   ;;  %s943_s1 = inlined_call_operand.vmem [shape: bf16[2,16,32], index: 1, kind: input, shape index: {}]   ;;  %s944_s2 = inlined_call_operand.vmem [shape: bf16[2,16,32], index: 2, kind: input, shape index: {}]   ;;  %s945_s3 = inlined_call_operand.vmem [shape: bf16[2,16,32], index: 3, kind: input, shape index: {}]   ;;  %s946_s4 = inlined_call_operand.vmem [shape: bf16[32,32], index: 4, kind: input, shape index: {}]   ;;  %s947_s5 = inlined_call_operand.vmem [shape: f32[1,32], index: 5, kind: input, shape index: {}]   ;;  %s948_s6 = inlined_call_operand.vmem [shape: f32[2,16,32], index: 6, kind: output, shape index: {}]  }
   0x1   :  { %s873_s23 = smov 0  }
   0x2 LB: > { %s28_s24 = sadd.s32 1, %s826_s22  ;;  %p715_p0 = scmp.ge.s32.totalorder %s830_s23, 1  ;;  %s830_s23 = sphi %s873_s23, %s16_s23   ;;  %s826_s22 = sphi %s871_s22, %s950_s22   ;;  %s822_s21 = sphi %s869_s21, %s949_s21  }
   0x3   : > { %p30_p1 = scmp.ge.s32.totalorder %s28_s24, 2  ;;  %p270_p2 = scmp.lt.s32.totalorder %s830_s23, 3 }
   0x5   : > { %s952_s24 = smov (%p30_p1, %s28_s24), 0  ;;  %p271_p3 = pnand %p715_p0, %p270_p2 }
   0x6   : > { %p328_p4 = scmp.lt.s32.totalorder (!%p271_p3), %s822_s21, 1 }
   0x7   : > { %274 = sbr.rel (%p271_p3) target bundleno = 938 (0x3aa), region = 44 }
   0xc   : > { %v832_v0 = vmov 0.0   ;;  %vm833_vm0 = vmmov 0   ;;  %s954_s21 = smov (!%p328_p4, %s822_s21), 1  ;;  %vm384_vm1 = vcmask 261120   ;;  %vm434_vm2 = vcmask 130048   ;;  %v798_v29 = vld [vmem:[%s946_s4 + $0x8] sm:$0xff]  }
   0xd   : > { %749 = vmatprep.subr.bf16.mxu0 %v832_v0  ;;  %751 = vmatprep.mubr.msk.bf16.mxu0 %vm833_vm0, %v832_v0  ;;  %s892_s25 = sshll.u32 %s954_s21, 3  ;;  %v799_v31 = vld [vmem:[%s946_s4] sm:$0xff]   ;;  %s737_s15 = sshll.u32 %s954_s21, 4 }
   0xe   : > { %755 = vmatprep.subr.bf16.mxu1 %v832_v0  ;;  %757 = vmatprep.mubr.msk.bf16.mxu1 %vm833_vm0, %v832_v0  ;;  %s351_s28 = scalar_lea.vmem %s944_s2, %s892_s25  ;;  %s345_s7 = scalar_lea.vmem %s943_s1, %s892_s25  ;;  %v731_v37 = vld [vmem:[%s947_s5] ss:$0 sm:$0xff] }
   0xf   : > { %v795_v1 = vld [vmem:[%s351_s28] sm:$0xff]   ;;  %s356_s10 = scalar_lea.vmem %s945_s3, %s892_s25  ;;  %s335_s18 = scalar_lea.vmem %s942_s0, %s737_s15 }
  0x10   : > { %v389_v2 = vsel %vm384_vm1, %v795_v1, 0  ;;  %v796_v3 = vld [vmem:[%s345_s7] sm:$0xff]   ;;  %s365_s27 = scalar_lea.vmem %s948_s6, %s737_s15  ;;  %v577_v44 = vld [vmem:[%s335_s18 + $0x8] sm:$0xff] }
  0x11   : > { %750 = vmatpush3.bf16.xpose.msra.mxu0 %v389_v2  ;;  %v797_v22 = vld [vmem:[%s356_s10] sm:$0xff]  }
  0x12   : > { %756 = vmatpush3.bf16.msra.mxu1 %v797_v22  ;;  %v576_v39 = vld [vmem:[%s335_s18] sm:$0xff] }
  0x13   : > { %761 = vmatprep.subr.bf16.mxu1 %v832_v0 }
  0x18   : > { %752 = vmatmul.mubr.msk.bf16.vlgmr.msra.gmra.mxu0 %vm384_vm1, %v796_v3 }
  0xd8   : > { %v425_v4 = vpop.f32.mrf.mxu0 }
  0xd9   : > { %v432_v5 = vmul.f32 0.17677669, %v425_v4 }
  0xda   : > { %v753_v6 = vpop.f32.mrf.mxu0 }
  0xdb   : > { %v435_v7 = vsel %vm434_vm2, %v432_v5, -inf }
  0xdc   : > { %436 = vmax.xlane.f32.xlu0 %v435_v7  ;;  %v428_v8 = vpop.f32.mrf.mxu0 }
  0xdd   : > { %v433_v9 = vmul.f32 0.17677669, %v428_v8 }
  0xde   : > { %v754_v10 = vpop.f32.mrf.mxu0 }
  0xdf   : > { %v438_v11 = vsel %vm434_vm2, %v433_v9, -inf }
  0xe0   : > { %439 = vmax.xlane.f32.xlu0 %v438_v11 }
 0x165   : > { %v437_v12 = vpop.xlane.xlu0 %436 }
 0x166   : > { %v441_v13 = vsub.f32 %v432_v5, %v437_v12 }
 0x168   : > { %v443_v14 = vmul.f32 1.442695, %v441_v13 }
 0x169   : > { %v440_v15 = vpop.xlane.xlu0 %439 }
 0x16a   : > { %800 = vpow2.f32 %v443_v14  ;;  %v442_v16 = vsub.f32 %v433_v9, %v440_v15 }
 0x16c   : > { %v445_v17 = vmul.f32 1.442695, %v442_v16 }
 0x16e   : > { %802 = vpow2.f32 %v445_v17 }
 0x177   : > { %v801_v18 = vpop.eup %800 }
 0x178   : > { %v447_v19 = vsel %vm434_vm2, %v801_v18, 0.0 }
 0x179   : > { %448 = vadd.xlane.f32.xlu1 %v447_v19 }
 0x17b   : > { %v803_v20 = vpop.eup %802 }
 0x17c   : > { %v450_v21 = vsel %vm434_vm2, %v803_v20, 0.0 }
 0x17d   : > { %451 = vadd.xlane.f32.xlu1 %v450_v21 }
 0x202   : > { %v449_v23 = vpop.xlane.xlu1 %448 }
 0x203   : > { %804 = vrcp.f32 %v449_v23 }
 0x206   : > { %v452_v24 = vpop.xlane.xlu1 %451 }
 0x207   : > { %806 = vrcp.f32 %v452_v24 }
 0x210   : > { %v805_v25 = vpop.eup %804 }
 0x211   : > { %v455_v27 = vmul.f32 %v805_v25, %v801_v18 }
 0x214   : > { %v807_v26 = vpop.eup %806 }
 0x215   : > { %v456_v28 = vmul.f32 %v807_v26, %v803_v20 }
 0x217   : > { %v457_v30 = vpack.c.bf16 %v456_v28, %v455_v27 }
 0x219   : > { %758 = vmatmul.mubr.msk.bf16.vlgmr.msra.gmra.mxu1 %vm434_vm2, %v457_v30 }
 0x21a   : > { %762 = vmatpush3.bf16.msra.mxu1 %v798_v29  ;;  %765 = vmatprep.mubr.msk.bf16.mxu1 %vm833_vm0, %v832_v0 }
 0x21b   : > { %763 = vmatprep.subr.bf16.mxu1 %v832_v0 }
 0x21e   : > { %764 = vmatpush3.bf16.msra.mxu1 %v799_v31 }
 0x2d9   : > { %v501_v32 = vpop.f32.mrf.mxu1 }
 0x2db   : > { %v759_v33 = vpop.f32.mrf.mxu1 }
 0x2dd   : > { %v504_v34 = vpop.f32.mrf.mxu1 }
 0x2de   : > { %v508_v35 = vpack.c.bf16 %v504_v34, %v501_v32 }
 0x2df   : > { %v760_v36 = vpop.f32.mrf.mxu1 }
 0x2e0   : > { %766 = vmatmul.mubr.msk.bf16.vlgmr.msra.gmra.mxu1 %vm384_vm1, %v508_v35 }
 0x3a0   : > { %v569_v38 = vpop.f32.mrf.mxu1 }
 0x3a1   : > { %v570_v40 = vadd.f32 %v731_v37, %v569_v38 }
 0x3a2   : > { %v767_v41 = vpop.f32.mrf.mxu1 }
 0x3a3   : > { %v578_v42 = vadd.f32 %v576_v39, %v570_v40 }
 0x3a4   : > { %v572_v43 = vpop.f32.mrf.mxu1 }
 0x3a5   : > { %580 = vst.msk [vmem:[%s365_s27] sm:$0xff] %vm384_vm1, %v578_v42  ;;  %v573_v45 = vadd.f32 %v731_v37, %v572_v43 }
 0x3a6   : > { %v768_v46 = vpop.f32.mrf.mxu1 }
 0x3a7   : > { %v579_v47 = vadd.f32 %v577_v44, %v573_v45 }
 0x3a9   : > { %581 = vst.msk [vmem:[%s365_s27 + $0x8] sm:$0xff] %vm384_vm1, %v579_v47 }
 0x3aa PF: > { %s16_s23 = sadd.s32 1, %s830_s23   ;;  %s949_s21 = smov %s826_s22 }
 0x3ab   : > { %p13_p5 = scmp.ge.s32.totalorder %s16_s23, 4   ;;  %s950_s22 = smov %s952_s24 }
 0x3ad   :  { %15 = sbr.rel (!%p13_p5) target bundleno = 2 (0x2), region = 83 }

// kernel: vocos_backbone_forward.11
= control target key start
LH: loop header
LB: loop body
LE: loop exit
PB: predicated region body
PF: predicated region fallthrough
CT: control target
= control target key end

     0   :  { %s2054_s17 = smov 0   ;;  %s2351_s0 = inlined_call_operand.vmem [shape: f32[2,16,32], index: 0, kind: input, shape index: {}]   ;;  %s2352_s1 = inlined_call_operand.vmem [shape: f32[32,32], index: 1, kind: input, shape index: {}]   ;;  %s2353_s2 = inlined_call_operand.vmem [shape: f32[32,32], index: 2, kind: input, shape index: {}]   ;;  %s2354_s3 = inlined_call_operand.vmem [shape: f32[1,32], index: 3, kind: input, shape index: {}]   ;;  %s2355_s4 = inlined_call_operand.vmem [shape: f32[1,32], index: 4, kind: input, shape index: {}]   ;;  %s2356_s5 = inlined_call_operand.vmem [shape: bf16[3,32,32], index: 5, kind: input, shape index: {}]   ;;  %s2357_s6 = inlined_call_operand.vmem [shape: f32[1,32], index: 6, kind: input, shape index: {}]   ;;  %s2358_s7 = inlined_call_operand.vmem [shape: f32[1,32], index: 7, kind: input, shape index: {}]   ;;  %s2359_s8 = inlined_call_operand.vmem [shape: f32[1,32], index: 8, kind: input, shape index: {}]   ;;  %s2360_s9 = inlined_call_operand.vmem [shape: bf16[3,32,32], index: 9, kind: input, shape index: {}]   ;;  %s2361_s10 = inlined_call_operand.vmem [shape: f32[1,32], index: 10, kind: input, shape index: {}]   ;;  %s2362_s11 = inlined_call_operand.vmem [shape: f32[2,16,32], index: 11, kind: output, shape index: {}]  }
   0x1 LB: > { %s1688_s18 = sadd.s32 4294967295, %s1990_s17   ;;  %p1692_p0 = scmp.ge.s32.totalorder %s1990_s17, 1  ;;  %s1990_s17 = sphi %s2054_s17, %s21_s17  }
   0x2   : > { %p337_p1 = scmp.lt.s32.totalorder %s1990_s17, 3 }
   0x4   : > { %p338_p2 = pnand %p1692_p0, %p337_p1 }
   0x5   : > { %p377_p3 = scmp.lt.s32.totalorder (!%p338_p2), %s1688_s18, 1 }
   0x6   : > { %341 = sbr.rel (%p338_p2) target bundleno = 1408 (0x580), region = 64 }
   0xb   : > { %v2065_v0 = vld [vmem:[%s2352_s1 + $0x18] sm:$0xff]  ;;  %v1992_v1 = vmov 0.0   ;;  %v2072_v2 = vld [vmem:[%s2352_s1 + $0x10] sm:$0xff]  ;;  %v2077_v3 = vld [vmem:[%s2352_s1 + $0x8] sm:$0xff]  ;;  %s2364_s18 = smov (!%p377_p3, %s1688_s18), 1  ;;  %vm398_vm0 = vcmask 261120   ;;  %v718_v48 = vlaneseq }
   0xc   : > { %1802 = vmatprep.subr.mxu0 %v1992_v1  ;;  %1813 = vmatprep.subr.mxu1 %v1992_v1  ;;  %v2088_v4 = vld [vmem:[%s2352_s1] sm:$0xff]  ;;  %s1739_s27 = sshll.u32 %s2364_s18, 4  ;;  %vm1993_vm1 = vmmov 0   ;;  %v2129_v26 = vld [vmem:[%s2353_s2 + $0x18] sm:$0xff]  ;;  %v2135_v28 = vld [vmem:[%s2353_s2 + $0x10] sm:$0xff]  ;;  %vm762_vm2 = vcmask 254976  }
   0xd   : > { %1803 = vmatpush3.msra.mxu0 %v2065_v0  ;;  %1814 = vmatpush3.msra.mxu1 %v2065_v0  ;;  %s381_s30 = scalar_lea.vmem %s2351_s0, %s1739_s27  ;;  %v2153_v29 = vld [vmem:[%s2353_s2 + $0x8] sm:$0xff]  ;;  %v2161_v30 = vld [vmem:[%s2353_s2] sm:$0xff]  ;;  %v1950_v43 = vld [vmem:[%s2356_s5 + $0x18] sm:$0xff]   ;;  %763 = vst.msk [vmem:[#allocation2] sm:$0x3] %vm762_vm2, %v1992_v1  ;;  %v719_v49 = vshrl.u32 %v718_v48, 7  ;;  %s386_s29 = scalar_lea.vmem %s2362_s11, %s1739_s27 }
   0xe   : > { %1804 = vmatprep.subr.mxu0 %v1992_v1  ;;  %1815 = vmatprep.subr.mxu1 %v1992_v1  ;;  %v2103_v5 = vld [vmem:[%s381_s30] sm:$0xff]  ;;  %v2105_v6 = vld [vmem:[%s381_s30 + $0x8] sm:$0xff]  ;;  %764 = vst.msk [vmem:[#allocation2 + $0x12] sm:$0x3] %vm762_vm2, %v1992_v1  ;;  %v1951_v44 = vld [vmem:[%s2356_s5 + $0x10] sm:$0xff]   ;;  %vm932_vm4 = vcmask 1046528  }
   0xf   : > { %1805 = vmatpush3.msra.mxu0 %v2072_v2  ;;  %1816 = vmatpush3.msra.mxu1 %v2072_v2  ;;  %v399_v7 = vsel %vm398_vm0, %v2103_v5, 0.0  ;;  %v400_v8 = vsel %vm398_vm0, %v2105_v6, 0.0  ;;  %v408_v9 = vmul.f32 %v2103_v5, %v2103_v5  ;;  %v409_v10 = vmul.f32 %v2105_v6, %v2105_v6  ;;  %v1948_v41 = vld [vmem:[%s2356_s5 + $0x8] sm:$0xff]   ;;  %v1949_v42 = vld [vmem:[%s2356_s5] sm:$0xff]  }
  0x10   : > { %1806 = vmatprep.subr.mxu0 %v1992_v1  ;;  %1817 = vmatprep.subr.mxu1 %v1992_v1  ;;  %v401_v11 = vadd.f32 %v400_v8, %v399_v7  ;;  %v2186_v45 = vld [vmem:[%s2356_s5 + $0x28] sm:$0xff]   ;;  %v2189_v50 = vsub.s32 0, %v719_v49  ;;  %v1701_v56 = vld [vmem:[%s2354_s3] ss:$0 sm:$0xff]  ;;  %vm784_vm3 = vsmask.f32 7424 }
  0x11   : > { %1807 = vmatpush3.msra.mxu0 %v2077_v3  ;;  %1810 = vmatprep.mubr.msk.f32.mxu0 %vm1993_vm1, %v1992_v1  ;;  %v410_v12 = vsel %vm398_vm0, %v408_v9, 0.0  ;;  %v411_v13 = vsel %vm398_vm0, %v409_v10, 0.0  ;;  %v1702_v60 = vld [vmem:[%s2355_s4] ss:$0 sm:$0xff]  ;;  %vm1410_vm5 = vcmask 253952   ;;  %vm1413_vm6 = vcmask 261121  }
  0x12   : > { %1808 = vmatprep.subr.mxu0 %v1992_v1  ;;  %1818 = vmatpush3.msra.mxu1 %v2077_v3  ;;  %v402_v14 = vrot.slane %v401_v11, 4  ;;  %v412_v15 = vadd.f32 %v411_v13, %v410_v12  ;;  %1411 = vst.msk [vmem:[#allocation3] sm:$0x1] %vm1410_vm5, %v1992_v1  ;;  %1412 = vst.msk [vmem:[#allocation3 + $0x11] sm:$0x1] %vm1410_vm5, %v1992_v1 }
  0x13   : > { %1809 = vmatpush3.msra.mxu0 %v2088_v4  ;;  %1819 = vmatprep.subr.mxu1 %v1992_v1 }
  0x14   : > { %1820 = vmatpush3.msra.mxu1 %v2088_v4  ;;  %1821 = vmatprep.mubr.msk.f32.mxu1 %vm1993_vm1, %v1992_v1  ;;  %v403_v16 = vadd.f32 %v402_v14, %v401_v11  ;;  %v413_v17 = vrot.slane %v412_v15, 4 }
  0x15   : > { %1824 = vmatprep.subr.mxu0 %v1992_v1  ;;  %1835 = vmatprep.subr.mxu1 %v1992_v1 }
  0x16   : > { %v404_v18 = vrot.slane %v403_v16, 2  ;;  %v414_v19 = vadd.f32 %v413_v17, %v412_v15 }
  0x18   : > { %v405_v20 = vadd.f32 %v404_v18, %v403_v16  ;;  %v415_v21 = vrot.slane %v414_v19, 2 }
  0x1a   : > { %v406_v22 = vrot.slane %v405_v20, 1  ;;  %v416_v23 = vadd.f32 %v415_v21, %v414_v19 }
  0x1c   : > { %v407_v24 = vadd.f32 %v406_v22, %v405_v20  ;;  %v417_v25 = vrot.slane %v416_v23, 1 }
  0x1e   : > { %1811 = vmatmul.mubr.msk.f32.vlgmr.msra.gmra.mxu0 %vm398_vm0, %v407_v24  ;;  %v418_v27 = vadd.f32 %v417_v25, %v416_v23 }
  0x1f   : > { %1825 = vmatpush3.msra.mxu0 %v2129_v26  ;;  %1832 = vmatprep.mubr.msk.f32.mxu0 %vm1993_vm1, %v1992_v1 }
  0x20   : > { %1822 = vmatmul.mubr.msk.f32.vlgmr.msra.gmra.mxu1 %vm398_vm0, %v418_v27  ;;  %1826 = vmatprep.subr.mxu0 %v1992_v1 }
  0x21   : > { %1827 = vmatpush3.msra.mxu0 %v2135_v28  ;;  %1836 = vmatpush3.msra.mxu1 %v2129_v26 }
  0x22   : > { %1828 = vmatprep.subr.mxu0 %v1992_v1  ;;  %1837 = vmatprep.subr.mxu1 %v1992_v1 }
  0x23   : > { %1838 = vmatpush3.msra.mxu1 %v2135_v28  ;;  %1843 = vmatprep.mubr.msk.f32.mxu1 %vm1993_vm1, %v1992_v1 }
  0x24   : > { %1839 = vmatprep.subr.mxu1 %v1992_v1  ;;  %1829 = vmatpush3.msra.mxu0 %v2153_v29 }
  0x25   : > { %1840 = vmatpush3.msra.mxu1 %v2153_v29  ;;  %1830 = vmatprep.subr.mxu0 %v1992_v1 }
  0x26   : > { %1841 = vmatprep.subr.mxu1 %v1992_v1  ;;  %1831 = vmatpush3.msra.mxu0 %v2161_v30 }
  0x27   : > { %1842 = vmatpush3.msra.mxu1 %v2161_v30  ;;  %1846 = vmatprep.subr.bf16.mxu0 %v1950_v43 }
  0x28   : > { %1854 = vmatprep.subr.bf16.mxu1 %v1948_v41 }
  0xde   : > { %v488_v31 = vpop.f32.mrf.mxu0 }
  0xdf   : > { %v566_v32 = vmul.f32 0.0625, %v488_v31 }
  0xe0   : > { %v1812_v33 = vpop.f32.mrf.mxu0  ;;  %v561_v34 = vpop.f32.mrf.mxu1 }
  0xe1   : > { %v568_v35 = vmul.f32 %v566_v32, %v566_v32  ;;  %v567_v36 = vmul.f32 0.0625, %v561_v34  ;;  %1833 = vmatmul.mubr.msk.f32.vlgmr.msra.gmra.mxu0 %vm398_vm0, %v566_v32 }
  0xe2   : > { %v1823_v37 = vpop.f32.mrf.mxu1  ;;  %1847 = vmatpush3.bf16.msra.mxu0 %v1950_v43 }
  0xe3   : > { %v569_v38 = vsub.f32 %v567_v36, %v568_v35  ;;  %1848 = vmatprep.subr.bf16.mxu0 %v1951_v44 }
  0xe5   : > { %v570_v39 = vadd.f32 1e-06, %v569_v38  ;;  %v1953_v38 = vld [vmem:[%s2356_s5 + $0x20] sm:$0xff]  }
  0xe6   : > { %1849 = vmatpush3.bf16.msra.mxu0 %v1951_v44 }
  0xe7   : > { %1960 = vrsqrt.f32 %v570_v39  ;;  %1862 = vmatprep.subr.bf16.mxu0 %v2186_v45 }
  0xf4   : > { %v1961_v40 = vpop.eup %1960 }
  0xf5   : > { %1844 = vmatmul.mubr.msk.f32.vlgmr.msra.gmra.mxu1 %vm398_vm0, %v1961_v40 }
  0xf6   : > { %1855 = vmatpush3.bf16.msra.mxu1 %v1948_v41 }
  0xf7   : > { %1856 = vmatprep.subr.bf16.mxu1 %v1949_v42 }
  0xfa   : > { %1857 = vmatpush3.bf16.msra.mxu1 %v1949_v42 }
  0xfb   : > { %1870 = vmatprep.subr.mxu1 %v1992_v1 }
 0x1a1   : > { %v641_v46 = vpop.f32.mrf.mxu0 }
 0x1a2   : > { %v721_v51 = vrot.slane %v641_v46, %v2189_v50 }
 0x1a3   : > { %v1834_v47 = vpop.f32.mrf.mxu0 }
 0x1a4   : > { %v722_v53 = vsub.f32 %v2103_v5, %v721_v51  ;;  %v723_v54 = vsub.f32 %v2105_v6, %v721_v51 }
 0x1b5   : > { %v714_v52 = vpop.f32.mrf.mxu1 }
 0x1b6   : > { %v727_v55 = vrot.slane %v714_v52, %v2189_v50 }
 0x1b7   : > { %v1845_v57 = vpop.f32.mrf.mxu1 }
 0x1b8   : > { %v728_v58 = vmul.f32 %v727_v55, %v722_v53  ;;  %v729_v59 = vmul.f32 %v727_v55, %v723_v54 }
 0x1ba   : > { %v737_v61 = vmul.f32 %v1701_v56, %v728_v58  ;;  %v738_v62 = vmul.f32 %v1701_v56, %v729_v59 }
 0x1bc   : > { %v746_v63 = vadd.f32 %v1702_v60, %v737_v61  ;;  %v747_v7 = vadd.f32 %v1702_v60, %v738_v62 }
 0x1be   : > { %v1703_v8 = vmul.f32 -1.442695, %v746_v63  ;;  %v1704_v9 = vmul.f32 -1.442695, %v747_v7 }
 0x1c0   : > { %1962 = vpow2.f32 %v1703_v8 }
 0x1c1   : > { %1964 = vpow2.f32 %v1704_v9 }
 0x1cd   : > { %v1963_v10 = vpop.eup %1962 }
 0x1ce   : > { %v1965_v11 = vpop.eup %1964  ;;  %v754_v12 = vadd.f32 1.0, %v1963_v10 }
 0x1cf   : > { %v755_v13 = vadd.f32 1.0, %v1965_v11 }
 0x1d0   : > { %1966 = vrcp.f32 %v754_v12 }
 0x1d1   : > { %1968 = vrcp.f32 %v755_v13 }
 0x1dd   : > { %v1967_v14 = vpop.eup %1966 }
 0x1de   : > { %v1969_v15 = vpop.eup %1968  ;;  %v760_v16 = vmul.f32 %v1967_v14, %v746_v63 }
 0x1df   : > { %v761_v17 = vmul.f32 %v1969_v15, %v747_v7 }
 0x1e0   : > { %765 = vst.msk [vmem:[#allocation2 + $0x2] sm:$0xff] %vm398_vm0, %v760_v16 }
 0x1e1   : > { %766 = vst.msk [vmem:[#allocation2 + $0xa] sm:$0xff] %vm398_vm0, %v761_v17 }
 0x1e7   : > { %v767_v18 = vld [vmem:[#allocation2] sm:$0xff] }
 0x1e8   : > { %v768_v19 = vld [vmem:[#allocation2 + $0x8] sm:$0xff]  ;;  %v769_v20 = vld [vmem:[#allocation2 + $0x10] sm:$0xf] }
 0x1e9   : > { %v782_v21 = vpack.c.bf16 %v768_v19, %v767_v18  ;;  %v783_v22 = vpack.c.bf16 %v769_v20, %v769_v20 }
 0x1eb   : > { %1858 = vmatprep.mubr.msk.bf16.mxu1 %vm398_vm0, %v782_v21  ;;  %v788_v23 = vshll.u32 %v782_v21, 16  ;;  %v793_v24 = vshll.u32 %v783_v22, 16  ;;  %v786_v25 = vshrl.u32 %v782_v21, 16  ;;  %v797_v33 = vshrl.u32 %v783_v22, 16 }
 0x1ec   : > { %1859 = vmatmul.mubr.msk.bf16.vlgmr.msra.gmra.mxu1 %vm398_vm0, %v783_v22  ;;  %v933_v34 = vrot.slane %v782_v21, 1  ;;  %v934_v35 = vrot.slane %v783_v22, 1 }
 0x1ed   : > { %v790_v27 = vrot.slane %v788_v23, 1  ;;  %v795_v31 = vrot.slane %v793_v24, 1  ;;  %1871 = vmatpush3.msra.mxu1 %v2065_v0  ;;  %1878 = vmatprep.mubr.msk.f32.mxu1 %vm1993_vm1, %v1992_v1 }
 0x1ee   : > { %1872 = vmatprep.subr.mxu1 %v1992_v1  ;;  %v935_v39 = vsel %vm932_vm4, %v933_v34, %v934_v35 }
 0x1ef   : > { %v791_v32 = vor.u32 %v790_v27, %v786_v25  ;;  %1873 = vmatpush3.msra.mxu1 %v2072_v2  ;;  %v799_v37 = vor.u32 %v797_v33, %v795_v31 }
 0x1f0   : > { %1874 = vmatprep.subr.mxu1 %v1992_v1 }
 0x1f1   : > { %v796_v36 = vsel %vm784_vm3, %v791_v32, %v795_v31  ;;  %1875 = vmatpush3.msra.mxu1 %v2077_v3 }
 0x1f2   : > { %1850 = vmatprep.mubr.msk.bf16.mxu0 %vm398_vm0, %v796_v36  ;;  %1876 = vmatprep.subr.mxu1 %v1992_v1 }
 0x1f3   : > { %1851 = vmatmul.mubr.msk.bf16.vlgmr.msra.gmra.mxu0 %vm398_vm0, %v799_v37  ;;  %1877 = vmatpush3.msra.mxu1 %v2088_v4 }
 0x1f4   : > { %1863 = vmatpush3.bf16.msra.mxu0 %v2186_v45  ;;  %1866 = vmatprep.mubr.msk.bf16.mxu0 %vm398_vm0, %v935_v39 }
 0x1f5   : > { %1864 = vmatprep.subr.bf16.mxu0 %v1953_v38  ;;  %1892 = vmatprep.subr.mxu1 %v1992_v1 }
 0x1f8   : > { %1865 = vmatpush3.bf16.msra.mxu0 %v1953_v38 }
 0x1f9   : > { %1881 = vmatprep.subr.mxu0 %v1992_v1 }
 0x1fb   : > { %1867 = vmatmul.mubr.msk.bf16.vlgmr.msra.gmra.mxu0 %vm398_vm0, %v934_v35 }
 0x1fc   : > { %1882 = vmatpush3.msra.mxu0 %v2065_v0  ;;  %1889 = vmatprep.mubr.msk.f32.mxu0 %vm1993_vm1, %v1992_v1 }
 0x1fd   : > { %1883 = vmatprep.subr.mxu0 %v1992_v1 }
 0x1fe   : > { %1884 = vmatpush3.msra.mxu0 %v2072_v2 }
 0x1ff   : > { %1885 = vmatprep.subr.mxu0 %v1992_v1 }
 0x200   : > { %1886 = vmatpush3.msra.mxu0 %v2077_v3  ;;  %v1717_v3 = vld [vmem:[%s2357_s6] ss:$0 sm:$0xff] }
 0x201   : > { %1887 = vmatprep.subr.mxu0 %v1992_v1 }
 0x202   : > { %1888 = vmatpush3.msra.mxu0 %v2088_v4 }
 0x203   : > { %1903 = vmatprep.subr.mxu0 %v1992_v1 }
 0x2ac   : > { %v1860_v40 = vpop.f32.mrf.mxu1 }
 0x2ae   : > { %v916_v41 = vpop.f32.mrf.mxu1 }
 0x2b0   : > { %v1861_v0 = vpop.f32.mrf.mxu1 }
 0x2b2   : > { %v919_v4 = vpop.f32.mrf.mxu1 }
 0x2b3   : > { %v1852_v42 = vpop.f32.mrf.mxu0 }
 0x2b4   : > { %v925_v46 = vadd.f32 %v1860_v40, %v1852_v42  ;;  %v1954_v42 = vld [vmem:[%s2360_s9 + $0x8] sm:$0xff]  }
 0x2b5   : > { %v852_v43 = vpop.f32.mrf.mxu0 }
 0x2b6   : > { %v917_v2 = vadd.f32 %v916_v41, %v852_v43  ;;  %v1956_v43 = vld [vmem:[%s2360_s9 + $0x18] sm:$0xff]  }
 0x2b7   : > { %v1853_v44 = vpop.f32.mrf.mxu0 }
 0x2b8   : > { %v1955_v44 = vld [vmem:[%s2360_s9] sm:$0xff]  }
 0x2b9   : > { %v855_v45 = vpop.f32.mrf.mxu0 }
 0x2ba   : > { %v920_v54 = vadd.f32 %v919_v4, %v855_v45  ;;  %v1957_v45 = vld [vmem:[%s2360_s9 + $0x10] sm:$0xff]  }
 0x2bb   : > { %v1868_v47 = vpop.f32.mrf.mxu0 }
 0x2bc   : > { %v1004_v48 = vadd.f32 %v1868_v47, %v925_v46 }
 0x2bd   : > { %v988_v49 = vpop.f32.mrf.mxu0 }
 0x2be   : > { %v1002_v51 = vadd.f32 %v988_v49, %v917_v2  ;;  %v2239_v52 = vadd.f32 %v1717_v3, %v1004_v48 }
 0x2bf   : > { %v1869_v53 = vpop.f32.mrf.mxu0 }
 0x2c0   : > { %v2241_v55 = vadd.f32 %v1717_v3, %v1002_v51  ;;  %v1037_v58 = vmul.f32 %v2239_v52, %v2239_v52  ;;  %v1022_v61 = vrot.slane %v2239_v52, 1  ;;  %v1722_v53 = vld [vmem:[%s2358_s7] ss:$0 sm:$0xff] }
 0x2c1   : > { %v991_v56 = vpop.f32.mrf.mxu0 }
 0x2c2   : > { %v1003_v57 = vadd.f32 %v991_v56, %v920_v54  ;;  %v1035_v59 = vmul.f32 %v2241_v55, %v2241_v55  ;;  %v1019_v62 = vrot.slane %v2241_v55, 1  ;;  %v1044_v8 = vrot.slane %v1037_v58, 1 }
 0x2c4   : > { %v2247_v60 = vadd.f32 %v1717_v3, %v1003_v57  ;;  %v1041_v9 = vrot.slane %v1035_v59, 1  ;;  %v1723_v59 = vld [vmem:[%s2359_s8] ss:$0 sm:$0xff] }
 0x2c6   : > { %v1020_v63 = vrot.slane %v2247_v60, 1  ;;  %v1036_v7 = vmul.f32 %v2247_v60, %v2247_v60 }
 0x2c8   : > { %v1021_v10 = vsel %vm932_vm4, %v1019_v62, %v1020_v63  ;;  %v1023_v11 = vsel %vm932_vm4, %v1020_v63, %v1022_v61  ;;  %v1042_v12 = vrot.slane %v1036_v7, 1 }
 0x2c9   : > { %v1026_v13 = vsel %vm398_vm0, %v1021_v10, 0.0  ;;  %v1027_v14 = vsel %vm398_vm0, %v1023_v11, 0.0 }
 0x2ca   : > { %v1028_v15 = vadd.f32 %v1027_v14, %v1026_v13  ;;  %v1043_v16 = vsel %vm932_vm4, %v1041_v9, %v1042_v12  ;;  %v1045_v17 = vsel %vm932_vm4, %v1042_v12, %v1044_v8 }
 0x2cb   : > { %v1048_v18 = vsel %vm398_vm0, %v1043_v16, 0.0  ;;  %v1049_v19 = vsel %vm398_vm0, %v1045_v17, 0.0 }
 0x2cc   : > { %v1029_v20 = vrot.slane %v1028_v15, 4  ;;  %v1050_v21 = vadd.f32 %v1049_v19, %v1048_v18 }
 0x2ce   : > { %v1030_v22 = vadd.f32 %v1029_v20, %v1028_v15  ;;  %v1051_v23 = vrot.slane %v1050_v21, 4 }
 0x2d0   : > { %v1031_v24 = vrot.slane %v1030_v22, 2  ;;  %v1052_v25 = vadd.f32 %v1051_v23, %v1050_v21 }
 0x2d2   : > { %v1032_v27 = vadd.f32 %v1031_v24, %v1030_v22  ;;  %v1053_v31 = vrot.slane %v1052_v25, 2 }
 0x2d4   : > { %v1033_v32 = vrot.slane %v1032_v27, 1  ;;  %v1054_v33 = vadd.f32 %v1053_v31, %v1052_v25 }
 0x2d6   : > { %v1034_v34 = vadd.f32 %v1033_v32, %v1032_v27  ;;  %v1055_v35 = vrot.slane %v1054_v33, 1 }
 0x2d8   : > { %1879 = vmatmul.mubr.msk.f32.vlgmr.msra.gmra.mxu1 %vm398_vm0, %v1034_v34  ;;  %v1056_v36 = vadd.f32 %v1055_v35, %v1054_v33 }
 0x2d9   : > { %1893 = vmatpush3.msra.mxu1 %v2129_v26  ;;  %1900 = vmatprep.mubr.msk.f32.mxu1 %vm1993_vm1, %v1992_v1 }
 0x2da   : > { %1890 = vmatmul.mubr.msk.f32.vlgmr.msra.gmra.mxu0 %vm398_vm0, %v1056_v36  ;;  %1894 = vmatprep.subr.mxu1 %v1992_v1  ;;  %v1958_v36 = vld [vmem:[%s2360_s9 + $0x28] sm:$0xff]  }
 0x2db   : > { %1895 = vmatpush3.msra.mxu1 %v2135_v28  ;;  %1904 = vmatpush3.msra.mxu0 %v2129_v26 }
 0x2dc   : > { %1896 = vmatprep.subr.mxu1 %v1992_v1  ;;  %1905 = vmatprep.subr.mxu0 %v1992_v1 }
 0x2dd   : > { %1897 = vmatpush3.msra.mxu1 %v2153_v29  ;;  %1906 = vmatpush3.msra.mxu0 %v2135_v28 }
 0x2de   : > { %1898 = vmatprep.subr.mxu1 %v1992_v1  ;;  %1907 = vmatprep.subr.mxu0 %v1992_v1 }
 0x2df   : > { %1899 = vmatpush3.msra.mxu1 %v2161_v30  ;;  %1908 = vmatpush3.msra.mxu0 %v2153_v29 }
 0x2e0   : > { %1909 = vmatprep.subr.mxu0 %v1992_v1  ;;  %1911 = vmatprep.mubr.msk.f32.mxu0 %vm1993_vm1, %v1992_v1 }
 0x2e1   : > { %1910 = vmatpush3.msra.mxu0 %v2161_v30  ;;  %1914 = vmatprep.subr.bf16.mxu1 %v1992_v1 }
 0x2e2   : > { %1922 = vmatprep.subr.bf16.mxu0 %v1992_v1 }
 0x398   : > { %v1126_v26 = vpop.f32.mrf.mxu1 }
 0x399   : > { %v1203_v28 = vmul.f32 0.0625, %v1126_v26 }
 0x39a   : > { %v1880_v37 = vpop.f32.mrf.mxu1  ;;  %v1199_v38 = vpop.f32.mrf.mxu0 }
 0x39b   : > { %v1205_v39 = vmul.f32 %v1203_v28, %v1203_v28  ;;  %v1204_v40 = vmul.f32 0.0625, %v1199_v38  ;;  %1901 = vmatmul.mubr.msk.f32.vlgmr.msra.gmra.mxu1 %vm398_vm0, %v1203_v28  ;;  %v1959_v28 = vld [vmem:[%s2360_s9 + $0x20] sm:$0xff]  }
 0x39c   : > { %v1891_v29 = vpop.f32.mrf.mxu0  ;;  %1918 = vmatprep.mubr.msk.bf16.mxu1 %vm1993_vm1, %v1992_v1  ;;  %1915 = vmatpush3.bf16.msra.mxu1 %v1956_v43 }
 0x39d   : > { %v1206_v41 = vsub.f32 %v1204_v40, %v1205_v39  ;;  %1916 = vmatprep.subr.bf16.mxu1 %v1992_v1 }
 0x39f   : > { %v1207_v0 = vadd.f32 1e-06, %v1206_v41 }
 0x3a0   : > { %1917 = vmatpush3.bf16.msra.mxu1 %v1957_v45 }
 0x3a1   : > { %1970 = vrsqrt.f32 %v1207_v0  ;;  %1930 = vmatprep.subr.bf16.mxu1 %v1992_v1 }
 0x3ae   : > { %v1971_v30 = vpop.eup %1970 }
 0x3af   : > { %1912 = vmatmul.mubr.msk.f32.vlgmr.msra.gmra.mxu0 %vm398_vm0, %v1971_v30 }
 0x3b0   : > { %1926 = vmatprep.mubr.msk.bf16.mxu0 %vm1993_vm1, %v1992_v1  ;;  %1923 = vmatpush3.bf16.msra.mxu0 %v1954_v42 }
 0x3b1   : > { %1924 = vmatprep.subr.bf16.mxu0 %v1992_v1 }
 0x3b4   : > { %1925 = vmatpush3.bf16.msra.mxu0 %v1955_v44 }
 0x45b   : > { %v1278_v46 = vpop.f32.mrf.mxu1 }
 0x45c   : > { %v1358_v2 = vrot.slane %v1278_v46, %v2189_v50 }
 0x45d   : > { %v1902_v47 = vpop.f32.mrf.mxu1 }
 0x45e   : > { %v1359_v3 = vsub.f32 %v2241_v55, %v1358_v2  ;;  %v1360_v49 = vsub.f32 %v2247_v60, %v1358_v2  ;;  %v1361_v51 = vsub.f32 %v2239_v52, %v1358_v2 }
 0x46f   : > { %v1351_v48 = vpop.f32.mrf.mxu0 }
 0x470   : > { %v1365_v4 = vrot.slane %v1351_v48, %v2189_v50 }
 0x471   : > { %v1913_v54 = vpop.f32.mrf.mxu0 }
 0x472   : > { %v1366_v56 = vmul.f32 %v1365_v4, %v1359_v3  ;;  %v1367_v57 = vmul.f32 %v1365_v4, %v1360_v49  ;;  %v1368_v58 = vmul.f32 %v1365_v4, %v1361_v51 }
 0x474   : > { %v1376_v61 = vmul.f32 %v1722_v53, %v1366_v56  ;;  %v1377_v55 = vmul.f32 %v1722_v53, %v1367_v57  ;;  %v1378_v62 = vmul.f32 %v1722_v53, %v1368_v58 }
 0x476   : > { %v1386_v60 = vadd.f32 %v1723_v59, %v1376_v61  ;;  %v1387_v63 = vadd.f32 %v1723_v59, %v1377_v55  ;;  %v1388_v52 = vadd.f32 %v1723_v59, %v1378_v62 }
 0x478   : > { %v1724_v7 = vmul.f32 -1.442695, %v1386_v60  ;;  %v1725_v50 = vmul.f32 -1.442695, %v1387_v63  ;;  %v1726_v8 = vmul.f32 -1.442695, %v1388_v52 }
 0x47a   : > { %1972 = vpow2.f32 %v1724_v7 }
 0x47b   : > { %1974 = vpow2.f32 %v1725_v50 }
 0x47c   : > { %1976 = vpow2.f32 %v1726_v8 }
 0x487   : > { %v1973_v9 = vpop.eup %1972 }
 0x488   : > { %v1975_v10 = vpop.eup %1974  ;;  %v1398_v11 = vadd.f32 1.0, %v1973_v9 }
 0x489   : > { %v1977_v12 = vpop.eup %1976  ;;  %v1399_v13 = vadd.f32 1.0, %v1975_v10 }
 0x48a   : > { %v1400_v14 = vadd.f32 1.0, %v1977_v12  ;;  %1978 = vrcp.f32 %v1398_v11 }
 0x48b   : > { %1980 = vrcp.f32 %v1399_v13 }
 0x48c   : > { %1982 = vrcp.f32 %v1400_v14 }
 0x497   : > { %v1979_v15 = vpop.eup %1978 }
 0x498   : > { %v1981_v16 = vpop.eup %1980  ;;  %v1407_v17 = vmul.f32 %v1979_v15, %v1386_v60 }
 0x499   : > { %v1983_v18 = vpop.eup %1982  ;;  %v1408_v19 = vmul.f32 %v1981_v16, %v1387_v63 }
 0x49a   : > { %v1409_v20 = vmul.f32 %v1983_v18, %v1388_v52  ;;  %1414 = vst.msk [vmem:[#allocation3] sm:$0xfe] %vm1413_vm6, %v1407_v17 }
 0x49b   : > { %1415 = vst.msk [vmem:[#allocation3 + $0x8] sm:$0xff] %vm398_vm0, %v1408_v19 }
 0x49c   : > { %1416 = vst.msk [vmem:[#allocation3 + $0x10] sm:$0x1] %vm1410_vm5, %v1409_v20 }
 0x4a1   : > { %v1417_v21 = vld [vmem:[#allocation3] sm:$0xff] }
 0x4a2   : > { %v1418_v22 = vld [vmem:[#allocation3 + $0x8] sm:$0xff] }
 0x4a3   : > { %v1432_v23 = vpack.c.bf16 %v1418_v22, %v1417_v21  ;;  %v1419_v24 = vld [vmem:[#allocation3 + $0x10] sm:$0x3] }
 0x4a4   : > { %v1433_v25 = vpack.c.bf16 %v1419_v24, %v1419_v24 }
 0x4a5   : > { %1927 = vmatmul.mubr.msk.bf16.vlgmr.msra.gmra.mxu0 %vm398_vm0, %v1432_v23  ;;  %v1437_v27 = vshll.u32 %v1432_v23, 16  ;;  %v1435_v32 = vshrl.u32 %v1432_v23, 16  ;;  %v1559_v37 = vrot.slane %v1432_v23, 1 }
 0x4a6   : > { %v1442_v31 = vshll.u32 %v1433_v25, 16  ;;  %v1560_v38 = vrot.slane %v1433_v25, 1 }
 0x4a7   : > { %v1439_v33 = vrot.slane %v1437_v27, 1 }
 0x4a8   : > { %v1444_v35 = vrot.slane %v1442_v31, 1  ;;  %v1561_v39 = vsel %vm932_vm4, %v1559_v37, %v1560_v38 }
 0x4a9   : > { %v1440_v34 = vor.u32 %v1439_v33, %v1435_v32 }
 0x4ab   : > { %v1445_v26 = vsel %vm784_vm3, %v1440_v34, %v1444_v35 }
 0x4ac   : > { %1919 = vmatmul.mubr.msk.bf16.vlgmr.msra.gmra.mxu1 %vm398_vm0, %v1445_v26 }
 0x4ad   : > { %1931 = vmatpush3.bf16.msra.mxu1 %v1958_v36  ;;  %1934 = vmatprep.mubr.msk.bf16.mxu1 %vm1993_vm1, %v1992_v1 }
 0x4ae   : > { %1932 = vmatprep.subr.bf16.mxu1 %v1992_v1  ;;  %v1736_v1 = vld [vmem:[%s2361_s10] ss:$0 sm:$0xff] }
 0x4b1   : > { %1933 = vmatpush3.bf16.msra.mxu1 %v1959_v28 }
 0x4b4   : > { %1935 = vmatmul.mubr.msk.bf16.vlgmr.msra.gmra.mxu1 %vm398_vm0, %v1561_v39 }
 0x565   : > { %v1550_v40 = vpop.f32.mrf.mxu0 }
 0x567   : > { %v1928_v29 = vpop.f32.mrf.mxu0 }
 0x569   : > { %v1553_v41 = vpop.f32.mrf.mxu0 }
 0x56b   : > { %v1929_v0 = vpop.f32.mrf.mxu0 }
 0x56c   : > { %v1495_v30 = vpop.f32.mrf.mxu1 }
 0x56d   : > { %v1551_v45 = vadd.f32 %v1550_v40, %v1495_v30 }
 0x56e   : > { %v1920_v42 = vpop.f32.mrf.mxu1 }
 0x570   : > { %v1498_v43 = vpop.f32.mrf.mxu1 }
 0x571   : > { %v1554_v48 = vadd.f32 %v1553_v41, %v1498_v43 }
 0x572   : > { %v1921_v44 = vpop.f32.mrf.mxu1 }
 0x574   : > { %v1611_v46 = vpop.f32.mrf.mxu1 }
 0x575   : > { %v1618_v47 = vadd.f32 %v1611_v46, %v1551_v45 }
 0x576   : > { %v1936_v2 = vpop.f32.mrf.mxu1 }
 0x577   : > { %v1627_v3 = vadd.f32 %v1736_v1, %v1618_v47 }
 0x578   : > { %v1614_v49 = vpop.f32.mrf.mxu1 }
 0x579   : > { %v1629_v51 = vadd.f32 %v1627_v3, %v2103_v5  ;;  %v1619_v4 = vadd.f32 %v1614_v49, %v1554_v48 }
 0x57a   : > { %v1937_v53 = vpop.f32.mrf.mxu1 }
 0x57b   : > { %1631 = vst.msk [vmem:[%s386_s29] sm:$0xff] %vm398_vm0, %v1629_v51  ;;  %v1628_v54 = vadd.f32 %v1736_v1, %v1619_v4 }
 0x57d   : > { %v1630_v56 = vadd.f32 %v1628_v54, %v2105_v6 }
 0x57f   : > { %1632 = vst.msk [vmem:[%s386_s29 + $0x8] sm:$0xff] %vm398_vm0, %v1630_v56 }
 0x580 PF: > { %s21_s17 = sadd.s32 1, %s1990_s17  }
 0x581   : > { %p18_p4 = scmp.ge.s32.totalorder %s21_s17, 4  }
 0x583   :  { %20 = sbr.rel (!%p18_p4) target bundleno = 1 (0x1), region = 94 }

// kernel: vocos_backbone_forward.17
= control target key start
LH: loop header
LB: loop body
LE: loop exit
PB: predicated region body
PF: predicated region fallthrough
CT: control target
= control target key end

     0   :  { %s892_s24 = smov 0   ;;  %s1002_s0 = inlined_call_operand.vmem [shape: f32[2,16,32], index: 0, kind: input, shape index: {}]   ;;  %s1003_s1 = inlined_call_operand.vmem [shape: f32[32,32], index: 1, kind: input, shape index: {}]   ;;  %s1004_s2 = inlined_call_operand.vmem [shape: f32[32,32], index: 2, kind: input, shape index: {}]   ;;  %s1005_s3 = inlined_call_operand.vmem [shape: f32[1,32], index: 3, kind: input, shape index: {}]   ;;  %s1006_s4 = inlined_call_operand.vmem [shape: f32[1,32], index: 4, kind: input, shape index: {}]   ;;  %s1007_s5 = inlined_call_operand.vmem [shape: f32[1,32], index: 5, kind: input, shape index: {}]   ;;  %s1008_s6 = inlined_call_operand.vmem [shape: f32[1,32], index: 6, kind: input, shape index: {}]   ;;  %s1009_s7 = inlined_call_operand.vmem [shape: f32[2,16,32], index: 7, kind: output, shape index: {}]  }
   0x1 LB: > { %s741_s25 = sadd.s32 4294967295, %s848_s24   ;;  %p745_p0 = scmp.ge.s32.totalorder %s848_s24, 1  ;;  %s848_s24 = sphi %s892_s24, %s17_s24  }
   0x2   : > { %p237_p1 = scmp.lt.s32.totalorder %s848_s24, 3 }
   0x4   : > { %p238_p2 = pnand %p745_p0, %p237_p1 }
   0x5   : > { %p269_p3 = scmp.lt.s32.totalorder (!%p238_p2), %s741_s25, 1 }
   0x6   : > { %241 = sbr.rel (%p238_p2) target bundleno = 759 (0x2f7), region = 48 }
   0xb   : > { %v284_v0 = vld [vmem:[%s1003_s1 + $0x18] sm:$0xff]  ;;  %v850_v1 = vmov 0.0   ;;  %v283_v2 = vld [vmem:[%s1003_s1 + $0x10] sm:$0xff]  ;;  %s1011_s25 = smov (!%p269_p3, %s741_s25), 1  ;;  %v282_v3 = vld [vmem:[%s1003_s1 + $0x8] sm:$0xff]  ;;  %vm289_vm0 = vcmask 261120   ;;  %v609_v43 = vlaneseq }
   0xc   : > { %782 = vmatprep.subr.mxu0 %v850_v1  ;;  %793 = vmatprep.subr.mxu1 %v850_v1  ;;  %s760_s9 = sshll.u32 %s1011_s25, 4  ;;  %v281_v4 = vld [vmem:[%s1003_s1] sm:$0xff]  ;;  %vm851_vm1 = vmmov 0   ;;  %v288_v26 = vld [vmem:[%s1004_s2 + $0x18] sm:$0xff]  ;;  %v287_v28 = vld [vmem:[%s1004_s2 + $0x10] sm:$0xff] }
   0xd   : > { %783 = vmatpush3.msra.mxu0 %v284_v0  ;;  %794 = vmatpush3.msra.mxu1 %v284_v0  ;;  %s273_s14 = scalar_lea.vmem %s1002_s0, %s760_s9  ;;  %v286_v29 = vld [vmem:[%s1004_s2 + $0x8] sm:$0xff]  ;;  %v285_v30 = vld [vmem:[%s1004_s2] sm:$0xff]  ;;  %v610_v44 = vshrl.u32 %v609_v43, 7  ;;  %s278_s13 = scalar_lea.vmem %s1009_s7, %s760_s9 }
   0xe   : > { %784 = vmatprep.subr.mxu0 %v850_v1  ;;  %795 = vmatprep.subr.mxu1 %v850_v1  ;;  %v928_v5 = vld [vmem:[%s273_s14] sm:$0xff]  ;;  %v930_v6 = vld [vmem:[%s273_s14 + $0x8] sm:$0xff] }
   0xf   : > { %785 = vmatpush3.msra.mxu0 %v283_v2  ;;  %796 = vmatpush3.msra.mxu1 %v283_v2  ;;  %v290_v7 = vsel %vm289_vm0, %v928_v5, 0.0  ;;  %v291_v8 = vsel %vm289_vm0, %v930_v6, 0.0  ;;  %v299_v9 = vmul.f32 %v928_v5, %v928_v5  ;;  %v300_v10 = vmul.f32 %v930_v6, %v930_v6  ;;  %v754_v52 = vld [vmem:[%s1005_s3] ss:$0 sm:$0xff] }
  0x10   : > { %786 = vmatprep.subr.mxu0 %v850_v1  ;;  %797 = vmatprep.subr.mxu1 %v850_v1  ;;  %v292_v11 = vadd.f32 %v291_v8, %v290_v7  ;;  %v611_v45 = vsub.s32 0, %v610_v44  ;;  %v755_v55 = vld [vmem:[%s1006_s4] ss:$0 sm:$0xff] }
  0x11   : > { %787 = vmatpush3.msra.mxu0 %v282_v3  ;;  %790 = vmatprep.mubr.msk.f32.mxu0 %vm851_vm1, %v850_v1  ;;  %v301_v12 = vsel %vm289_vm0, %v299_v9, 0.0  ;;  %v302_v13 = vsel %vm289_vm0, %v300_v10, 0.0 }
  0x12   : > { %788 = vmatprep.subr.mxu0 %v850_v1  ;;  %798 = vmatpush3.msra.mxu1 %v282_v3  ;;  %v293_v14 = vrot.slane %v292_v11, 4  ;;  %v303_v15 = vadd.f32 %v302_v13, %v301_v12 }
  0x13   : > { %789 = vmatpush3.msra.mxu0 %v281_v4  ;;  %799 = vmatprep.subr.mxu1 %v850_v1 }
  0x14   : > { %800 = vmatpush3.msra.mxu1 %v281_v4  ;;  %801 = vmatprep.mubr.msk.f32.mxu1 %vm851_vm1, %v850_v1  ;;  %v294_v16 = vadd.f32 %v293_v14, %v292_v11  ;;  %v304_v17 = vrot.slane %v303_v15, 4 }
  0x15   : > { %804 = vmatprep.subr.mxu0 %v850_v1  ;;  %815 = vmatprep.subr.mxu1 %v850_v1 }
  0x16   : > { %v295_v18 = vrot.slane %v294_v16, 2  ;;  %v305_v19 = vadd.f32 %v304_v17, %v303_v15  ;;  %v756_v15 = vld [vmem:[%s1007_s5] ss:$0 sm:$0xff] }
  0x17   : > { %v757_v17 = vld [vmem:[%s1008_s6] ss:$0 sm:$0xff] }
  0x18   : > { %v296_v20 = vadd.f32 %v295_v18, %v294_v16  ;;  %v306_v21 = vrot.slane %v305_v19, 2 }
  0x1a   : > { %v297_v22 = vrot.slane %v296_v20, 1  ;;  %v307_v23 = vadd.f32 %v306_v21, %v305_v19 }
  0x1c   : > { %v298_v24 = vadd.f32 %v297_v22, %v296_v20  ;;  %v308_v25 = vrot.slane %v307_v23, 1 }
  0x1e   : > { %791 = vmatmul.mubr.msk.f32.vlgmr.msra.gmra.mxu0 %vm289_vm0, %v298_v24  ;;  %v309_v27 = vadd.f32 %v308_v25, %v307_v23 }
  0x1f   : > { %805 = vmatpush3.msra.mxu0 %v288_v26  ;;  %812 = vmatprep.mubr.msk.f32.mxu0 %vm851_vm1, %v850_v1 }
  0x20   : > { %802 = vmatmul.mubr.msk.f32.vlgmr.msra.gmra.mxu1 %vm289_vm0, %v309_v27  ;;  %806 = vmatprep.subr.mxu0 %v850_v1 }
  0x21   : > { %807 = vmatpush3.msra.mxu0 %v287_v28  ;;  %816 = vmatpush3.msra.mxu1 %v288_v26 }
  0x22   : > { %808 = vmatprep.subr.mxu0 %v850_v1  ;;  %817 = vmatprep.subr.mxu1 %v850_v1 }
  0x23   : > { %818 = vmatpush3.msra.mxu1 %v287_v28  ;;  %823 = vmatprep.mubr.msk.f32.mxu1 %vm851_vm1, %v850_v1 }
  0x24   : > { %819 = vmatprep.subr.mxu1 %v850_v1  ;;  %809 = vmatpush3.msra.mxu0 %v286_v29 }
  0x25   : > { %820 = vmatpush3.msra.mxu1 %v286_v29  ;;  %810 = vmatprep.subr.mxu0 %v850_v1 }
  0x26   : > { %821 = vmatprep.subr.mxu1 %v850_v1  ;;  %811 = vmatpush3.msra.mxu0 %v285_v30 }
  0x27   : > { %822 = vmatpush3.msra.mxu1 %v285_v30 }
  0xde   : > { %v379_v31 = vpop.f32.mrf.mxu0 }
  0xdf   : > { %v457_v32 = vmul.f32 0.0625, %v379_v31 }
  0xe0   : > { %v792_v33 = vpop.f32.mrf.mxu0  ;;  %v452_v34 = vpop.f32.mrf.mxu1 }
  0xe1   : > { %v459_v35 = vmul.f32 %v457_v32, %v457_v32  ;;  %v458_v36 = vmul.f32 0.0625, %v452_v34  ;;  %813 = vmatmul.mubr.msk.f32.vlgmr.msra.gmra.mxu0 %vm289_vm0, %v457_v32 }
  0xe2   : > { %v803_v37 = vpop.f32.mrf.mxu1 }
  0xe3   : > { %v460_v38 = vsub.f32 %v458_v36, %v459_v35 }
  0xe5   : > { %v461_v39 = vadd.f32 1e-06, %v460_v38 }
  0xe7   : > { %836 = vrsqrt.f32 %v461_v39 }
  0xf4   : > { %v837_v40 = vpop.eup %836 }
  0xf5   : > { %824 = vmatmul.mubr.msk.f32.vlgmr.msra.gmra.mxu1 %vm289_vm0, %v837_v40 }
 0x1a1   : > { %v532_v41 = vpop.f32.mrf.mxu0 }
 0x1a2   : > { %v612_v46 = vrot.slane %v532_v41, %v611_v45 }
 0x1a3   : > { %v814_v42 = vpop.f32.mrf.mxu0 }
 0x1a4   : > { %v613_v48 = vsub.f32 %v928_v5, %v612_v46  ;;  %v614_v49 = vsub.f32 %v930_v6, %v612_v46 }
 0x1b5   : > { %v605_v47 = vpop.f32.mrf.mxu1 }
 0x1b6   : > { %v618_v50 = vrot.slane %v605_v47, %v611_v45 }
 0x1b7   : > { %v825_v51 = vpop.f32.mrf.mxu1 }
 0x1b8   : > { %v619_v53 = vmul.f32 %v618_v50, %v613_v48  ;;  %v620_v54 = vmul.f32 %v618_v50, %v614_v49 }
 0x1ba   : > { %v628_v56 = vmul.f32 %v754_v52, %v619_v53  ;;  %v629_v57 = vmul.f32 %v754_v52, %v620_v54 }
 0x1bc   : > { %v637_v58 = vadd.f32 %v755_v55, %v628_v56  ;;  %v638_v60 = vadd.f32 %v755_v55, %v629_v57 }
 0x1be   : > { %v639_v59 = vsel %vm289_vm0, %v637_v58, 0.0  ;;  %v642_v61 = vsel %vm289_vm0, %v638_v60, 0.0 }
 0x1bf   : > { %640 = vadd.xlane.f32.xlu0 %v639_v59 }
 0x1c3   : > { %643 = vadd.xlane.f32.xlu0 %v642_v61 }
 0x248   : > { %v641_v62 = vpop.xlane.xlu0 %640 }
 0x249   : > { %v646_v63 = vmul.f32 0.03125, %v641_v62 }
 0x24b   : > { %v648_v0 = vsub.f32 %v637_v58, %v646_v63 }
 0x24c   : > { %v644_v1 = vpop.xlane.xlu0 %643 }
 0x24d   : > { %v647_v2 = vmul.f32 0.03125, %v644_v1  ;;  %v650_v3 = vmul.f32 %v648_v0, %v648_v0 }
 0x24f   : > { %v649_v4 = vsub.f32 %v638_v60, %v647_v2  ;;  %v652_v5 = vsel %vm289_vm0, %v650_v3, 0.0 }
 0x250   : > { %653 = vadd.xlane.f32.xlu1 %v652_v5 }
 0x251   : > { %v651_v6 = vmul.f32 %v649_v4, %v649_v4 }
 0x253   : > { %v655_v7 = vsel %vm289_vm0, %v651_v6, 0.0 }
 0x254   : > { %656 = vadd.xlane.f32.xlu1 %v655_v7 }
 0x2d9   : > { %v654_v8 = vpop.xlane.xlu1 %653 }
 0x2da   : > { %v658_v9 = vmul.f32 0.03125, %v654_v8 }
 0x2dc   : > { %v660_v10 = vadd.f32 1e-06, %v658_v9 }
 0x2dd   : > { %v657_v11 = vpop.xlane.xlu1 %656 }
 0x2de   : > { %838 = vrsqrt.f32 %v660_v10  ;;  %v659_v12 = vmul.f32 0.03125, %v657_v11 }
 0x2e0   : > { %v661_v13 = vadd.f32 1e-06, %v659_v12 }
 0x2e2   : > { %840 = vrsqrt.f32 %v661_v13 }
 0x2eb   : > { %v839_v14 = vpop.eup %838 }
 0x2ec   : > { %v664_v16 = vmul.f32 %v839_v14, %v648_v0 }
 0x2ee   : > { %v673_v18 = vmul.f32 %v756_v15, %v664_v16 }
 0x2ef   : > { %v841_v19 = vpop.eup %840 }
 0x2f0   : > { %v682_v20 = vadd.f32 %v757_v17, %v673_v18  ;;  %v665_v21 = vmul.f32 %v841_v19, %v649_v4 }
 0x2f2   : > { %684 = vst.msk [vmem:[%s278_s13] sm:$0xff] %vm289_vm0, %v682_v20  ;;  %v674_v22 = vmul.f32 %v756_v15, %v665_v21 }
 0x2f4   : > { %v683_v23 = vadd.f32 %v757_v17, %v674_v22 }
 0x2f6   : > { %685 = vst.msk [vmem:[%s278_s13 + $0x8] sm:$0xff] %vm289_vm0, %v683_v23 }
 0x2f7 PF: > { %s17_s24 = sadd.s32 1, %s848_s24  }
 0x2f8   : > { %p14_p4 = scmp.ge.s32.totalorder %s17_s24, 4  }
 0x2fa   :  { %16 = sbr.rel (!%p14_p4) target bundleno = 1 (0x1), region = 78 }

// kernel: vocos_backbone_forward.18
= control target key start
LH: loop header
LB: loop body
LE: loop exit
PB: predicated region body
PF: predicated region fallthrough
CT: control target
= control target key end

     0   :  { %s1002_s21 = smov 0   ;;  %s1104_s0 = inlined_call_operand.vmem [shape: f32[2,16,32], index: 0, kind: input, shape index: {}]   ;;  %s1105_s1 = inlined_call_operand.vmem [shape: f32[7,32], index: 1, kind: input, shape index: {}]   ;;  %s1106_s2 = inlined_call_operand.vmem [shape: f32[1,32], index: 2, kind: input, shape index: {}]   ;;  %s1107_s3 = inlined_call_operand.vmem [shape: f32[1,32], index: 3, kind: input, shape index: {}]   ;;  %s1108_s4 = inlined_call_operand.vmem [shape: f32[1,32], index: 4, kind: input, shape index: {}]   ;;  %s1109_s5 = inlined_call_operand.vmem [shape: bf16[32,64], index: 5, kind: input, shape index: {}]   ;;  %s1110_s6 = inlined_call_operand.vmem [shape: f32[1,64], index: 6, kind: input, shape index: {}]   ;;  %s1111_s7 = inlined_call_operand.vmem [shape: bf16[64,32], index: 7, kind: input, shape index: {}]   ;;  %s1112_s8 = inlined_call_operand.vmem [shape: f32[1,32], index: 8, kind: input, shape index: {}]   ;;  %s1113_s9 = inlined_call_operand.vmem [shape: f32[1,32], index: 9, kind: input, shape index: {}]   ;;  %s1114_s10 = inlined_call_operand.vmem [shape: f32[1,32], index: 10, kind: input, shape index: {}]   ;;  %s1115_s11 = inlined_call_operand.vmem [shape: f32[1,32], index: 11, kind: input, shape index: {}]   ;;  %s1116_s12 = inlined_call_operand.vmem [shape: f32[2,16,32], index: 12, kind: output, shape index: {}]  }
   0x1 LB: > { %s848_s22 = sadd.s32 4294967295, %s933_s21   ;;  %p852_p0 = scmp.ge.s32.totalorder %s933_s21, 1  ;;  %s933_s21 = sphi %s1002_s21, %s22_s21  }
   0x2   : > { %p362_p1 = scmp.lt.s32.totalorder %s933_s21, 3 }
   0x4   : > { %p363_p2 = pnand %p852_p0, %p362_p1 }
   0x5   : > { %p404_p3 = scmp.lt.s32.totalorder (!%p363_p2), %s848_s22, 1 }
   0x6   : > { %366 = sbr.rel (%p363_p2) target bundleno = 792 (0x318), region = 68 }
   0xb   : > { %vm417_vm0 = vcmask 256000   ;;  %v427_v0 = vlaneseq  ;;  %v935_v1 = vmov 0.0   ;;  %s1118_s22 = smov (!%p404_p3, %s848_s22), 1  ;;  %vm420_vm1 = vcmask 261120   ;;  %v426_v8 = vld [vmem:[%s1105_s1] sm:$0x7f] }
   0xc   : > { %418 = vst.msk [vmem:[#allocation2] sm:$0x7] %vm417_vm0, %v935_v1  ;;  %419 = vst.msk [vmem:[#allocation2 + $0x13] sm:$0x7] %vm417_vm0, %v935_v1  ;;  %883 = vmatprep.subr.bf16.mxu0 %v935_v1  ;;  %891 = vmatprep.subr.bf16.mxu1 %v935_v1  ;;  %s873_s10 = sshll.u32 %s1118_s22, 4  ;;  %vm445_vm2 = vcmask 1046528  }
   0xd   : > { %v428_v2 = vshrl.u32 %v427_v0, 7  ;;  %s408_s24 = scalar_lea.vmem %s1104_s0, %s873_s10  ;;  %vm465_vm3 = vcmask 1045504   ;;  %vm485_vm4 = vcmask 1044480   ;;  %vm505_vm5 = vcmask 1043456   ;;  %s413_s18 = scalar_lea.vmem %s1116_s12, %s873_s10 }
   0xe   : > { %v1022_v6 = vld [vmem:[%s408_s24] sm:$0xff]  ;;  %v1024_v7 = vld [vmem:[%s408_s24 + $0x8] sm:$0xff]  ;;  %vm525_vm6 = vcmask 1042432   ;;  %vm545_vm7 = vcmask 1041408   ;;  %vm936_vm8 = vmmov 0   ;;  %vm735_vm9 = vcmask 523264  }
   0xf   : > { %v429_v3 = vsub.s32 0, %v428_v2  ;;  %v437_v4 = vsub.s32 1, %v428_v2  ;;  %v457_v5 = vsub.s32 2, %v428_v2  ;;  %v477_v9 = vsub.s32 3, %v428_v2  ;;  %421 = vst.msk [vmem:[#allocation2 + $0x3] sm:$0xff] %vm420_vm1, %v1022_v6  ;;  %422 = vst.msk [vmem:[#allocation2 + $0xb] sm:$0xff] %vm420_vm1, %v1024_v7  ;;  %887 = vmatprep.mubr.msk.bf16.mxu0 %vm936_vm8, %v935_v1  ;;  %899 = vmatprep.mubr.msk.bf16.mxu1 %vm936_vm8, %v935_v1 }
  0x10   : > { %v497_v10 = vsub.s32 4, %v428_v2  ;;  %v517_v11 = vsub.s32 5, %v428_v2  ;;  %v537_v12 = vsub.s32 6, %v428_v2 }
  0x11   : > { %v430_v13 = vrot.slane %v426_v8, %v429_v3  ;;  %v438_v14 = vrot.slane %v426_v8, %v437_v4  ;;  %v458_v15 = vrot.slane %v426_v8, %v457_v5  ;;  %v478_v16 = vrot.slane %v426_v8, %v477_v9 }
  0x12   : > { %v498_v17 = vrot.slane %v426_v8, %v497_v10  ;;  %v518_v20 = vrot.slane %v426_v8, %v517_v11  ;;  %v538_v21 = vrot.slane %v426_v8, %v537_v12 }
  0x16   : > { %v423_v18 = vld [vmem:[#allocation2] sm:$0xff]  ;;  %v424_v19 = vld [vmem:[#allocation2 + $0x8] sm:$0xff]  ;;  %v425_v42 = vld [vmem:[#allocation2 + $0x10] sm:$0x3f] }
  0x17   : > { %v431_v22 = vmul.f32 %v430_v13, %v423_v18  ;;  %v439_v23 = vmul.f32 %v438_v14, %v423_v18  ;;  %v440_v24 = vmul.f32 %v438_v14, %v424_v19  ;;  %v459_v25 = vmul.f32 %v458_v15, %v423_v18 }
  0x18   : > { %v460_v26 = vmul.f32 %v458_v15, %v424_v19  ;;  %v479_v27 = vmul.f32 %v478_v16, %v423_v18  ;;  %v480_v28 = vmul.f32 %v478_v16, %v424_v19  ;;  %v499_v29 = vmul.f32 %v498_v17, %v423_v18 }
  0x19   : > { %v446_v30 = vrot.slane %v439_v23, 1  ;;  %v447_v31 = vrot.slane %v440_v24, 1  ;;  %v466_v32 = vrot.slane %v459_v25, 2  ;;  %v500_v33 = vmul.f32 %v498_v17, %v424_v19 }
  0x1a   : > { %v467_v34 = vrot.slane %v460_v26, 2  ;;  %v486_v35 = vrot.slane %v479_v27, 3  ;;  %v487_v36 = vrot.slane %v480_v28, 3  ;;  %v506_v37 = vrot.slane %v499_v29, 4 }
  0x1b   : > { %v448_v38 = vsel %vm445_vm2, %v446_v30, %v447_v31  ;;  %v507_v39 = vrot.slane %v500_v33, 4  ;;  %v519_v40 = vmul.f32 %v518_v20, %v423_v18  ;;  %v520_v41 = vmul.f32 %v518_v20, %v424_v19 }
  0x1c   : > { %v453_v43 = vadd.f32 %v448_v38, %v431_v22  ;;  %v468_v44 = vsel %vm465_vm3, %v466_v32, %v467_v34  ;;  %v539_v45 = vmul.f32 %v538_v21, %v423_v18  ;;  %v488_v46 = vsel %vm485_vm4, %v486_v35, %v487_v36 }
  0x1d   : > { %v526_v47 = vrot.slane %v519_v40, 5  ;;  %v527_v48 = vrot.slane %v520_v41, 5  ;;  %v540_v49 = vmul.f32 %v538_v21, %v424_v19  ;;  %v508_v51 = vsel %vm505_vm5, %v506_v37, %v507_v39  ;;  %v914_v40 = vld [vmem:[%s1109_s5] sm:$0xff]  }
  0x1e   : > { %v473_v50 = vadd.f32 %v468_v44, %v453_v43  ;;  %v546_v52 = vrot.slane %v539_v45, 6  ;;  %v441_v53 = vmul.f32 %v438_v14, %v425_v42  ;;  %v432_v55 = vmul.f32 %v430_v13, %v424_v19  ;;  %v857_v14 = vld [vmem:[%s1106_s2] ss:$0 sm:$0xff] }
  0x1f   : > { %v547_v54 = vrot.slane %v540_v49, 6  ;;  %v461_v56 = vmul.f32 %v458_v15, %v425_v42  ;;  %v481_v57 = vmul.f32 %v478_v16, %v425_v42  ;;  %v501_v60 = vmul.f32 %v498_v17, %v425_v42  ;;  %v858_v49 = vld [vmem:[%s1107_s3] ss:$0 sm:$0xff] }
  0x20   : > { %v493_v58 = vadd.f32 %v488_v46, %v473_v50  ;;  %v449_v59 = vrot.slane %v441_v53, 1  ;;  %v521_v61 = vmul.f32 %v518_v20, %v425_v42  ;;  %v528_v62 = vsel %vm525_vm6, %v526_v47, %v527_v48  ;;  %v859_v53 = vld [vmem:[%s1108_s4] ss:$0 sm:$0xff] }
  0x21   : > { %v469_v63 = vrot.slane %v461_v56, 2  ;;  %v489_v0 = vrot.slane %v481_v57, 3  ;;  %v509_v4 = vrot.slane %v501_v60, 4  ;;  %v541_v5 = vmul.f32 %v538_v21, %v425_v42  ;;  %v917_v60 = vld [vmem:[%s1111_s7 + $0x8] sm:$0xff]  }
  0x22   : > { %v513_v2 = vadd.f32 %v508_v51, %v493_v58  ;;  %v450_v3 = vsel %vm445_vm2, %v447_v31, %v449_v59  ;;  %v548_v8 = vsel %vm545_vm7, %v546_v52, %v547_v54  ;;  %v529_v13 = vrot.slane %v521_v61, 5  ;;  %v915_v58 = vld [vmem:[%s1111_s7 + $0x18] sm:$0xff]   ;;  %v916_v59 = vld [vmem:[%s1111_s7 + $0x10] sm:$0xff]   ;;  %v918_v61 = vld [vmem:[%s1111_s7] sm:$0xff]  }
  0x23   : > { %v454_v9 = vadd.f32 %v450_v3, %v432_v55  ;;  %v470_v10 = vsel %vm465_vm3, %v467_v34, %v469_v63  ;;  %v490_v12 = vsel %vm485_vm4, %v487_v36, %v489_v0  ;;  %v510_v17 = vsel %vm505_vm5, %v507_v39, %v509_v4  ;;  %v913_v39 = vld [vmem:[%s1109_s5 + $0x8] sm:$0xff]   ;;  %892 = vmatpush3.bf16.msra.mxu1 %v915_v58 }
  0x24   : > { %v533_v11 = vadd.f32 %v528_v62, %v513_v2  ;;  %v549_v18 = vrot.slane %v541_v5, 6  ;;  %v530_v21 = vsel %vm525_vm6, %v527_v48, %v529_v13  ;;  %884 = vmatpush3.bf16.msra.mxu0 %v913_v39  ;;  %893 = vmatprep.subr.bf16.mxu1 %v935_v1  ;;  %v860_v62 = vld [vmem:[%s1110_s6] ss:$0 sm:$0xff] }
  0x25   : > { %v474_v15 = vadd.f32 %v470_v10, %v454_v9  ;;  %885 = vmatprep.subr.bf16.mxu0 %v935_v1 }
  0x26   : > { %v553_v16 = vadd.f32 %v548_v8, %v533_v11  ;;  %v550_v24 = vsel %vm545_vm7, %v547_v54, %v549_v18 }
  0x27   : > { %v494_v19 = vadd.f32 %v490_v12, %v474_v15  ;;  %894 = vmatpush3.bf16.msra.mxu1 %v916_v59 }
  0x28   : > { %v562_v20 = vadd.f32 %v857_v14, %v553_v16  ;;  %886 = vmatpush3.bf16.msra.mxu0 %v914_v40  ;;  %895 = vmatprep.subr.bf16.mxu1 %v935_v1 }
  0x29   : > { %v514_v22 = vadd.f32 %v510_v17, %v494_v19 }
  0x2a   : > { %v564_v23 = vsel %vm420_vm1, %v562_v20, 0.0 }
  0x2b   : > { %565 = vadd.xlane.f32.xlu0 %v564_v23  ;;  %v534_v25 = vadd.f32 %v530_v21, %v514_v22  ;;  %896 = vmatpush3.bf16.msra.mxu1 %v917_v60 }
  0x2c   : > { %897 = vmatprep.subr.bf16.mxu1 %v935_v1 }
  0x2d   : > { %v554_v26 = vadd.f32 %v550_v24, %v534_v25 }
  0x2f   : > { %v563_v27 = vadd.f32 %v857_v14, %v554_v26  ;;  %898 = vmatpush3.bf16.msra.mxu1 %v918_v61  ;;  %v864_v26 = vld [vmem:[%s1112_s8] ss:$0 sm:$0xff] }
  0x31   : > { %v567_v28 = vsel %vm420_vm1, %v563_v27, 0.0 }
  0x32   : > { %568 = vadd.xlane.f32.xlu0 %v567_v28  ;;  %v870_v28 = vld [vmem:[%s1113_s9] ss:$0 sm:$0xff] }
  0xb4   : > { %v566_v29 = vpop.xlane.xlu0 %565 }
  0xb5   : > { %v571_v30 = vmul.f32 0.03125, %v566_v29 }
  0xb7   : > { %v573_v31 = vsub.f32 %v562_v20, %v571_v30 }
  0xb9   : > { %v575_v32 = vmul.f32 %v573_v31, %v573_v31 }
  0xbb   : > { %v569_v33 = vpop.xlane.xlu0 %568  ;;  %v577_v34 = vsel %vm420_vm1, %v575_v32, 0.0 }
  0xbc   : > { %v572_v35 = vmul.f32 0.03125, %v569_v33  ;;  %578 = vadd.xlane.f32.xlu1 %v577_v34 }
  0xbe   : > { %v574_v36 = vsub.f32 %v563_v27, %v572_v35 }
  0xc0   : > { %v576_v37 = vmul.f32 %v574_v36, %v574_v36 }
  0xc2   : > { %v580_v38 = vsel %vm420_vm1, %v576_v37, 0.0 }
  0xc3   : > { %581 = vadd.xlane.f32.xlu1 %v580_v38 }
 0x145   : > { %v579_v41 = vpop.xlane.xlu1 %578 }
 0x146   : > { %v583_v42 = vmul.f32 0.03125, %v579_v41 }
 0x148   : > { %v585_v43 = vadd.f32 1e-06, %v583_v42 }
 0x14a   : > { %919 = vrsqrt.f32 %v585_v43 }
 0x14c   : > { %v582_v44 = vpop.xlane.xlu1 %581 }
 0x14d   : > { %v584_v45 = vmul.f32 0.03125, %v582_v44 }
 0x14f   : > { %v586_v46 = vadd.f32 1e-06, %v584_v45 }
 0x151   : > { %921 = vrsqrt.f32 %v586_v46 }
 0x157   : > { %v920_v47 = vpop.eup %919 }
 0x158   : > { %v589_v48 = vmul.f32 %v920_v47, %v573_v31 }
 0x15a   : > { %v598_v52 = vmul.f32 %v858_v49, %v589_v48 }
 0x15c   : > { %v607_v55 = vadd.f32 %v859_v53, %v598_v52 }
 0x15e   : > { %v922_v50 = vpop.eup %921 }
 0x15f   : > { %v590_v51 = vmul.f32 %v922_v50, %v574_v36 }
 0x161   : > { %v599_v54 = vmul.f32 %v858_v49, %v590_v51 }
 0x163   : > { %v608_v56 = vadd.f32 %v859_v53, %v599_v54 }
 0x165   : > { %v609_v57 = vpack.c.bf16 %v608_v56, %v607_v55 }
 0x167   : > { %888 = vmatmul.mubr.msk.bf16.vlgmr.msra.gmra.mxu0 %vm420_vm1, %v609_v57 }
 0x227   : > { %v670_v63 = vpop.f32.mrf.mxu0 }
 0x228   : > { %v671_v0 = vadd.f32 %v860_v62, %v670_v63 }
 0x229   : > { %v889_v2 = vpop.f32.mrf.mxu0 }
 0x22a   : > { %v679_v3 = vmul.f32 0.044715, %v671_v0  ;;  %v677_v20 = vmul.f32 0.5, %v671_v0 }
 0x22b   : > { %v673_v4 = vpop.f32.mrf.mxu0 }
 0x22c   : > { %v681_v5 = vmul.f32 %v679_v3, %v671_v0  ;;  %v674_v8 = vadd.f32 %v860_v62, %v673_v4 }
 0x22d   : > { %v890_v9 = vpop.f32.mrf.mxu0 }
 0x22e   : > { %v683_v10 = vmul.f32 %v681_v5, %v671_v0  ;;  %v680_v11 = vmul.f32 0.044715, %v674_v8  ;;  %v678_v21 = vmul.f32 0.5, %v674_v8 }
 0x230   : > { %v685_v12 = vadd.f32 %v683_v10, %v671_v0  ;;  %v682_v13 = vmul.f32 %v680_v11, %v674_v8 }
 0x232   : > { %v687_v14 = vmul.f32 0.7978846, %v685_v12  ;;  %v684_v15 = vmul.f32 %v682_v13, %v674_v8 }
 0x234   : > { %923 = vtanh.f32 %v687_v14  ;;  %v686_v1 = vadd.f32 %v684_v15, %v674_v8 }
 0x236   : > { %v688_v16 = vmul.f32 0.7978846, %v686_v1 }
 0x238   : > { %925 = vtanh.f32 %v688_v16 }
 0x241   : > { %v924_v17 = vpop.eup %923 }
 0x242   : > { %v691_v18 = vadd.f32 1.0, %v924_v17 }
 0x244   : > { %v693_v23 = vmul.f32 %v691_v18, %v677_v20 }
 0x245   : > { %v926_v19 = vpop.eup %925 }
 0x246   : > { %v692_v22 = vadd.f32 1.0, %v926_v19 }
 0x248   : > { %v694_v24 = vmul.f32 %v692_v22, %v678_v21 }
 0x24a   : > { %v695_v25 = vpack.c.bf16 %v694_v24, %v693_v23 }
 0x24c   : > { %900 = vmatmul.mubr.msk.bf16.vlgmr.msra.gmra.mxu1 %vm735_vm9, %v695_v25 }
 0x30c   : > { %v773_v27 = vpop.f32.mrf.mxu1 }
 0x30d   : > { %v774_v29 = vadd.f32 %v864_v26, %v773_v27 }
 0x30e   : > { %v901_v30 = vpop.f32.mrf.mxu1 }
 0x30f   : > { %v787_v31 = vmul.f32 %v870_v28, %v774_v29 }
 0x310   : > { %v776_v32 = vpop.f32.mrf.mxu1 }
 0x311   : > { %v789_v33 = vadd.f32 %v787_v31, %v1022_v6  ;;  %v777_v34 = vadd.f32 %v864_v26, %v776_v32 }
 0x312   : > { %v902_v35 = vpop.f32.mrf.mxu1 }
 0x313   : > { %791 = vst.msk [vmem:[%s413_s18] sm:$0xff] %vm420_vm1, %v789_v33  ;;  %v788_v36 = vmul.f32 %v870_v28, %v777_v34 }
 0x315   : > { %v790_v37 = vadd.f32 %v788_v36, %v1024_v7 }
 0x317   : > { %792 = vst.msk [vmem:[%s413_s18 + $0x8] sm:$0xff] %vm420_vm1, %v790_v37 }
 0x318 PF: > { %s22_s21 = sadd.s32 1, %s933_s21  }
 0x319   : > { %p19_p4 = scmp.ge.s32.totalorder %s22_s21, 4  }
 0x31b   :  { %21 = sbr.rel (!%p19_p4) target bundleno = 1 (0x1), region = 98 }

// kernel: vocos_backbone_forward.19
= control target key start
LH: loop header
LB: loop body
LE: loop exit
PB: predicated region body
PF: predicated region fallthrough
CT: control target
= control target key end

     0   :  { %s1352_s0 = inlined_call_operand.vmem [shape: f32[2,16,32], index: 0, kind: input, shape index: {}]   ;;  %s1353_s1 = inlined_call_operand.vmem [shape: f32[7,32], index: 1, kind: input, shape index: {}]   ;;  %s1354_s2 = inlined_call_operand.vmem [shape: f32[1,32], index: 2, kind: input, shape index: {}]   ;;  %s1355_s3 = inlined_call_operand.vmem [shape: f32[1,32], index: 3, kind: input, shape index: {}]   ;;  %s1356_s4 = inlined_call_operand.vmem [shape: f32[1,32], index: 4, kind: input, shape index: {}]   ;;  %s1357_s5 = inlined_call_operand.vmem [shape: bf16[32,64], index: 5, kind: input, shape index: {}]   ;;  %s1358_s6 = inlined_call_operand.vmem [shape: f32[1,64], index: 6, kind: input, shape index: {}]   ;;  %s1359_s7 = inlined_call_operand.vmem [shape: bf16[64,32], index: 7, kind: input, shape index: {}]   ;;  %s1360_s8 = inlined_call_operand.vmem [shape: f32[1,32], index: 8, kind: input, shape index: {}]   ;;  %s1361_s9 = inlined_call_operand.vmem [shape: f32[1,32], index: 9, kind: input, shape index: {}]   ;;  %s1362_s10 = inlined_call_operand.vmem [shape: f32[1,32], index: 10, kind: input, shape index: {}]   ;;  %s1363_s11 = inlined_call_operand.vmem [shape: f32[1,32], index: 11, kind: input, shape index: {}]   ;;  %s1364_s12 = inlined_call_operand.hbm [shape: f32[2,16,32], index: 12, kind: output, shape index: {}]  }
   0x1   :  { %1365 = sst [smem:[#allocation6_spill]] %s1352_s0 }
   0x2   :  { %1366 = sst [smem:[#allocation7_spill]] %s1353_s1 }
   0x3   :  { %17 = vsyncpa [#allocation4], 0 }
   0x4   :  { %19 = vsyncpa [#allocation4 + $0x1], 0  ;;  %s1162_s21 = smov 0   ;;  %s1164_s22 = smov 0  }
   0x5   :  { %s1166_s23 = smov 0   ;;  %s1168_s24 = smov 0  }
   0x6 LB: > { %s1183_s25 = sadd.s32 4294967295, %s1090_s24   ;;  %s911_s26 = sadd.s32 4294967294, %s1090_s24   ;;  %s1090_s24 = sphi %s1168_s24, %s1374_s24   ;;  %s1086_s23 = sphi %s1166_s23, %s1373_s23   ;;  %s1082_s22 = sphi %s1164_s22, %s1372_s22   ;;  %s1078_s21 = sphi %s1162_s21, %s1371_s21  }
   0x7   : > { %s1187_s27 = sadd.s32 1, %s1090_s24   ;;  %s289_s28 = sadd.s32 1, %s1086_s23 }
   0x8   : > { %s286_s29 = ssub.s32 %s1090_s24, %s1187_s27  ;;  %p299_p0 = scmp.ne.s32.totalorder %s1086_s23, %s1082_s22 }
   0x9   : > { %p287_p1 = scmp.eq.s32.totalorder %s286_s29, 0  ;;  %p300_p2 = scmp.eq.s32.totalorder %s1183_s25, 1 }
   0xa   : > { %p305_p3 = scmp.ne.s32.totalorder %s1082_s22, %s1078_s21  ;;  %p306_p4 = scmp.eq.s32.totalorder %s911_s26, 1 }
   0xb   : > { %s1198_s30 = scalar_select %p287_p1, %s1086_s23, %s289_s28  }
   0xc   : > { %p1200_p5 = por %p300_p2, %p299_p0  ;;  %p1204_p6 = por %p306_p4, %p305_p3 }
   0xd   : > { %p914_p7 = scmp.ge.s32.totalorder %s1090_s24, 1  ;;  %p365_p8 = scmp.lt.s32.totalorder %s1090_s24, 3 }
   0xf   : > { %p366_p9 = pnand %p914_p7, %p365_p8 }
  0x10   : > { %p407_p10 = scmp.lt.s32.totalorder (!%p366_p9), %s1183_s25, 1  ;;  %s1369_s0 = sld [smem:[#allocation6_spill]] (!%p366_p9) }
  0x11   : > { %369 = sbr.rel (%p366_p9) target bundleno = 1125 (0x465), region = 68  ;;  %s1370_s1 = sld [smem:[#allocation7_spill]] (!%p366_p9) }
  0x16   : > { %vm415_vm0 = vcmask 256000   ;;  %v425_v0 = vlaneseq  ;;  %v1092_v1 = vmov 0.0   ;;  %s408_s15 = scalar_select %p407_p10, %s1183_s25, 1  ;;  %vm418_vm1 = vcmask 261120  }
  0x17   : > { %416 = vst.msk [vmem:[#allocation2] sm:$0x7] %vm415_vm0, %v1092_v1  ;;  %417 = vst.msk [vmem:[#allocation2 + $0x13] sm:$0x7] %vm415_vm0, %v1092_v1  ;;  %949 = vmatprep.subr.bf16.mxu0 %v1092_v1  ;;  %957 = vmatprep.subr.bf16.mxu1 %v1092_v1  ;;  %v424_v8 = vld [vmem:[%s1370_s1] sm:$0x7f] }
  0x18   : > { %v426_v2 = vshrl.u32 %v425_v0, 7  ;;  %s939_s16 = sshll.u32 %s408_s15, 4  ;;  %vm443_vm2 = vcmask 1046528   ;;  %vm463_vm3 = vcmask 1045504   ;;  %vm483_vm4 = vcmask 1044480  }
  0x19   : > { %s411_s19 = scalar_lea.vmem %s1369_s0, %s939_s16  ;;  %vm503_vm5 = vcmask 1043456   ;;  %vm523_vm6 = vcmask 1042432   ;;  %vm543_vm7 = vcmask 1041408   ;;  %vm1093_vm8 = vmmov 0   ;;  %s940_s16 = sshll.u32 %s1183_s25, 8 }
  0x1a   : > { %v427_v3 = vsub.s32 0, %v426_v2  ;;  %v435_v4 = vsub.s32 1, %v426_v2  ;;  %v455_v5 = vsub.s32 2, %v426_v2  ;;  %v1219_v6 = vld [vmem:[%s411_s19] sm:$0xff]  ;;  %v1221_v7 = vld [vmem:[%s411_s19 + $0x8] sm:$0xff]  ;;  %v475_v9 = vsub.s32 3, %v426_v2  ;;  %953 = vmatprep.mubr.msk.bf16.mxu0 %vm1093_vm8, %v1092_v1  ;;  %965 = vmatprep.mubr.msk.bf16.mxu1 %vm1093_vm8, %v1092_v1  ;;  %s1307_s26 = scalar_lea.hbm %s1364_s12, %s940_s16 }
  0x1b   : > { %v495_v10 = vsub.s32 4, %v426_v2  ;;  %419 = vst.msk [vmem:[#allocation2 + $0x3] sm:$0xff] %vm418_vm1, %v1219_v6  ;;  %420 = vst.msk [vmem:[#allocation2 + $0xb] sm:$0xff] %vm418_vm1, %v1221_v7  ;;  %v515_v11 = vsub.s32 5, %v426_v2  ;;  %v535_v12 = vsub.s32 6, %v426_v2  ;;  %vm733_vm9 = vcmask 523264  }
  0x1c   : > { %v428_v13 = vrot.slane %v424_v8, %v427_v3  ;;  %v436_v14 = vrot.slane %v424_v8, %v435_v4  ;;  %v456_v15 = vrot.slane %v424_v8, %v455_v5  ;;  %v476_v16 = vrot.slane %v424_v8, %v475_v9  ;;  %s404_s19 = sand.u32 1, %s1082_s22  }
  0x1d   : > { %v496_v17 = vrot.slane %v424_v8, %v495_v10  ;;  %v516_v20 = vrot.slane %v424_v8, %v515_v11  ;;  %v536_v21 = vrot.slane %v424_v8, %v535_v12  ;;  %s915_s28 = sshll.u32 %s404_s19, 4  ;;  %s1312_s29 = scalar_lea.sflag [#allocation4], %s404_s19 }
  0x1e   : > { %s406_s17 = scalar_lea.vmem [#allocation3], %s915_s28  ;;  %s1094_s28 = smov [#allocation3]  }
  0x1f   : > { %s849_s18 = sshll.u32 %s406_s17, 4  ;;  %s1034_s15 = sshll.u32 %s1094_s28, 4  ;;  %s1309_s18 = int_to_ptr.vmem [resolvable:$true] %s849_s18  ;;  %s1035_s15 = int_to_ptr.vmem [resolvable:$false] %s1034_s15 }
  0x20   : > { %s1030_s25 = scalar_lea.vmem %s1309_s18, 256  ;;  %s1036_s0 = scalar_lea.vmem %s1035_s15, 512 }
  0x21   : > { %p1031_p11 = scmp.ne.s32.totalorder %s1309_s18, %s1030_s25  ;;  %p1037_p0 = scmp.lt.s32.totalorder %s1309_s18, %s1035_s15 }
  0x22   : > { %v421_v18 = vld [vmem:[#allocation2] sm:$0xff]  ;;  %v422_v19 = vld [vmem:[#allocation2 + $0x8] sm:$0xff]  ;;  %v423_v42 = vld [vmem:[#allocation2 + $0x10] sm:$0x3f]  ;;  %p1038_p1 = scmp.lt.s32.totalorder %s1036_s0, %s1030_s25 }
  0x23   : > { %v429_v22 = vmul.f32 %v428_v13, %v421_v18  ;;  %v437_v23 = vmul.f32 %v436_v14, %v421_v18  ;;  %v438_v24 = vmul.f32 %v436_v14, %v422_v19  ;;  %v457_v25 = vmul.f32 %v456_v15, %v421_v18  ;;  %p1032_p12 = pnand %p1031_p11, %p1200_p5 }
  0x24   : > { %v458_v26 = vmul.f32 %v456_v15, %v422_v19  ;;  %v477_v27 = vmul.f32 %v476_v16, %v421_v18  ;;  %v478_v28 = vmul.f32 %v476_v16, %v422_v19  ;;  %v497_v29 = vmul.f32 %v496_v17, %v421_v18  ;;  %p1039_p2 = por %p1038_p1, %p1037_p0 }
  0x25   : > { %v444_v30 = vrot.slane %v437_v23, 1  ;;  %v445_v31 = vrot.slane %v438_v24, 1  ;;  %v464_v32 = vrot.slane %v457_v25, 2  ;;  %v498_v33 = vmul.f32 %v496_v17, %v422_v19  ;;  %p1033_p13 = pneg %p1032_p12 }
  0x26   : > { %v465_v34 = vrot.slane %v458_v26, 2  ;;  %v484_v35 = vrot.slane %v477_v27, 3  ;;  %v485_v36 = vrot.slane %v478_v28, 3  ;;  %v504_v37 = vrot.slane %v497_v29, 4 }
  0x27   : > { %v446_v38 = vsel %vm443_vm2, %v444_v30, %v445_v31  ;;  %v505_v39 = vrot.slane %v498_v33, 4  ;;  %v517_v40 = vmul.f32 %v516_v20, %v421_v18  ;;  %v518_v41 = vmul.f32 %v516_v20, %v422_v19  ;;  %p1040_p3 = pnand %p1039_p2, %p1033_p13 }
  0x28   : > { %v451_v43 = vadd.f32 %v446_v38, %v429_v22  ;;  %v466_v44 = vsel %vm463_vm3, %v464_v32, %v465_v34  ;;  %v537_v45 = vmul.f32 %v536_v21, %v421_v18  ;;  %v486_v46 = vsel %vm483_vm4, %v484_v35, %v485_v36 }
  0x29   : > { %v524_v47 = vrot.slane %v517_v40, 5  ;;  %v525_v48 = vrot.slane %v518_v41, 5  ;;  %v538_v49 = vmul.f32 %v536_v21, %v422_v19  ;;  %v506_v51 = vsel %vm503_vm5, %v504_v37, %v505_v39  ;;  %v1013_v40 = vld [vmem:[%s1357_s5] sm:$0xff]  }
  0x2a   : > { %v471_v50 = vadd.f32 %v466_v44, %v451_v43  ;;  %v544_v52 = vrot.slane %v537_v45, 6  ;;  %v439_v53 = vmul.f32 %v436_v14, %v423_v42  ;;  %v430_v55 = vmul.f32 %v428_v13, %v422_v19  ;;  %v918_v14 = vld [vmem:[%s1354_s2] ss:$0 sm:$0xff] }
  0x2b   : > { %v545_v54 = vrot.slane %v538_v49, 6  ;;  %v459_v56 = vmul.f32 %v456_v15, %v423_v42  ;;  %v479_v57 = vmul.f32 %v476_v16, %v423_v42  ;;  %v499_v60 = vmul.f32 %v496_v17, %v423_v42  ;;  %v919_v49 = vld [vmem:[%s1355_s3] ss:$0 sm:$0xff] }
  0x2c   : > { %v491_v58 = vadd.f32 %v486_v46, %v471_v50  ;;  %v447_v59 = vrot.slane %v439_v53, 1  ;;  %v519_v61 = vmul.f32 %v516_v20, %v423_v42  ;;  %v526_v62 = vsel %vm523_vm6, %v524_v47, %v525_v48  ;;  %v920_v53 = vld [vmem:[%s1356_s4] ss:$0 sm:$0xff] }
  0x2d   : > { %v467_v63 = vrot.slane %v459_v56, 2  ;;  %v487_v0 = vrot.slane %v479_v57, 3  ;;  %v507_v4 = vrot.slane %v499_v60, 4  ;;  %v539_v5 = vmul.f32 %v536_v21, %v423_v42  ;;  %v1016_v60 = vld [vmem:[%s1359_s7 + $0x8] sm:$0xff]  }
  0x2e   : > { %v511_v2 = vadd.f32 %v506_v51, %v491_v58  ;;  %v448_v3 = vsel %vm443_vm2, %v445_v31, %v447_v59  ;;  %v546_v8 = vsel %vm543_vm7, %v544_v52, %v545_v54  ;;  %v527_v13 = vrot.slane %v519_v61, 5  ;;  %v1014_v58 = vld [vmem:[%s1359_s7 + $0x18] sm:$0xff]   ;;  %v1015_v59 = vld [vmem:[%s1359_s7 + $0x10] sm:$0xff]   ;;  %v1017_v61 = vld [vmem:[%s1359_s7] sm:$0xff]  }
  0x2f   : > { %v452_v9 = vadd.f32 %v448_v3, %v430_v55  ;;  %v468_v10 = vsel %vm463_vm3, %v465_v34, %v467_v63  ;;  %v488_v12 = vsel %vm483_vm4, %v485_v36, %v487_v0  ;;  %v508_v17 = vsel %vm503_vm5, %v505_v39, %v507_v4  ;;  %v1012_v39 = vld [vmem:[%s1357_s5 + $0x8] sm:$0xff]   ;;  %958 = vmatpush3.bf16.msra.mxu1 %v1014_v58 }
  0x30   : > { %v531_v11 = vadd.f32 %v526_v62, %v511_v2  ;;  %v547_v18 = vrot.slane %v539_v5, 6  ;;  %v528_v21 = vsel %vm523_vm6, %v525_v48, %v527_v13  ;;  %950 = vmatpush3.bf16.msra.mxu0 %v1012_v39  ;;  %959 = vmatprep.subr.bf16.mxu1 %v1092_v1  ;;  %v921_v62 = vld [vmem:[%s1358_s6] ss:$0 sm:$0xff] }
  0x31   : > { %v472_v15 = vadd.f32 %v468_v10, %v452_v9  ;;  %951 = vmatprep.subr.bf16.mxu0 %v1092_v1 }
  0x32   : > { %v551_v16 = vadd.f32 %v546_v8, %v531_v11  ;;  %v548_v24 = vsel %vm543_vm7, %v545_v54, %v547_v18 }
  0x33   : > { %v492_v19 = vadd.f32 %v488_v12, %v472_v15  ;;  %960 = vmatpush3.bf16.msra.mxu1 %v1015_v59 }
  0x34   : > { %v560_v20 = vadd.f32 %v918_v14, %v551_v16  ;;  %952 = vmatpush3.bf16.msra.mxu0 %v1013_v40  ;;  %961 = vmatprep.subr.bf16.mxu1 %v1092_v1 }
  0x35   : > { %v512_v22 = vadd.f32 %v508_v17, %v492_v19 }
  0x36   : > { %v562_v23 = vsel %vm418_vm1, %v560_v20, 0.0 }
  0x37   : > { %563 = vadd.xlane.f32.xlu0 %v562_v23  ;;  %v532_v25 = vadd.f32 %v528_v21, %v512_v22  ;;  %962 = vmatpush3.bf16.msra.mxu1 %v1016_v60 }
  0x38   : > { %963 = vmatprep.subr.bf16.mxu1 %v1092_v1 }
  0x39   : > { %v552_v26 = vadd.f32 %v548_v24, %v532_v25 }
  0x3b   : > { %v561_v27 = vadd.f32 %v918_v14, %v552_v26  ;;  %964 = vmatpush3.bf16.msra.mxu1 %v1017_v61  ;;  %v925_v26 = vld [vmem:[%s1360_s8] ss:$0 sm:$0xff] }
  0x3d   : > { %v565_v28 = vsel %vm418_vm1, %v561_v27, 0.0 }
  0x3e   : > { %566 = vadd.xlane.f32.xlu0 %v565_v28  ;;  %v931_v28 = vld [vmem:[%s1361_s9] ss:$0 sm:$0xff] }
  0xc0   : > { %v564_v29 = vpop.xlane.xlu0 %563 }
  0xc1   : > { %v569_v30 = vmul.f32 0.03125, %v564_v29 }
  0xc3   : > { %v571_v31 = vsub.f32 %v560_v20, %v569_v30 }
  0xc5   : > { %v573_v32 = vmul.f32 %v571_v31, %v571_v31 }
  0xc7   : > { %v567_v33 = vpop.xlane.xlu0 %566  ;;  %v575_v34 = vsel %vm418_vm1, %v573_v32, 0.0 }
  0xc8   : > { %v570_v35 = vmul.f32 0.03125, %v567_v33  ;;  %576 = vadd.xlane.f32.xlu1 %v575_v34 }
  0xca   : > { %v572_v36 = vsub.f32 %v561_v27, %v570_v35 }
  0xcc   : > { %v574_v37 = vmul.f32 %v572_v36, %v572_v36 }
  0xce   : > { %v578_v38 = vsel %vm418_vm1, %v574_v37, 0.0 }
  0xcf   : > { %579 = vadd.xlane.f32.xlu1 %v578_v38 }
 0x151   : > { %v577_v41 = vpop.xlane.xlu1 %576 }
 0x152   : > { %v581_v42 = vmul.f32 0.03125, %v577_v41 }
 0x154   : > { %v583_v43 = vadd.f32 1e-06, %v581_v42 }
 0x156   : > { %1018 = vrsqrt.f32 %v583_v43 }
 0x158   : > { %v580_v44 = vpop.xlane.xlu1 %579 }
 0x159   : > { %v582_v45 = vmul.f32 0.03125, %v580_v44 }
 0x15b   : > { %v584_v46 = vadd.f32 1e-06, %v582_v45 }
 0x15d   : > { %1020 = vrsqrt.f32 %v584_v46 }
 0x163   : > { %v1019_v47 = vpop.eup %1018 }
 0x164   : > { %v587_v48 = vmul.f32 %v1019_v47, %v571_v31 }
 0x166   : > { %v596_v52 = vmul.f32 %v919_v49, %v587_v48 }
 0x168   : > { %v605_v55 = vadd.f32 %v920_v53, %v596_v52 }
 0x16a   : > { %v1021_v50 = vpop.eup %1020 }
 0x16b   : > { %v588_v51 = vmul.f32 %v1021_v50, %v572_v36 }
 0x16d   : > { %v597_v54 = vmul.f32 %v919_v49, %v588_v51 }
 0x16f   : > { %v606_v56 = vadd.f32 %v920_v53, %v597_v54 }
 0x171   : > { %v607_v57 = vpack.c.bf16 %v606_v56, %v605_v55  ;;  %v932_v55 = vld [vmem:[%s1362_s10] ss:$0 sm:$0xff] }
 0x173   : > { %954 = vmatmul.mubr.msk.bf16.vlgmr.msra.gmra.mxu0 %vm418_vm1, %v607_v57  ;;  %v933_v57 = vld [vmem:[%s1363_s11] ss:$0 sm:$0xff] }
 0x233   : > { %v668_v63 = vpop.f32.mrf.mxu0 }
 0x234   : > { %v669_v0 = vadd.f32 %v921_v62, %v668_v63 }
 0x235   : > { %v955_v2 = vpop.f32.mrf.mxu0 }
 0x236   : > { %v677_v3 = vmul.f32 0.044715, %v669_v0  ;;  %v675_v20 = vmul.f32 0.5, %v669_v0 }
 0x237   : > { %v671_v4 = vpop.f32.mrf.mxu0 }
 0x238   : > { %v679_v5 = vmul.f32 %v677_v3, %v669_v0  ;;  %v672_v8 = vadd.f32 %v921_v62, %v671_v4 }
 0x239   : > { %v956_v9 = vpop.f32.mrf.mxu0 }
 0x23a   : > { %v681_v10 = vmul.f32 %v679_v5, %v669_v0  ;;  %v678_v11 = vmul.f32 0.044715, %v672_v8  ;;  %v676_v21 = vmul.f32 0.5, %v672_v8 }
 0x23c   : > { %v683_v12 = vadd.f32 %v681_v10, %v669_v0  ;;  %v680_v13 = vmul.f32 %v678_v11, %v672_v8 }
 0x23e   : > { %v685_v14 = vmul.f32 0.7978846, %v683_v12  ;;  %v682_v15 = vmul.f32 %v680_v13, %v672_v8 }
 0x240   : > { %1022 = vtanh.f32 %v685_v14  ;;  %v684_v1 = vadd.f32 %v682_v15, %v672_v8 }
 0x242   : > { %v686_v16 = vmul.f32 0.7978846, %v684_v1 }
 0x244   : > { %1024 = vtanh.f32 %v686_v16 }
 0x24d   : > { %v1023_v17 = vpop.eup %1022 }
 0x24e   : > { %v689_v18 = vadd.f32 1.0, %v1023_v17 }
 0x250   : > { %v691_v23 = vmul.f32 %v689_v18, %v675_v20 }
 0x251   : > { %v1025_v19 = vpop.eup %1024 }
 0x252   : > { %v690_v22 = vadd.f32 1.0, %v1025_v19 }
 0x254   : > { %v692_v24 = vmul.f32 %v690_v22, %v676_v21 }
 0x256   : > { %v693_v25 = vpack.c.bf16 %v692_v24, %v691_v23 }
 0x258   : > { %966 = vmatmul.mubr.msk.bf16.vlgmr.msra.gmra.mxu1 %vm733_vm9, %v693_v25 }
 0x318   : > { %v771_v27 = vpop.f32.mrf.mxu1 }
 0x319   : > { %v772_v29 = vadd.f32 %v925_v26, %v771_v27 }
 0x31a   : > { %v967_v30 = vpop.f32.mrf.mxu1 }
 0x31b   : > { %v785_v31 = vmul.f32 %v931_v28, %v772_v29 }
 0x31c   : > { %v774_v32 = vpop.f32.mrf.mxu1 }
 0x31d   : > { %v775_v33 = vadd.f32 %v925_v26, %v774_v32  ;;  %v787_v34 = vadd.f32 %v785_v31, %v1219_v6 }
 0x31e   : > { %v968_v35 = vpop.f32.mrf.mxu1 }
 0x31f   : > { %v786_v36 = vmul.f32 %v931_v28, %v775_v33  ;;  %v789_v37 = vsel %vm418_vm1, %v787_v34, 0.0 }
 0x320   : > { %790 = vadd.xlane.f32.xlu0 %v789_v37 }
 0x321   : > { %v788_v38 = vadd.f32 %v786_v36, %v1221_v7 }
 0x323   : > { %v792_v39 = vsel %vm418_vm1, %v788_v38, 0.0 }
 0x324   : > { %793 = vadd.xlane.f32.xlu1 %v792_v39 }
 0x3a9   : > { %v791_v40 = vpop.xlane.xlu0 %790 }
 0x3aa   : > { %v795_v41 = vmul.f32 0.03125, %v791_v40 }
 0x3ac   : > { %v797_v42 = vsub.f32 %v787_v34, %v795_v41 }
 0x3ad   : > { %v794_v43 = vpop.xlane.xlu1 %793 }
 0x3ae   : > { %v796_v44 = vmul.f32 0.03125, %v794_v43  ;;  %v799_v45 = vmul.f32 %v797_v42, %v797_v42 }
 0x3b0   : > { %v798_v46 = vsub.f32 %v788_v38, %v796_v44  ;;  %v801_v6 = vsel %vm418_vm1, %v799_v45, 0.0 }
 0x3b1   : > { %802 = vadd.xlane.f32.xlu0 %v801_v6 }
 0x3b2   : > { %v800_v47 = vmul.f32 %v798_v46, %v798_v46 }
 0x3b4   : > { %v804_v48 = vsel %vm418_vm1, %v800_v47, 0.0 }
 0x3b5   : > { %805 = vadd.xlane.f32.xlu1 %v804_v48 }
 0x43a   : > { %v803_v49 = vpop.xlane.xlu0 %802 }
 0x43b   : > { %v807_v7 = vmul.f32 0.03125, %v803_v49 }
 0x43d   : > { %v809_v50 = vadd.f32 1e-06, %v807_v7 }
 0x43e   : > { %v806_v51 = vpop.xlane.xlu1 %805 }
 0x43f   : > { %1026 = vrsqrt.f32 %v809_v50  ;;  %v808_v52 = vmul.f32 0.03125, %v806_v51 }
 0x441   : > { %v810_v53 = vadd.f32 1e-06, %v808_v52 }
 0x443   : > { %1028 = vrsqrt.f32 %v810_v53 }
 0x44c   : > { %v1027_v54 = vpop.eup %1026 }
 0x44d   : > { %v813_v56 = vmul.f32 %v1027_v54, %v797_v42 }
 0x44f   : > { %v822_v58 = vmul.f32 %v932_v55, %v813_v56 }
 0x450   : > { %v1029_v59 = vpop.eup %1028 }
 0x451   : > { %v814_v60 = vmul.f32 %v1029_v59, %v798_v46  ;;  %v831_v61 = vadd.f32 %v933_v57, %v822_v58 }
 0x453   : > { %v823_v62 = vmul.f32 %v932_v55, %v814_v60  ;;  %833 = vst.msk [vmem:[%s406_s17] sm:$0xff] %vm418_vm1, %v831_v61 }
 0x455   : > { %v832_v63 = vadd.f32 %v933_v57, %v823_v62 }
 0x457   : > { %834 = vst.msk [vmem:[%s406_s17 + $0x8] sm:$0xff] %vm418_vm1, %v832_v63 }
 0x458   : > { %1043 = shalt.err (!%p1040_p3)
}
 0x459   : > { %s1044_s19 = scalar_lea.hbm %s1307_s26, 256  ;;  %s1048_s20 = scalar_lea.hbm %s1364_s12, 512 }
 0x45a   : > { %p1045_p4 = scmp.ne.s32.totalorder %s1307_s26, %s1044_s19  ;;  %p1049_p9 = scmp.lt.s32.totalorder %s1307_s26, %s1364_s12 }
 0x45b   : > { %p1050_p10 = scmp.lt.s32.totalorder %s1048_s20, %s1044_s19 }
 0x45c   : > { %p1046_p7 = pnand %p1045_p4, %p1200_p5 }
 0x45d   : > { %p1051_p11 = por %p1050_p10, %p1049_p9 }
 0x45e   : > { %p1047_p8 = pneg %p1046_p7 }
 0x460   : > { %p1052_p12 = pnand %p1051_p11, %p1047_p8 }
 0x462   : > { %1055 = shalt.err (!%p1052_p12)
}
 0x463   : > { %s1095_s25 = smov 128   ;;  %s1096_s15 = smov 8  }
 0x464   : > { %969 = dma.vmem_to_hbm [thread:$0]  (%p1200_p5), %s1309_s18, 256, %s1307_s26, %s1312_s29, %s1095_s25, %s1095_s25, %s1096_s15  }
 0x465 PF: > { %p975_p13 = scmp.ge.s32.totalorder %s1090_s24, 2  ;;  %s864_s0 = sand.u32 1, %s1078_s21  }
 0x466   : > { %s865_s1 = scalar_lea.sflag [#allocation4], %s864_s0 }
 0x467   : > { %p972_p0 = pnand %p975_p13, %p1204_p6 }
 0x469   : > { %p973_p1 = pneg %p972_p0 }
 0x46b   : > { %1073 = dma.done.wait (%p973_p1), %s865_s1, 256  }
 0x46c   : > { %1075 = vsyncadd (%p973_p1), %s865_s1, 4294967040  ;;  %p22_p2 = scmp.ge.s32.totalorder %s1187_s27, 4   ;;  %s1371_s21 = smov %s1082_s22 }
 0x46d   : > { %s1372_s22 = smov %s1086_s23  ;;  %s1373_s23 = smov %s1198_s30 }
 0x46e   : > { %s1374_s24 = smov %s1187_s27  ;;  %24 = sbr.rel (!%p22_p2) target bundleno = 6 (0x6), region = 103 }
 0x473   :  { %870 = vsyncpa [#allocation4], 1 }
 0x474   :  { %872 = vsyncpa [#allocation4 + $0x1], 1 }

</bundles_post_ra>
